<compile_context>
chip_gen: v5e
topology: v5e:2x2
jax: 0.10.0
libtpu: 0.0.40
codegen_flags: <defaults>
</compile_context>

<pallas_src>
import jax
import jax.numpy as jnp
from jax.experimental import pallas as pl
from jax.experimental.pallas import tpu as pltpu

LRELU_SLOPE = 0.2
BN_EPS = 1e-5
VMEM_LIMIT = 48 * 1024 * 1024   # <= 64 MiB/TC physical on v7x; fine on v5e/v6e


def _round_up(x, m):
    return (x + m - 1) // m * m


# ------------------------------ Pallas kernels -------------------------------

def _make_conv_lrelu_kernel(ws):
    """Stride-2 4x4 conv (s2d wide-row formulation) fused with LeakyReLU(0.2)."""
    offs = (0, 1, ws, ws + 1)              # taps (di,dj) in {0,1}^2 -> di*ws+dj

    def kernel(x_ref, w_ref, o_ref):
        # x_ref: (1, r_in, 4*Cin) bf16   w_ref: (4, 4*Cin, Cout) bf16 (resident)
        # o_ref: (1, r_out, Cout) bf16
        r_out = o_ref.shape[1]
        acc = jnp.dot(x_ref[0, 0:r_out, :], w_ref[0],
                      preferred_element_type=jnp.float32)
        for t in range(1, 4):
            off = offs[t]
            acc = acc + jnp.dot(x_ref[0, off:off + r_out, :], w_ref[t],
                                preferred_element_type=jnp.float32)
        o_ref[0] = jnp.maximum(acc, LRELU_SLOPE * acc).astype(o_ref.dtype)

    return kernel


def _make_conv_stats_kernel(ws):
    """Stride-2 4x4 conv emitting raw bf16 conv output plus fused per-block
    BatchNorm partial statistics (sum / sum-of-squares from the f32 acc)."""
    offs = (0, 1, ws, ws + 1)

    def kernel(x_ref, w_ref, o_ref, sum_ref, sumsq_ref):
        r_out, cout = o_ref.shape[1], o_ref.shape[2]
        acc = jnp.dot(x_ref[0, 0:r_out, :], w_ref[0],
                      preferred_element_type=jnp.float32)
        for t in range(1, 4):
            off = offs[t]
            acc = acc + jnp.dot(x_ref[0, off:off + r_out, :], w_ref[t],
                                preferred_element_type=jnp.float32)
        o_ref[0] = acc.astype(o_ref.dtype)
        # Mask the garbage "wide" column (wo == ws-1) out of the statistics.
        row = jax.lax.broadcasted_iota(jnp.int32, (r_out, cout), 0)
        mask = ((row % ws) != (ws - 1)).astype(jnp.float32)
        masked = acc * mask
        sum_ref[0] = jnp.sum(masked, axis=0, keepdims=True)
        sumsq_ref[0] = jnp.sum(masked * acc, axis=0, keepdims=True)

    return kernel


def _scale_shift_lrelu_kernel(x_ref, scale_ref, shift_ref, o_ref):
    # BatchNorm apply (per-channel scale/shift) fused with LeakyReLU(0.2).
    y = x_ref[0].astype(jnp.float32) * scale_ref[...] + shift_ref[...]
    o_ref[0] = jnp.maximum(y, LRELU_SLOPE * y).astype(o_ref.dtype)


# --------------------------- pallas_call wrappers -----------------------------

def _compiler_params():
    return pltpu.CompilerParams(
        dimension_semantics=("parallel",),
        vmem_limit_bytes=VMEM_LIMIT,
    )


def _conv_s2d_call(x_nhwc, w_taps, with_stats):
    """4x4 / stride-2 / pad-1 conv of an NHWC activation via a fused Pallas
    kernel.  Returns the 'wide' output (N, Ho*Ws, Cout) (+ BN partials) and
    the layer geometry."""
    N, H, W, C = x_nhwc.shape
    Ho, Wo = H // 2, W // 2
    Hs, Ws = Ho + 1, Wo + 1
    K = 4 * C
    cout = w_taps.shape[-1]
    r_out = Ho * Ws
    r_in = _round_up(Hs * Ws + 1, 16)      # +slack row for the (1,1) tap

    # pad=1 halo -> space-to-depth(2) -> flatten spatial to rows.  Pure layout,
    # ~1x the activation size, bf16.  (channel order: q_row, q_col, c)
    xp = jnp.pad(x_nhwc.astype(jnp.bfloat16), ((0, 0), (1, 1), (1, 1), (0, 0)))
    xs = (xp.reshape(N, Hs, 2, Ws, 2, C)
            .transpose(0, 1, 3, 2, 4, 5)
            .reshape(N, Hs * Ws, K))
    xs = jnp.pad(xs, ((0, 0), (0, r_in - Hs * Ws), (0, 0)))

    cost = pl.CostEstimate(
        flops=8 * N * r_out * K * cout,
        transcendentals=0,
        bytes_accessed=xs.size * 2 + w_taps.size * 2 + N * r_out * cout * 2,
    )

    in_specs = [pl.BlockSpec((1, r_in, K), lambda i: (i, 0, 0)),
                pl.BlockSpec((4, K, cout), lambda i: (0, 0, 0))]    # resident

    if with_stats:
        kernel = _make_conv_stats_kernel(Ws)
        out_shape = (jax.ShapeDtypeStruct((N, r_out, cout), jnp.bfloat16),
                     jax.ShapeDtypeStruct((N, 1, cout), jnp.float32),
                     jax.ShapeDtypeStruct((N, 1, cout), jnp.float32))
        out_specs = (pl.BlockSpec((1, r_out, cout), lambda i: (i, 0, 0)),
                     pl.BlockSpec((1, 1, cout), lambda i: (i, 0, 0)),
                     pl.BlockSpec((1, 1, cout), lambda i: (i, 0, 0)))
    else:
        kernel = _make_conv_lrelu_kernel(Ws)
        out_shape = jax.ShapeDtypeStruct((N, r_out, cout), jnp.bfloat16)
        out_specs = pl.BlockSpec((1, r_out, cout), lambda i: (i, 0, 0))

    res = pl.pallas_call(
        kernel,
        grid=(N,),
        out_shape=out_shape,
        in_specs=in_specs,
        out_specs=out_specs,
        compiler_params=_compiler_params(),
        cost_estimate=cost,
    )(xs, w_taps)
    return res, (N, Ho, Wo, Ws, cout)


def _unwide(y_wide, N, Ho, Wo, Ws, cout):
    # Drop the garbage wide column -> (N, Ho, Wo, Cout) NHWC bf16.
    return y_wide.reshape(N, Ho, Ws, cout)[:, :, :Wo, :]


def _conv_lrelu_layer(x, w_taps):
    y_wide, (N, Ho, Wo, Ws, cout) = _conv_s2d_call(x, w_taps, with_stats=False)
    return _unwide(y_wide, N, Ho, Wo, Ws, cout)


def _bn_apply_lrelu(y_wide, scale, shift):
    N, r_out, cout = y_wide.shape
    return pl.pallas_call(
        _scale_shift_lrelu_kernel,
        grid=(N,),
        out_shape=jax.ShapeDtypeStruct((N, r_out, cout), jnp.bfloat16),
        in_specs=[pl.BlockSpec((1, r_out, cout), lambda i: (i, 0, 0)),
                  pl.BlockSpec((1, cout), lambda i: (0, 0)),
                  pl.BlockSpec((1, cout), lambda i: (0, 0))],
        out_specs=pl.BlockSpec((1, r_out, cout), lambda i: (i, 0, 0)),
        compiler_params=_compiler_params(),
    )(y_wide, scale, shift)


def _conv_bn_lrelu_layer(x, w_taps, gamma, beta):
    (y_wide, sums, sumsqs), (N, Ho, Wo, Ws, cout) = _conv_s2d_call(
        x, w_taps, with_stats=True)
    # Tiny XLA reduction over the per-sample partials -> exact batch stats
    # (biased variance over N*Ho*Wo, PyTorch BatchNorm2d training mode).
    count = float(N * Ho * Wo)
    mean = jnp.sum(sums, axis=(0, 1)) / count
    var = jnp.maximum(jnp.sum(sumsqs, axis=(0, 1)) / count - mean * mean, 0.0)
    scale_v = gamma * jax.lax.rsqrt(var + BN_EPS)
    shift_v = beta - mean * scale_v
    y_wide = _bn_apply_lrelu(y_wide, scale_v.reshape(1, -1),
                             shift_v.reshape(1, -1))
    return _unwide(y_wide, N, Ho, Wo, Ws, cout)


# -------------------------------- forward ------------------------------------

def discriminator_forward(x_nchw, params):
    """x_nchw: (N, nc, 32, 32) float32 NCHW -> (N, 1, 1, 1) float32."""
    w1, w2, g2, b2, w3, g3, b3, w4 = params

    h = jnp.transpose(x_nchw, (0, 2, 3, 1))          # one NHWC boundary transpose

    h = _conv_lrelu_layer(h, w1)                     # (N, 16, 16, ndf)   bf16
    h = _conv_bn_lrelu_layer(h, w2, g2, b2)          # (N,  8,  8, 2ndf)  bf16
    h = _conv_bn_lrelu_layer(h, w3, g3, b3)          # (N,  4,  4, 4ndf)  bf16

    # Final Conv(4ndf -> 1, 4, s1, p0) on a 4x4 map == dense (N, 16*4ndf)@(.,1).
    N, Ho, Wo, C = h.shape
    out = jnp.dot(h.reshape(N, Ho * Wo * C).astype(jnp.float32), w4,
                  preferred_element_type=jnp.float32)
    return out.reshape(N, 1, 1, 1)


# ---------------------------- parameter handling -----------------------------

def init_params(key, ndf, nc):
    """DCGAN-style init in PyTorch layout: conv weights ~ N(0, 0.02),
    BN gamma=1, beta=0."""
    ks = jax.random.split(key, 4)
    w1 = 0.02 * jax.random.normal(ks[0], (ndf, nc, 4, 4), jnp.float32)
    w2 = 0.02 * jax.random.normal(ks[1], (ndf * 2, ndf, 4, 4), jnp.float32)
    w3 = 0.02 * jax.random.normal(ks[2], (ndf * 4, ndf * 2, 4, 4), jnp.float32)
    w4 = 0.02 * jax.random.normal(ks[3], (1, ndf * 4, 4, 4), jnp.float32)
    g2 = jnp.ones((ndf * 2,), jnp.float32)
    b2 = jnp.zeros((ndf * 2,), jnp.float32)
    g3 = jnp.ones((ndf * 4,), jnp.float32)
    b3 = jnp.zeros((ndf * 4,), jnp.float32)
    return (w1, w2, g2, b2, w3, g3, b3, w4)


def prepare_params(torch_params):
    """Convert PyTorch (Cout, Cin, 4, 4) conv weights into the s2d tap layout
    (4, 4*Cin, Cout) bf16 used by the fused conv kernel; the final conv becomes
    a (16*Cin, 1) f32 matvec operand."""
    w1, w2, g2, b2, w3, g3, b3, w4 = torch_params

    def taps(w):
        co, ci, _, _ = w.shape
        w = jnp.transpose(w, (2, 3, 1, 0))        # (kh, kw, Cin, Cout)
        w = w.reshape(2, 2, 2, 2, ci, co)         # (di, qr, dj, qc, Cin, Cout)
        w = jnp.transpose(w, (0, 2, 1, 3, 4, 5))  # (di, dj, qr, qc, Cin, Cout)
        return w.reshape(4, 4 * ci, co).astype(jnp.bfloat16)

    w4_flat = (jnp.transpose(w4, (2, 3, 1, 0))
               .reshape(-1, w4.shape[0]).astype(jnp.float32))
    return (taps(w1), taps(w2), g2, b2, taps(w3), g3, b3, w4_flat)


if __name__ == "__main__":
    ndf, nc = 8, 3
    key = jax.random.PRNGKey(0)
    kx, kp = jax.random.split(key)
    # 32x32 input -> 16 -> 8 -> 4 -> 1 (standard DCGAN discriminator geometry)
    x = jax.random.normal(kx, (2, nc, 32, 32), jnp.float32)
    params = prepare_params(init_params(kp, ndf, nc))

    out = jax.jit(discriminator_forward)(x, params)
    jax.block_until_ready(out)
    assert out.shape == (2, 1, 1, 1), out.shape
    assert bool(jnp.all(jnp.isfinite(out)))
    print("KERNEL_OK")
</pallas_src>

<mosaic_0001>
module attributes {stable_mosaic.version = 11 : i64} {
  func.func @kernel(%arg0: i32, %arg1: memref<1x304x12xbf16, #tpu.memory_space<vmem>>, %arg2: memref<4x12x8xbf16, #tpu.memory_space<vmem>>, %arg3: memref<1x272x8xbf16, #tpu.memory_space<vmem>>) attributes {dimension_semantics = [#tpu.dimension_semantics<parallel>], iteration_bounds = array<i64: 2>, scalar_prefetch = 0 : i64, scratch_operands = 0 : i64, tpu.core_type = #tpu.core_type<tc>, window_params = [{transform_indices = @transform_0, window_bounds = array<i64: 1, 304, 12>}, {pipeline_mode = #tpu.pipeline_mode<synchronous>, transform_indices = @transform_1, window_bounds = array<i64: 4, 12, 8>}, {transform_indices = @transform_2, window_bounds = array<i64: 1, 272, 8>}]} {
    %c0 = arith.constant 0 : index
    %c0_0 = arith.constant 0 : index
    %c0_1 = arith.constant 0 : index
    %0 = vector.load %arg1[%c0, %c0_0, %c0_1] : memref<1x304x12xbf16, #tpu.memory_space<vmem>>, vector<1x272x12xbf16>
    %1 = vector.shape_cast %0 : vector<1x272x12xbf16> to vector<272x12xbf16>
    %c0_2 = arith.constant 0 : index
    %c0_3 = arith.constant 0 : index
    %c0_4 = arith.constant 0 : index
    %2 = vector.load %arg2[%c0_2, %c0_3, %c0_4] : memref<4x12x8xbf16, #tpu.memory_space<vmem>>, vector<1x12x8xbf16>
    %3 = vector.shape_cast %2 : vector<1x12x8xbf16> to vector<12x8xbf16>
    %cst = arith.constant dense<0.000000e+00> : vector<272x8xf32>
    %4 = tpu.matmul %1, %3, %cst {dimension_numbers = #tpu.dot_dimension_numbers<[1], [0], [0], [1], [0, 0, 1, 1], [], []>} : vector<272x12xbf16>, vector<12x8xbf16>, vector<272x8xf32> -> vector<272x8xf32>
    %c0_5 = arith.constant 0 : index
    %c1 = arith.constant 1 : index
    %c0_6 = arith.constant 0 : index
    %5 = vector.load %arg1[%c0_5, %c1, %c0_6] : memref<1x304x12xbf16, #tpu.memory_space<vmem>>, vector<1x272x12xbf16>
    %6 = vector.shape_cast %5 : vector<1x272x12xbf16> to vector<272x12xbf16>
    %c1_7 = arith.constant 1 : index
    %c0_8 = arith.constant 0 : index
    %c0_9 = arith.constant 0 : index
    %7 = vector.load %arg2[%c1_7, %c0_8, %c0_9] : memref<4x12x8xbf16, #tpu.memory_space<vmem>>, vector<1x12x8xbf16>
    %8 = vector.shape_cast %7 : vector<1x12x8xbf16> to vector<12x8xbf16>
    %cst_10 = arith.constant dense<0.000000e+00> : vector<272x8xf32>
    %9 = tpu.matmul %6, %8, %cst_10 {dimension_numbers = #tpu.dot_dimension_numbers<[1], [0], [0], [1], [0, 0, 1, 1], [], []>} : vector<272x12xbf16>, vector<12x8xbf16>, vector<272x8xf32> -> vector<272x8xf32>
    %10 = arith.addf %4, %9 : vector<272x8xf32>
    %c0_11 = arith.constant 0 : index
    %c17 = arith.constant 17 : index
    %c0_12 = arith.constant 0 : index
    %11 = vector.load %arg1[%c0_11, %c17, %c0_12] : memref<1x304x12xbf16, #tpu.memory_space<vmem>>, vector<1x272x12xbf16>
    %12 = vector.shape_cast %11 : vector<1x272x12xbf16> to vector<272x12xbf16>
    %c2 = arith.constant 2 : index
    %c0_13 = arith.constant 0 : index
    %c0_14 = arith.constant 0 : index
    %13 = vector.load %arg2[%c2, %c0_13, %c0_14] : memref<4x12x8xbf16, #tpu.memory_space<vmem>>, vector<1x12x8xbf16>
    %14 = vector.shape_cast %13 : vector<1x12x8xbf16> to vector<12x8xbf16>
    %cst_15 = arith.constant dense<0.000000e+00> : vector<272x8xf32>
    %15 = tpu.matmul %12, %14, %cst_15 {dimension_numbers = #tpu.dot_dimension_numbers<[1], [0], [0], [1], [0, 0, 1, 1], [], []>} : vector<272x12xbf16>, vector<12x8xbf16>, vector<272x8xf32> -> vector<272x8xf32>
    %16 = arith.addf %10, %15 : vector<272x8xf32>
    %c0_16 = arith.constant 0 : index
    %c18 = arith.constant 18 : index
    %c0_17 = arith.constant 0 : index
    %17 = vector.load %arg1[%c0_16, %c18, %c0_17] : memref<1x304x12xbf16, #tpu.memory_space<vmem>>, vector<1x272x12xbf16>
    %18 = vector.shape_cast %17 : vector<1x272x12xbf16> to vector<272x12xbf16>
    %c3 = arith.constant 3 : index
    %c0_18 = arith.constant 0 : index
    %c0_19 = arith.constant 0 : index
    %19 = vector.load %arg2[%c3, %c0_18, %c0_19] : memref<4x12x8xbf16, #tpu.memory_space<vmem>>, vector<1x12x8xbf16>
    %20 = vector.shape_cast %19 : vector<1x12x8xbf16> to vector<12x8xbf16>
    %cst_20 = arith.constant dense<0.000000e+00> : vector<272x8xf32>
    %21 = tpu.matmul %18, %20, %cst_20 {dimension_numbers = #tpu.dot_dimension_numbers<[1], [0], [0], [1], [0, 0, 1, 1], [], []>} : vector<272x12xbf16>, vector<12x8xbf16>, vector<272x8xf32> -> vector<272x8xf32>
    %22 = arith.addf %16, %21 : vector<272x8xf32>
    %cst_21 = arith.constant 2.000000e-01 : f32
    %23 = vector.broadcast %cst_21 : f32 to vector<272x8xf32>
    %24 = arith.mulf %23, %22 : vector<272x8xf32>
    %25 = arith.maximumf %22, %24 : vector<272x8xf32>
    %26 = arith.truncf %25 : vector<272x8xf32> to vector<272x8xbf16>
    %c0_22 = arith.constant 0 : index
    %c0_23 = arith.constant 0 : index
    %c0_24 = arith.constant 0 : index
    %27 = vector.load %arg3[%c0_22, %c0_23, %c0_24] : memref<1x272x8xbf16, #tpu.memory_space<vmem>>, vector<1x272x8xbf16>
    %28 = vector.shape_cast %27 : vector<1x272x8xbf16> to vector<272x8xbf16>
    %29 = vector.shape_cast %26 : vector<272x8xbf16> to vector<1x272x8xbf16>
    tpu.vector_store %arg3[%c0_22, %c0_23, %c0_24], %29 {strides = array<i32>} : memref<1x272x8xbf16, #tpu.memory_space<vmem>>, vector<1x272x8xbf16>,
    return
  }
  func.func @transform_0(%arg0: i32) -> (i32, i32, i32) {
    %c0_i32 = arith.constant 0 : i32
    %c0_i32_0 = arith.constant 0 : i32
    %c0_i32_1 = arith.constant 0 : i32
    return %arg0, %c0_i32, %c0_i32_0 : i32, i32, i32
  }
  func.func @transform_1(%arg0: i32) -> (i32, i32, i32) {
    %c0_i32 = arith.constant 0 : i32
    %c0_i32_0 = arith.constant 0 : i32
    %c0_i32_1 = arith.constant 0 : i32
    %c0_i32_2 = arith.constant 0 : i32
    return %c0_i32, %c0_i32_0, %c0_i32_1 : i32, i32, i32
  }
  func.func @transform_2(%arg0: i32) -> (i32, i32, i32) {
    %c0_i32 = arith.constant 0 : i32
    %c0_i32_0 = arith.constant 0 : i32
    %c0_i32_1 = arith.constant 0 : i32
    return %arg0, %c0_i32, %c0_i32_0 : i32, i32, i32
  }
}

module attributes {stable_mosaic.version = 11 : i64} {
  func.func @kernel(%arg0: i32, %arg1: memref<1x96x32xbf16, #tpu.memory_space<vmem>>, %arg2: memref<4x32x16xbf16, #tpu.memory_space<vmem>>, %arg3: memref<1x72x16xbf16, #tpu.memory_space<vmem>>, %arg4: memref<1x1x16xf32, #tpu.memory_space<vmem>>, %arg5: memref<1x1x16xf32, #tpu.memory_space<vmem>>) attributes {dimension_semantics = [#tpu.dimension_semantics<parallel>], iteration_bounds = array<i64: 2>, scalar_prefetch = 0 : i64, scratch_operands = 0 : i64, tpu.core_type = #tpu.core_type<tc>, window_params = [{transform_indices = @transform_0, window_bounds = array<i64: 1, 96, 32>}, {pipeline_mode = #tpu.pipeline_mode<synchronous>, transform_indices = @transform_1, window_bounds = array<i64: 4, 32, 16>}, {transform_indices = @transform_2, window_bounds = array<i64: 1, 72, 16>}, {transform_indices = @transform_3, window_bounds = array<i64: 1, 1, 16>}, {transform_indices = @transform_4, window_bounds = array<i64: 1, 1, 16>}]} {
    %c0 = arith.constant 0 : index
    %c0_0 = arith.constant 0 : index
    %c0_1 = arith.constant 0 : index
    %0 = vector.load %arg1[%c0, %c0_0, %c0_1] : memref<1x96x32xbf16, #tpu.memory_space<vmem>>, vector<1x72x32xbf16>
    %1 = vector.shape_cast %0 : vector<1x72x32xbf16> to vector<72x32xbf16>
    %c0_2 = arith.constant 0 : index
    %c0_3 = arith.constant 0 : index
    %c0_4 = arith.constant 0 : index
    %2 = vector.load %arg2[%c0_2, %c0_3, %c0_4] : memref<4x32x16xbf16, #tpu.memory_space<vmem>>, vector<1x32x16xbf16>
    %3 = vector.shape_cast %2 : vector<1x32x16xbf16> to vector<32x16xbf16>
    %cst = arith.constant dense<0.000000e+00> : vector<72x16xf32>
    %4 = tpu.matmul %1, %3, %cst {dimension_numbers = #tpu.dot_dimension_numbers<[1], [0], [0], [1], [0, 0, 1, 1], [], []>} : vector<72x32xbf16>, vector<32x16xbf16>, vector<72x16xf32> -> vector<72x16xf32>
    %c0_5 = arith.constant 0 : index
    %c1 = arith.constant 1 : index
    %c0_6 = arith.constant 0 : index
    %5 = vector.load %arg1[%c0_5, %c1, %c0_6] : memref<1x96x32xbf16, #tpu.memory_space<vmem>>, vector<1x72x32xbf16>
    %6 = vector.shape_cast %5 : vector<1x72x32xbf16> to vector<72x32xbf16>
    %c1_7 = arith.constant 1 : index
    %c0_8 = arith.constant 0 : index
    %c0_9 = arith.constant 0 : index
    %7 = vector.load %arg2[%c1_7, %c0_8, %c0_9] : memref<4x32x16xbf16, #tpu.memory_space<vmem>>, vector<1x32x16xbf16>
    %8 = vector.shape_cast %7 : vector<1x32x16xbf16> to vector<32x16xbf16>
    %cst_10 = arith.constant dense<0.000000e+00> : vector<72x16xf32>
    %9 = tpu.matmul %6, %8, %cst_10 {dimension_numbers = #tpu.dot_dimension_numbers<[1], [0], [0], [1], [0, 0, 1, 1], [], []>} : vector<72x32xbf16>, vector<32x16xbf16>, vector<72x16xf32> -> vector<72x16xf32>
    %10 = arith.addf %4, %9 : vector<72x16xf32>
    %c0_11 = arith.constant 0 : index
    %c9 = arith.constant 9 : index
    %c0_12 = arith.constant 0 : index
    %11 = vector.load %arg1[%c0_11, %c9, %c0_12] : memref<1x96x32xbf16, #tpu.memory_space<vmem>>, vector<1x72x32xbf16>
    %12 = vector.shape_cast %11 : vector<1x72x32xbf16> to vector<72x32xbf16>
    %c2 = arith.constant 2 : index
    %c0_13 = arith.constant 0 : index
    %c0_14 = arith.constant 0 : index
    %13 = vector.load %arg2[%c2, %c0_13, %c0_14] : memref<4x32x16xbf16, #tpu.memory_space<vmem>>, vector<1x32x16xbf16>
    %14 = vector.shape_cast %13 : vector<1x32x16xbf16> to vector<32x16xbf16>
    %cst_15 = arith.constant dense<0.000000e+00> : vector<72x16xf32>
    %15 = tpu.matmul %12, %14, %cst_15 {dimension_numbers = #tpu.dot_dimension_numbers<[1], [0], [0], [1], [0, 0, 1, 1], [], []>} : vector<72x32xbf16>, vector<32x16xbf16>, vector<72x16xf32> -> vector<72x16xf32>
    %16 = arith.addf %10, %15 : vector<72x16xf32>
    %c0_16 = arith.constant 0 : index
    %c10 = arith.constant 10 : index
    %c0_17 = arith.constant 0 : index
    %17 = vector.load %arg1[%c0_16, %c10, %c0_17] : memref<1x96x32xbf16, #tpu.memory_space<vmem>>, vector<1x72x32xbf16>
    %18 = vector.shape_cast %17 : vector<1x72x32xbf16> to vector<72x32xbf16>
    %c3 = arith.constant 3 : index
    %c0_18 = arith.constant 0 : index
    %c0_19 = arith.constant 0 : index
    %19 = vector.load %arg2[%c3, %c0_18, %c0_19] : memref<4x32x16xbf16, #tpu.memory_space<vmem>>, vector<1x32x16xbf16>
    %20 = vector.shape_cast %19 : vector<1x32x16xbf16> to vector<32x16xbf16>
    %cst_20 = arith.constant dense<0.000000e+00> : vector<72x16xf32>
    %21 = tpu.matmul %18, %20, %cst_20 {dimension_numbers = #tpu.dot_dimension_numbers<[1], [0], [0], [1], [0, 0, 1, 1], [], []>} : vector<72x32xbf16>, vector<32x16xbf16>, vector<72x16xf32> -> vector<72x16xf32>
    %22 = arith.addf %16, %21 : vector<72x16xf32>
    %23 = arith.truncf %22 : vector<72x16xf32> to vector<72x16xbf16>
    %c0_21 = arith.constant 0 : index
    %c0_22 = arith.constant 0 : index
    %c0_23 = arith.constant 0 : index
    %24 = vector.load %arg3[%c0_21, %c0_22, %c0_23] : memref<1x72x16xbf16, #tpu.memory_space<vmem>>, vector<1x72x16xbf16>
    %25 = vector.shape_cast %24 : vector<1x72x16xbf16> to vector<72x16xbf16>
    %26 = vector.shape_cast %23 : vector<72x16xbf16> to vector<1x72x16xbf16>
    tpu.vector_store %arg3[%c0_21, %c0_22, %c0_23], %26 {strides = array<i32>} : memref<1x72x16xbf16, #tpu.memory_space<vmem>>, vector<1x72x16xbf16>,
    %27 = tpu.iota {dimensions = array<i32: 0>} : vector<72x16xi32>
    %c9_i32 = arith.constant 9 : i32
    %c0_i32 = arith.constant 0 : i32
    %28 = arith.cmpi eq, %c9_i32, %c0_i32 : i32
    %c1_i32 = arith.constant 1 : i32
    %29 = arith.select %28, %c1_i32, %c9_i32 : i32
    %30 = vector.broadcast %29 : i32 to vector<72x16xi32>
    %31 = arith.remsi %27, %30 : vector<72x16xi32>
    %c0_i32_24 = arith.constant 0 : i32
    %32 = vector.broadcast %c0_i32_24 : i32 to vector<72x16xi32>
    %33 = arith.cmpi ne, %31, %32 : vector<72x16xi32>
    %c0_i32_25 = arith.constant 0 : i32
    %34 = vector.broadcast %c0_i32_25 : i32 to vector<72x16xi32>
    %35 = arith.cmpi slt, %31, %34 : vector<72x16xi32>
    %c0_i32_26 = arith.constant 0 : i32
    %36 = arith.cmpi slt, %29, %c0_i32_26 : i32
    %37 = vector.broadcast %36 : i1 to vector<72x16xi1>
    %38 = vector.broadcast %37 : vector<72x16xi1> to vector<72x16xi1>
    %39 = arith.xori %35, %38 : vector<72x16xi1>
    %40 = arith.andi %39, %33 : vector<72x16xi1>
    %41 = vector.broadcast %29 : i32 to vector<72x16xi32>
    %42 = arith.addi %31, %41 : vector<72x16xi32>
    %43 = arith.select %40, %42, %31 : vector<72x16xi1>, vector<72x16xi32>
    %c8_i32 = arith.constant 8 : i32
    %44 = vector.broadcast %c8_i32 : i32 to vector<72x16xi32>
    %45 = arith.cmpi ne, %43, %44 : vector<72x16xi32>
    %46 = arith.extui %45 : vector<72x16xi1> to vector<72x16xi32>
    %47 = arith.sitofp %46 : vector<72x16xi32> to vector<72x16xf32>
    %48 = arith.mulf %22, %47 : vector<72x16xf32>
    %cst_27 = arith.constant dense<0.000000e+00> : vector<16xf32>
    %49 = vector.multi_reduction <add>, %48, %cst_27 [0] : vector<72x16xf32> to vector<16xf32>
    %50 = vector.shape_cast %49 : vector<16xf32> to vector<1x16xf32>
    %c0_28 = arith.constant 0 : index
    %c0_29 = arith.constant 0 : index
    %c0_30 = arith.constant 0 : index
    %51 = vector.load %arg4[%c0_28, %c0_29, %c0_30] : memref<1x1x16xf32, #tpu.memory_space<vmem>>, vector<1x1x16xf32>
    %52 = vector.shape_cast %51 : vector<1x1x16xf32> to vector<1x16xf32>
    %53 = vector.shape_cast %50 : vector<1x16xf32> to vector<1x1x16xf32>
    tpu.vector_store %arg4[%c0_28, %c0_29, %c0_30], %53 {strides = array<i32>} : memref<1x1x16xf32, #tpu.memory_space<vmem>>, vector<1x1x16xf32>,
    %54 = arith.mulf %48, %22 : vector<72x16xf32>
    %cst_31 = arith.constant dense<0.000000e+00> : vector<16xf32>
    %55 = vector.multi_reduction <add>, %54, %cst_31 [0] : vector<72x16xf32> to vector<16xf32>
    %56 = vector.shape_cast %55 : vector<16xf32> to vector<1x16xf32>
    %c0_32 = arith.constant 0 : index
    %c0_33 = arith.constant 0 : index
    %c0_34 = arith.constant 0 : index
    %57 = vector.load %arg5[%c0_32, %c0_33, %c0_34] : memref<1x1x16xf32, #tpu.memory_space<vmem>>, vector<1x1x16xf32>
    %58 = vector.shape_cast %57 : vector<1x1x16xf32> to vector<1x16xf32>
    %59 = vector.shape_cast %56 : vector<1x16xf32> to vector<1x1x16xf32>
    tpu.vector_store %arg5[%c0_32, %c0_33, %c0_34], %59 {strides = array<i32>} : memref<1x1x16xf32, #tpu.memory_space<vmem>>, vector<1x1x16xf32>,
    return
  }
  func.func @transform_0(%arg0: i32) -> (i32, i32, i32) {
    %c0_i32 = arith.constant 0 : i32
    %c0_i32_0 = arith.constant 0 : i32
    %c0_i32_1 = arith.constant 0 : i32
    return %arg0, %c0_i32, %c0_i32_0 : i32, i32, i32
  }
  func.func @transform_1(%arg0: i32) -> (i32, i32, i32) {
    %c0_i32 = arith.constant 0 : i32
    %c0_i32_0 = arith.constant 0 : i32
    %c0_i32_1 = arith.constant 0 : i32
    %c0_i32_2 = arith.constant 0 : i32
    return %c0_i32, %c0_i32_0, %c0_i32_1 : i32, i32, i32
  }
  func.func @transform_2(%arg0: i32) -> (i32, i32, i32) {
    %c0_i32 = arith.constant 0 : i32
    %c0_i32_0 = arith.constant 0 : i32
    %c0_i32_1 = arith.constant 0 : i32
    return %arg0, %c0_i32, %c0_i32_0 : i32, i32, i32
  }
  func.func @transform_3(%arg0: i32) -> (i32, i32, i32) {
    %c0_i32 = arith.constant 0 : i32
    %c0_i32_0 = arith.constant 0 : i32
    %c0_i32_1 = arith.constant 0 : i32
    return %arg0, %c0_i32, %c0_i32_0 : i32, i32, i32
  }
  func.func @transform_4(%arg0: i32) -> (i32, i32, i32) {
    %c0_i32 = arith.constant 0 : i32
    %c0_i32_0 = arith.constant 0 : i32
    %c0_i32_1 = arith.constant 0 : i32
    return %arg0, %c0_i32, %c0_i32_0 : i32, i32, i32
  }
}

module attributes {stable_mosaic.version = 11 : i64} {
  func.func @_scale_shift_lrelu_kernel(%arg0: i32, %arg1: memref<1x72x16xbf16, #tpu.memory_space<vmem>>, %arg2: memref<1x16xf32, #tpu.memory_space<vmem>>, %arg3: memref<1x16xf32, #tpu.memory_space<vmem>>, %arg4: memref<1x72x16xbf16, #tpu.memory_space<vmem>>) attributes {dimension_semantics = [#tpu.dimension_semantics<parallel>], iteration_bounds = array<i64: 2>, scalar_prefetch = 0 : i64, scratch_operands = 0 : i64, tpu.core_type = #tpu.core_type<tc>, window_params = [{transform_indices = @transform_0, window_bounds = array<i64: 1, 72, 16>}, {pipeline_mode = #tpu.pipeline_mode<synchronous>, transform_indices = @transform_1, window_bounds = array<i64: 1, 16>}, {pipeline_mode = #tpu.pipeline_mode<synchronous>, transform_indices = @transform_2, window_bounds = array<i64: 1, 16>}, {transform_indices = @transform_3, window_bounds = array<i64: 1, 72, 16>}]} {
    %c0 = arith.constant 0 : index
    %c0_0 = arith.constant 0 : index
    %c0_1 = arith.constant 0 : index
    %0 = vector.load %arg1[%c0, %c0_0, %c0_1] : memref<1x72x16xbf16, #tpu.memory_space<vmem>>, vector<1x72x16xbf16>
    %1 = vector.shape_cast %0 : vector<1x72x16xbf16> to vector<72x16xbf16>
    %2 = arith.extf %1 : vector<72x16xbf16> to vector<72x16xf32>
    %c0_2 = arith.constant 0 : index
    %c0_3 = arith.constant 0 : index
    %3 = vector.load %arg2[%c0_2, %c0_3] : memref<1x16xf32, #tpu.memory_space<vmem>>, vector<1x16xf32>
    %4 = vector.broadcast %3 : vector<1x16xf32> to vector<72x16xf32>
    %5 = arith.mulf %2, %4 : vector<72x16xf32>
    %c0_4 = arith.constant 0 : index
    %c0_5 = arith.constant 0 : index
    %6 = vector.load %arg3[%c0_4, %c0_5] : memref<1x16xf32, #tpu.memory_space<vmem>>, vector<1x16xf32>
    %7 = vector.broadcast %6 : vector<1x16xf32> to vector<72x16xf32>
    %8 = arith.addf %5, %7 : vector<72x16xf32>
    %cst = arith.constant 2.000000e-01 : f32
    %9 = vector.broadcast %cst : f32 to vector<72x16xf32>
    %10 = arith.mulf %9, %8 : vector<72x16xf32>
    %11 = arith.maximumf %8, %10 : vector<72x16xf32>
    %12 = arith.truncf %11 : vector<72x16xf32> to vector<72x16xbf16>
    %c0_6 = arith.constant 0 : index
    %c0_7 = arith.constant 0 : index
    %c0_8 = arith.constant 0 : index
    %13 = vector.load %arg4[%c0_6, %c0_7, %c0_8] : memref<1x72x16xbf16, #tpu.memory_space<vmem>>, vector<1x72x16xbf16>
    %14 = vector.shape_cast %13 : vector<1x72x16xbf16> to vector<72x16xbf16>
    %15 = vector.shape_cast %12 : vector<72x16xbf16> to vector<1x72x16xbf16>
    tpu.vector_store %arg4[%c0_6, %c0_7, %c0_8], %15 {strides = array<i32>} : memref<1x72x16xbf16, #tpu.memory_space<vmem>>, vector<1x72x16xbf16>,
    return
  }
  func.func @transform_0(%arg0: i32) -> (i32, i32, i32) {
    %c0_i32 = arith.constant 0 : i32
    %c0_i32_0 = arith.constant 0 : i32
    %c0_i32_1 = arith.constant 0 : i32
    return %arg0, %c0_i32, %c0_i32_0 : i32, i32, i32
  }
  func.func @transform_1(%arg0: i32) -> (i32, i32) {
    %c0_i32 = arith.constant 0 : i32
    %c0_i32_0 = arith.constant 0 : i32
    %c0_i32_1 = arith.constant 0 : i32
    return %c0_i32, %c0_i32_0 : i32, i32
  }
  func.func @transform_2(%arg0: i32) -> (i32, i32) {
    %c0_i32 = arith.constant 0 : i32
    %c0_i32_0 = arith.constant 0 : i32
    %c0_i32_1 = arith.constant 0 : i32
    return %c0_i32, %c0_i32_0 : i32, i32
  }
  func.func @transform_3(%arg0: i32) -> (i32, i32, i32) {
    %c0_i32 = arith.constant 0 : i32
    %c0_i32_0 = arith.constant 0 : i32
    %c0_i32_1 = arith.constant 0 : i32
    return %arg0, %c0_i32, %c0_i32_0 : i32, i32, i32
  }
}

module attributes {stable_mosaic.version = 11 : i64} {
  func.func @kernel(%arg0: i32, %arg1: memref<1x32x64xbf16, #tpu.memory_space<vmem>>, %arg2: memref<4x64x32xbf16, #tpu.memory_space<vmem>>, %arg3: memref<1x20x32xbf16, #tpu.memory_space<vmem>>, %arg4: memref<1x1x32xf32, #tpu.memory_space<vmem>>, %arg5: memref<1x1x32xf32, #tpu.memory_space<vmem>>) attributes {dimension_semantics = [#tpu.dimension_semantics<parallel>], iteration_bounds = array<i64: 2>, scalar_prefetch = 0 : i64, scratch_operands = 0 : i64, tpu.core_type = #tpu.core_type<tc>, window_params = [{transform_indices = @transform_0, window_bounds = array<i64: 1, 32, 64>}, {pipeline_mode = #tpu.pipeline_mode<synchronous>, transform_indices = @transform_1, window_bounds = array<i64: 4, 64, 32>}, {transform_indices = @transform_2, window_bounds = array<i64: 1, 20, 32>}, {transform_indices = @transform_3, window_bounds = array<i64: 1, 1, 32>}, {transform_indices = @transform_4, window_bounds = array<i64: 1, 1, 32>}]} {
    %c0 = arith.constant 0 : index
    %c0_0 = arith.constant 0 : index
    %c0_1 = arith.constant 0 : index
    %0 = vector.load %arg1[%c0, %c0_0, %c0_1] : memref<1x32x64xbf16, #tpu.memory_space<vmem>>, vector<1x20x64xbf16>
    %1 = vector.shape_cast %0 : vector<1x20x64xbf16> to vector<20x64xbf16>
    %c0_2 = arith.constant 0 : index
    %c0_3 = arith.constant 0 : index
    %c0_4 = arith.constant 0 : index
    %2 = vector.load %arg2[%c0_2, %c0_3, %c0_4] : memref<4x64x32xbf16, #tpu.memory_space<vmem>>, vector<1x64x32xbf16>
    %3 = vector.shape_cast %2 : vector<1x64x32xbf16> to vector<64x32xbf16>
    %cst = arith.constant dense<0.000000e+00> : vector<20x32xf32>
    %4 = tpu.matmul %1, %3, %cst {dimension_numbers = #tpu.dot_dimension_numbers<[1], [0], [0], [1], [0, 0, 1, 1], [], []>} : vector<20x64xbf16>, vector<64x32xbf16>, vector<20x32xf32> -> vector<20x32xf32>
    %c0_5 = arith.constant 0 : index
    %c1 = arith.constant 1 : index
    %c0_6 = arith.constant 0 : index
    %5 = vector.load %arg1[%c0_5, %c1, %c0_6] : memref<1x32x64xbf16, #tpu.memory_space<vmem>>, vector<1x20x64xbf16>
    %6 = vector.shape_cast %5 : vector<1x20x64xbf16> to vector<20x64xbf16>
    %c1_7 = arith.constant 1 : index
    %c0_8 = arith.constant 0 : index
    %c0_9 = arith.constant 0 : index
    %7 = vector.load %arg2[%c1_7, %c0_8, %c0_9] : memref<4x64x32xbf16, #tpu.memory_space<vmem>>, vector<1x64x32xbf16>
    %8 = vector.shape_cast %7 : vector<1x64x32xbf16> to vector<64x32xbf16>
    %cst_10 = arith.constant dense<0.000000e+00> : vector<20x32xf32>
    %9 = tpu.matmul %6, %8, %cst_10 {dimension_numbers = #tpu.dot_dimension_numbers<[1], [0], [0], [1], [0, 0, 1, 1], [], []>} : vector<20x64xbf16>, vector<64x32xbf16>, vector<20x32xf32> -> vector<20x32xf32>
    %10 = arith.addf %4, %9 : vector<20x32xf32>
    %c0_11 = arith.constant 0 : index
    %c5 = arith.constant 5 : index
    %c0_12 = arith.constant 0 : index
    %11 = vector.load %arg1[%c0_11, %c5, %c0_12] : memref<1x32x64xbf16, #tpu.memory_space<vmem>>, vector<1x20x64xbf16>
    %12 = vector.shape_cast %11 : vector<1x20x64xbf16> to vector<20x64xbf16>
    %c2 = arith.constant 2 : index
    %c0_13 = arith.constant 0 : index
    %c0_14 = arith.constant 0 : index
    %13 = vector.load %arg2[%c2, %c0_13, %c0_14] : memref<4x64x32xbf16, #tpu.memory_space<vmem>>, vector<1x64x32xbf16>
    %14 = vector.shape_cast %13 : vector<1x64x32xbf16> to vector<64x32xbf16>
    %cst_15 = arith.constant dense<0.000000e+00> : vector<20x32xf32>
    %15 = tpu.matmul %12, %14, %cst_15 {dimension_numbers = #tpu.dot_dimension_numbers<[1], [0], [0], [1], [0, 0, 1, 1], [], []>} : vector<20x64xbf16>, vector<64x32xbf16>, vector<20x32xf32> -> vector<20x32xf32>
    %16 = arith.addf %10, %15 : vector<20x32xf32>
    %c0_16 = arith.constant 0 : index
    %c6 = arith.constant 6 : index
    %c0_17 = arith.constant 0 : index
    %17 = vector.load %arg1[%c0_16, %c6, %c0_17] : memref<1x32x64xbf16, #tpu.memory_space<vmem>>, vector<1x20x64xbf16>
    %18 = vector.shape_cast %17 : vector<1x20x64xbf16> to vector<20x64xbf16>
    %c3 = arith.constant 3 : index
    %c0_18 = arith.constant 0 : index
    %c0_19 = arith.constant 0 : index
    %19 = vector.load %arg2[%c3, %c0_18, %c0_19] : memref<4x64x32xbf16, #tpu.memory_space<vmem>>, vector<1x64x32xbf16>
    %20 = vector.shape_cast %19 : vector<1x64x32xbf16> to vector<64x32xbf16>
    %cst_20 = arith.constant dense<0.000000e+00> : vector<20x32xf32>
    %21 = tpu.matmul %18, %20, %cst_20 {dimension_numbers = #tpu.dot_dimension_numbers<[1], [0], [0], [1], [0, 0, 1, 1], [], []>} : vector<20x64xbf16>, vector<64x32xbf16>, vector<20x32xf32> -> vector<20x32xf32>
    %22 = arith.addf %16, %21 : vector<20x32xf32>
    %23 = arith.truncf %22 : vector<20x32xf32> to vector<20x32xbf16>
    %c0_21 = arith.constant 0 : index
    %c0_22 = arith.constant 0 : index
    %c0_23 = arith.constant 0 : index
    %24 = vector.load %arg3[%c0_21, %c0_22, %c0_23] : memref<1x20x32xbf16, #tpu.memory_space<vmem>>, vector<1x20x32xbf16>
    %25 = vector.shape_cast %24 : vector<1x20x32xbf16> to vector<20x32xbf16>
    %26 = vector.shape_cast %23 : vector<20x32xbf16> to vector<1x20x32xbf16>
    tpu.vector_store %arg3[%c0_21, %c0_22, %c0_23], %26 {strides = array<i32>} : memref<1x20x32xbf16, #tpu.memory_space<vmem>>, vector<1x20x32xbf16>,
    %27 = tpu.iota {dimensions = array<i32: 0>} : vector<20x32xi32>
    %c5_i32 = arith.constant 5 : i32
    %c0_i32 = arith.constant 0 : i32
    %28 = arith.cmpi eq, %c5_i32, %c0_i32 : i32
    %c1_i32 = arith.constant 1 : i32
    %29 = arith.select %28, %c1_i32, %c5_i32 : i32
    %30 = vector.broadcast %29 : i32 to vector<20x32xi32>
    %31 = arith.remsi %27, %30 : vector<20x32xi32>
    %c0_i32_24 = arith.constant 0 : i32
    %32 = vector.broadcast %c0_i32_24 : i32 to vector<20x32xi32>
    %33 = arith.cmpi ne, %31, %32 : vector<20x32xi32>
    %c0_i32_25 = arith.constant 0 : i32
    %34 = vector.broadcast %c0_i32_25 : i32 to vector<20x32xi32>
    %35 = arith.cmpi slt, %31, %34 : vector<20x32xi32>
    %c0_i32_26 = arith.constant 0 : i32
    %36 = arith.cmpi slt, %29, %c0_i32_26 : i32
    %37 = vector.broadcast %36 : i1 to vector<20x32xi1>
    %38 = vector.broadcast %37 : vector<20x32xi1> to vector<20x32xi1>
    %39 = arith.xori %35, %38 : vector<20x32xi1>
    %40 = arith.andi %39, %33 : vector<20x32xi1>
    %41 = vector.broadcast %29 : i32 to vector<20x32xi32>
    %42 = arith.addi %31, %41 : vector<20x32xi32>
    %43 = arith.select %40, %42, %31 : vector<20x32xi1>, vector<20x32xi32>
    %c4_i32 = arith.constant 4 : i32
    %44 = vector.broadcast %c4_i32 : i32 to vector<20x32xi32>
    %45 = arith.cmpi ne, %43, %44 : vector<20x32xi32>
    %46 = arith.extui %45 : vector<20x32xi1> to vector<20x32xi32>
    %47 = arith.sitofp %46 : vector<20x32xi32> to vector<20x32xf32>
    %48 = arith.mulf %22, %47 : vector<20x32xf32>
    %cst_27 = arith.constant dense<0.000000e+00> : vector<32xf32>
    %49 = vector.multi_reduction <add>, %48, %cst_27 [0] : vector<20x32xf32> to vector<32xf32>
    %50 = vector.shape_cast %49 : vector<32xf32> to vector<1x32xf32>
    %c0_28 = arith.constant 0 : index
    %c0_29 = arith.constant 0 : index
    %c0_30 = arith.constant 0 : index
    %51 = vector.load %arg4[%c0_28, %c0_29, %c0_30] : memref<1x1x32xf32, #tpu.memory_space<vmem>>, vector<1x1x32xf32>
    %52 = vector.shape_cast %51 : vector<1x1x32xf32> to vector<1x32xf32>
    %53 = vector.shape_cast %50 : vector<1x32xf32> to vector<1x1x32xf32>
    tpu.vector_store %arg4[%c0_28, %c0_29, %c0_30], %53 {strides = array<i32>} : memref<1x1x32xf32, #tpu.memory_space<vmem>>, vector<1x1x32xf32>,
    %54 = arith.mulf %48, %22 : vector<20x32xf32>
    %cst_31 = arith.constant dense<0.000000e+00> : vector<32xf32>
    %55 = vector.multi_reduction <add>, %54, %cst_31 [0] : vector<20x32xf32> to vector<32xf32>
    %56 = vector.shape_cast %55 : vector<32xf32> to vector<1x32xf32>
    %c0_32 = arith.constant 0 : index
    %c0_33 = arith.constant 0 : index
    %c0_34 = arith.constant 0 : index
    %57 = vector.load %arg5[%c0_32, %c0_33, %c0_34] : memref<1x1x32xf32, #tpu.memory_space<vmem>>, vector<1x1x32xf32>
    %58 = vector.shape_cast %57 : vector<1x1x32xf32> to vector<1x32xf32>
    %59 = vector.shape_cast %56 : vector<1x32xf32> to vector<1x1x32xf32>
    tpu.vector_store %arg5[%c0_32, %c0_33, %c0_34], %59 {strides = array<i32>} : memref<1x1x32xf32, #tpu.memory_space<vmem>>, vector<1x1x32xf32>,
    return
  }
  func.func @transform_0(%arg0: i32) -> (i32, i32, i32) {
    %c0_i32 = arith.constant 0 : i32
    %c0_i32_0 = arith.constant 0 : i32
    %c0_i32_1 = arith.constant 0 : i32
    return %arg0, %c0_i32, %c0_i32_0 : i32, i32, i32
  }
  func.func @transform_1(%arg0: i32) -> (i32, i32, i32) {
    %c0_i32 = arith.constant 0 : i32
    %c0_i32_0 = arith.constant 0 : i32
    %c0_i32_1 = arith.constant 0 : i32
    %c0_i32_2 = arith.constant 0 : i32
    return %c0_i32, %c0_i32_0, %c0_i32_1 : i32, i32, i32
  }
  func.func @transform_2(%arg0: i32) -> (i32, i32, i32) {
    %c0_i32 = arith.constant 0 : i32
    %c0_i32_0 = arith.constant 0 : i32
    %c0_i32_1 = arith.constant 0 : i32
    return %arg0, %c0_i32, %c0_i32_0 : i32, i32, i32
  }
  func.func @transform_3(%arg0: i32) -> (i32, i32, i32) {
    %c0_i32 = arith.constant 0 : i32
    %c0_i32_0 = arith.constant 0 : i32
    %c0_i32_1 = arith.constant 0 : i32
    return %arg0, %c0_i32, %c0_i32_0 : i32, i32, i32
  }
  func.func @transform_4(%arg0: i32) -> (i32, i32, i32) {
    %c0_i32 = arith.constant 0 : i32
    %c0_i32_0 = arith.constant 0 : i32
    %c0_i32_1 = arith.constant 0 : i32
    return %arg0, %c0_i32, %c0_i32_0 : i32, i32, i32
  }
}

module attributes {stable_mosaic.version = 11 : i64} {
  func.func @_scale_shift_lrelu_kernel(%arg0: i32, %arg1: memref<1x20x32xbf16, #tpu.memory_space<vmem>>, %arg2: memref<1x32xf32, #tpu.memory_space<vmem>>, %arg3: memref<1x32xf32, #tpu.memory_space<vmem>>, %arg4: memref<1x20x32xbf16, #tpu.memory_space<vmem>>) attributes {dimension_semantics = [#tpu.dimension_semantics<parallel>], iteration_bounds = array<i64: 2>, scalar_prefetch = 0 : i64, scratch_operands = 0 : i64, tpu.core_type = #tpu.core_type<tc>, window_params = [{transform_indices = @transform_0, window_bounds = array<i64: 1, 20, 32>}, {pipeline_mode = #tpu.pipeline_mode<synchronous>, transform_indices = @transform_1, window_bounds = array<i64: 1, 32>}, {pipeline_mode = #tpu.pipeline_mode<synchronous>, transform_indices = @transform_2, window_bounds = array<i64: 1, 32>}, {transform_indices = @transform_3, window_bounds = array<i64: 1, 20, 32>}]} {
    %c0 = arith.constant 0 : index
    %c0_0 = arith.constant 0 : index
    %c0_1 = arith.constant 0 : index
    %0 = vector.load %arg1[%c0, %c0_0, %c0_1] : memref<1x20x32xbf16, #tpu.memory_space<vmem>>, vector<1x20x32xbf16>
    %1 = vector.shape_cast %0 : vector<1x20x32xbf16> to vector<20x32xbf16>
    %2 = arith.extf %1 : vector<20x32xbf16> to vector<20x32xf32>
    %c0_2 = arith.constant 0 : index
    %c0_3 = arith.constant 0 : index
    %3 = vector.load %arg2[%c0_2, %c0_3] : memref<1x32xf32, #tpu.memory_space<vmem>>, vector<1x32xf32>
    %4 = vector.broadcast %3 : vector<1x32xf32> to vector<20x32xf32>
    %5 = arith.mulf %2, %4 : vector<20x32xf32>
    %c0_4 = arith.constant 0 : index
    %c0_5 = arith.constant 0 : index
    %6 = vector.load %arg3[%c0_4, %c0_5] : memref<1x32xf32, #tpu.memory_space<vmem>>, vector<1x32xf32>
    %7 = vector.broadcast %6 : vector<1x32xf32> to vector<20x32xf32>
    %8 = arith.addf %5, %7 : vector<20x32xf32>
    %cst = arith.constant 2.000000e-01 : f32
    %9 = vector.broadcast %cst : f32 to vector<20x32xf32>
    %10 = arith.mulf %9, %8 : vector<20x32xf32>
    %11 = arith.maximumf %8, %10 : vector<20x32xf32>
    %12 = arith.truncf %11 : vector<20x32xf32> to vector<20x32xbf16>
    %c0_6 = arith.constant 0 : index
    %c0_7 = arith.constant 0 : index
    %c0_8 = arith.constant 0 : index
    %13 = vector.load %arg4[%c0_6, %c0_7, %c0_8] : memref<1x20x32xbf16, #tpu.memory_space<vmem>>, vector<1x20x32xbf16>
    %14 = vector.shape_cast %13 : vector<1x20x32xbf16> to vector<20x32xbf16>
    %15 = vector.shape_cast %12 : vector<20x32xbf16> to vector<1x20x32xbf16>
    tpu.vector_store %arg4[%c0_6, %c0_7, %c0_8], %15 {strides = array<i32>} : memref<1x20x32xbf16, #tpu.memory_space<vmem>>, vector<1x20x32xbf16>,
    return
  }
  func.func @transform_0(%arg0: i32) -> (i32, i32, i32) {
    %c0_i32 = arith.constant 0 : i32
    %c0_i32_0 = arith.constant 0 : i32
    %c0_i32_1 = arith.constant 0 : i32
    return %arg0, %c0_i32, %c0_i32_0 : i32, i32, i32
  }
  func.func @transform_1(%arg0: i32) -> (i32, i32) {
    %c0_i32 = arith.constant 0 : i32
    %c0_i32_0 = arith.constant 0 : i32
    %c0_i32_1 = arith.constant 0 : i32
    return %c0_i32, %c0_i32_0 : i32, i32
  }
  func.func @transform_2(%arg0: i32) -> (i32, i32) {
    %c0_i32 = arith.constant 0 : i32
    %c0_i32_0 = arith.constant 0 : i32
    %c0_i32_1 = arith.constant 0 : i32
    return %c0_i32, %c0_i32_0 : i32, i32
  }
  func.func @transform_3(%arg0: i32) -> (i32, i32, i32) {
    %c0_i32 = arith.constant 0 : i32
    %c0_i32_0 = arith.constant 0 : i32
    %c0_i32_1 = arith.constant 0 : i32
    return %arg0, %c0_i32, %c0_i32_0 : i32, i32, i32
  }
}

</mosaic_0001>

<bundles_post_ra>
// kernel: discriminator_forward.5
= control target key start
LH: loop header
LB: loop body
LE: loop exit
PB: predicated region body
PF: predicated region fallthrough
CT: control target
= control target key end

     0   :  { %s1889_s9 = smov 0   ;;  %s2207_s0 = inlined_call_operand.vmem [shape: bf16[2,304,12], index: 0, kind: input, shape index: {}]   ;;  %s2208_s1 = inlined_call_operand.vmem [shape: bf16[4,12,8], index: 1, kind: input, shape index: {}]   ;;  %s2209_s2 = inlined_call_operand.vmem [shape: bf16[2,272,8], index: 2, kind: output, shape index: {}]  }
   0x1 LB: > { %s1580_s10 = sadd.s32 4294967295, %s1872_s9   ;;  %p1584_p0 = scmp.ge.s32.totalorder %s1872_s9, 1  ;;  %s1872_s9 = sphi %s1889_s9, %s12_s9  }
   0x2   : > { %p112_p1 = scmp.lt.s32.totalorder %s1872_s9, 3 }
   0x4   : > { %p113_p2 = pnand %p1584_p0, %p112_p1 }
   0x5   : > { %p134_p3 = scmp.lt.s32.totalorder (!%p113_p2), %s1580_s10, 1 }
   0x6   : > { %116 = sbr.rel (%p113_p2) target bundleno = 434 (0x1b2), region = 28 }
   0xb   : > { %v1680_v0 = vld [vmem:[%s2208_s1] sm:$0xf]  ;;  %v1828_v1 = vld [vmem:[%s2208_s1] sm:$0x30]  ;;  %vm471_vm0 = vcmask 1045504   ;;  %s2211_s10 = smov (!%p134_p3, %s1580_s10), 1 }
   0xc   : > { %v1681_v2 = vor.u32 %v1828_v1, %v1680_v0  ;;  %v1790_v3 = vld [vmem:[%s2208_s1 + $0x18] sm:$0xf]  ;;  %v1847_v4 = vld [vmem:[%s2208_s1 + $0x18] sm:$0x30]  ;;  %v1767_v6 = vld [vmem:[%s2208_s1 + $0x10] sm:$0xf] }
   0xd   : > { %v1791_v5 = vor.u32 %v1847_v4, %v1790_v3  ;;  %v1846_v7 = vld [vmem:[%s2208_s1 + $0x10] sm:$0x30]  ;;  %v1659_v10 = vld [vmem:[%s2208_s1 + $0x8] sm:$0xf]  ;;  %v1829_v11 = vld [vmem:[%s2208_s1 + $0x8] sm:$0x30] }
   0xe   : > { %v609_v8 = vsel %vm471_vm0, %v1681_v2, 0  ;;  %v1768_v9 = vor.u32 %v1846_v7, %v1767_v6  ;;  %s1856_s27 = smul.u32 152, %s2211_s10  ;;  %v1660_v13 = vor.u32 %v1829_v11, %v1659_v10  ;;  %vm419_vm1 = vcmask 97280  }
   0xf   : > { %618 = vmatpush.bf16.msra.mxu1 %v609_v8  ;;  %v1258_v12 = vsel %vm471_vm0, %v1791_v5, 0  ;;  %vm1165_vm2 = vcmask 1046528   ;;  %vm273_vm3 = vsmask.f32 7424  ;;  %s1857_s3 = smul.u32 136, %s2211_s10  ;;  %vm1490_vm4 = vcmask 60416  }
  0x10   : > { %1267 = vmatpush.bf16.msra.mxu3 %v1258_v12  ;;  %v1028_v14 = vsel %vm471_vm0, %v1768_v9, 0  ;;  %s1930_s30 = scalar_lea.vmem %s2207_s0, %s1856_s27  ;;  %v473_v15 = vsel %vm471_vm0, %v1660_v13, 0 }
  0x11   : > { %1037 = vmatpush.bf16.msra.mxu2 %v1028_v14  ;;  %v1811_v16 = vld [vmem:[%s1930_s30] sm:$0xff]  ;;  %v1853_v17 = vld [vmem:[%s1930_s30 + $0x8] sm:$0xf0]  ;;  %v1830_v18 = vld [vmem:[%s1930_s30 + $0x10] sm:$0xff]  ;;  %482 = vmatpush.bf16.msra.mxu0 %v473_v15  ;;  %s2030_s6 = scalar_lea.vmem %s2209_s2, %s1857_s3 }
  0x12   : > { %v1854_v19 = vld [vmem:[%s1930_s30 + $0x8] sm:$0xe]  ;;  %v277_v22 = vshll.u32 %v1811_v16, 16  ;;  %1682 = vmatmul.msk.bf16.vlgmr.msra.gmra.mxu1 %vm419_vm1, %v1811_v16  ;;  %v1167_v24 = vrot.slane %v1830_v18, 1  ;;  %v839_v27 = vshll.u32 %v1830_v18, 16  ;;  %v275_v28 = vshrl.u32 %v1811_v16, 16 }
  0x13   : > { %v1852_v20 = vld [vmem:[%s1930_s30 + $0x8] sm:$0xff]   ;;  %v1855_v23 = vor.u32 %v1854_v19, %v1853_v17  ;;  %v1813_v40 = vld [vmem:[%s1930_s30 + $0x10] sm:$0xff]  ;;  %v1831_v41 = vld [vmem:[%s1930_s30 + $0x18] sm:$0xff]  ;;  %v843_v44 = vshrl.u32 %v1830_v18, 16 }
  0x14   : > { %v1812_v21 = vld [vmem:[%s1930_s30 + $0x8] sm:$0xff]  ;;  %v832_v25 = vshrl.u32 %v1852_v20, 16  ;;  %v834_v26 = vshll.u32 %v1852_v20, 16  ;;  %v279_v31 = vrot.slane %v277_v22, 1  ;;  %v841_v33 = vrot.slane %v839_v27, 1  ;;  %v1814_v54 = vld [vmem:[%s1930_s30 + $0x18] sm:$0xff] }
  0x15   : > { %v282_v29 = vshll.u32 %v1812_v21, 16  ;;  %v1166_v30 = vrot.slane %v1855_v23, 1  ;;  %v286_v42 = vshrl.u32 %v1812_v21, 16  ;;  %v290_v43 = vshll.u32 %v1813_v40, 16  ;;  %v1832_v55 = vld [vmem:[%s1930_s30 + $0x20] sm:$0xff]  ;;  %v1833_v5 = vld [vmem:[%s1930_s30 + $0x28] sm:$0xff] }
  0x16   : > { %v836_v32 = vrot.slane %v834_v26, 1  ;;  %v280_v36 = vor.u32 %v279_v31, %v275_v28  ;;  %v847_v45 = vshll.u32 %v1831_v41, 16  ;;  %v1169_v46 = vrot.slane %v1831_v41, 1  ;;  %v1815_v4 = vld [vmem:[%s1930_s30 + $0x20] sm:$0xff]  ;;  %v1816_v18 = vld [vmem:[%s1930_s30 + $0x28] sm:$0xff]  ;;  %v1834_v19 = vld [vmem:[%s1930_s30 + $0x30] sm:$0xff] }
  0x17   : > { %v284_v34 = vrot.slane %v282_v29, 1  ;;  %v1168_v35 = vsel %vm1165_vm2, %v1166_v30, %v1167_v24  ;;  %v292_v48 = vrot.slane %v290_v43, 1  ;;  %v845_v49 = vor.u32 %v843_v44, %v841_v33 }
  0x18   : > { %1792 = vmatmul.msk.bf16.vlgmr.msra.gmra.mxu3 %vm419_vm1, %v1168_v35  ;;  %v837_v37 = vor.u32 %v836_v32, %v832_v25  ;;  %v849_v50 = vrot.slane %v847_v45, 1  ;;  %v1170_v51 = vsel %vm1165_vm2, %v1167_v24, %v1169_v46  ;;  %v294_v56 = vshrl.u32 %v1813_v40, 16  ;;  %v1817_v32 = vld [vmem:[%s1930_s30 + $0x30] sm:$0xff] }
  0x19   : > { %v285_v38 = vsel %vm273_vm3, %v280_v36, %v284_v34  ;;  %v288_v47 = vor.u32 %v286_v42, %v284_v34  ;;  %v298_v57 = vshll.u32 %v1814_v54, 16  ;;  %v851_v58 = vshrl.u32 %v1831_v41, 16 }
  0x1a   : > { %v842_v39 = vsel %vm273_vm3, %v837_v37, %v841_v33  ;;  %1661 = vmatmul.msk.bf16.vlgmr.msra.gmra.mxu0 %vm419_vm1, %v285_v38  ;;  %v850_v53 = vsel %vm273_vm3, %v845_v49, %v849_v50  ;;  %v855_v59 = vshll.u32 %v1832_v55, 16  ;;  %v1171_v60 = vrot.slane %v1832_v55, 1  ;;  %v1835_v33 = vld [vmem:[%s1930_s30 + $0x38] sm:$0xff] }
  0x1b   : > { %1769 = vmatmul.msk.bf16.vlgmr.msra.gmra.mxu2 %vm419_vm1, %v842_v39  ;;  %v293_v52 = vsel %vm273_vm3, %v288_v47, %v292_v48  ;;  %v296_v61 = vor.u32 %v294_v56, %v292_v48  ;;  %v300_v62 = vrot.slane %v298_v57, 1  ;;  %v853_v63 = vor.u32 %v851_v58, %v849_v50  ;;  %v1836_v47 = vld [vmem:[%s1930_s30 + $0x40] sm:$0xff] }
  0x1c   : > { %v857_v0 = vrot.slane %v855_v59, 1  ;;  %v1172_v1 = vsel %vm1165_vm2, %v1169_v46, %v1171_v60  ;;  %v302_v6 = vshrl.u32 %v1814_v54, 16  ;;  %v306_v7 = vshll.u32 %v1815_v4, 16  ;;  %v1818_v46 = vld [vmem:[%s1930_s30 + $0x38] sm:$0xff] }
  0x1d   : > { %v301_v2 = vsel %vm273_vm3, %v296_v61, %v300_v62  ;;  %v859_v8 = vshrl.u32 %v1832_v55, 16  ;;  %v863_v9 = vshll.u32 %v1833_v5, 16  ;;  %v1173_v10 = vrot.slane %v1833_v5, 1  ;;  %v1837_v61 = vld [vmem:[%s1930_s30 + $0x48] sm:$0xff] }
  0x1e   : > { %v858_v3 = vsel %vm273_vm3, %v853_v63, %v857_v0  ;;  %v304_v11 = vor.u32 %v302_v6, %v300_v62  ;;  %v308_v12 = vrot.slane %v306_v7, 1  ;;  %v310_v20 = vshrl.u32 %v1815_v4, 16 }
  0x1f   : > { %v861_v13 = vor.u32 %v859_v8, %v857_v0  ;;  %v865_v14 = vrot.slane %v863_v9, 1  ;;  %v1174_v15 = vsel %vm1165_vm2, %v1171_v60, %v1173_v10  ;;  %v867_v22 = vshrl.u32 %v1833_v5, 16  ;;  %v1819_v60 = vld [vmem:[%s1930_s30 + $0x40] sm:$0xff] }
  0x20   : > { %v309_v16 = vsel %vm273_vm3, %v304_v11, %v308_v12  ;;  %v871_v23 = vshll.u32 %v1834_v19, 16  ;;  %v1175_v24 = vrot.slane %v1834_v19, 1  ;;  %v312_v25 = vor.u32 %v310_v20, %v308_v12  ;;  %v1838_v11 = vld [vmem:[%s1930_s30 + $0x50] sm:$0xff] }
  0x21   : > { %v866_v17 = vsel %vm273_vm3, %v861_v13, %v865_v14  ;;  %v869_v27 = vor.u32 %v867_v22, %v865_v14  ;;  %v318_v34 = vshrl.u32 %v1816_v18, 16  ;;  %v322_v35 = vshll.u32 %v1817_v32, 16 }
  0x22   : > { %1683 = vmatmul.msk.bf16.gmra.mxu1 %vm419_vm1, %v1812_v21  ;;  %v314_v21 = vshll.u32 %v1816_v18, 16  ;;  %v873_v28 = vrot.slane %v871_v23, 1  ;;  %v1176_v29 = vsel %vm1165_vm2, %v1173_v10, %v1175_v24  ;;  %v875_v36 = vshrl.u32 %v1834_v19, 16  ;;  %v1820_v10 = vld [vmem:[%s1930_s30 + $0x48] sm:$0xff] }
  0x23   : > { %v879_v37 = vshll.u32 %v1835_v33, 16  ;;  %v1177_v38 = vrot.slane %v1835_v33, 1  ;;  %v326_v48 = vshrl.u32 %v1817_v32, 16  ;;  %v330_v49 = vshll.u32 %v1818_v46, 16 }
  0x24   : > { %v316_v26 = vrot.slane %v314_v21, 1  ;;  %v874_v31 = vsel %vm273_vm3, %v869_v27, %v873_v28  ;;  %v877_v41 = vor.u32 %v875_v36, %v873_v28  ;;  %v883_v50 = vshrl.u32 %v1835_v33, 16 }
  0x25   : > { %v881_v42 = vrot.slane %v879_v37, 1  ;;  %v1178_v43 = vsel %vm1165_vm2, %v1175_v24, %v1177_v38  ;;  %v334_v62 = vshrl.u32 %v1818_v46, 16  ;;  %v338_v63 = vshll.u32 %v1819_v60, 16 }
  0x26   : > { %v317_v30 = vsel %vm273_vm3, %v312_v25, %v316_v26  ;;  %v320_v39 = vor.u32 %v318_v34, %v316_v26  ;;  %v891_v0 = vshrl.u32 %v1836_v47, 16  ;;  %v342_v12 = vshrl.u32 %v1819_v60, 16 }
  0x27   : > { %v882_v45 = vsel %vm273_vm3, %v877_v41, %v881_v42  ;;  %v885_v55 = vor.u32 %v883_v50, %v881_v42  ;;  %v346_v13 = vshll.u32 %v1820_v10, 16  ;;  %v350_v34 = vshrl.u32 %v1820_v10, 16 }
  0x28   : > { %1793 = vmatmul.msk.bf16.gmra.mxu3 %vm419_vm1, %v1170_v51  ;;  %v887_v51 = vshll.u32 %v1836_v47, 16  ;;  %v907_v37 = vshrl.u32 %v1838_v11, 16 }
  0x29   : > { %v348_v19 = vrot.slane %v346_v13, 1 }
  0x2a   : > { %1662 = vmatmul.msk.bf16.gmra.mxu0 %vm419_vm1, %v293_v52  ;;  %v1179_v52 = vrot.slane %v1836_v47, 1  ;;  %v889_v56 = vrot.slane %v887_v51, 1 }
  0x2b   : > { %1770 = vmatmul.msk.bf16.gmra.mxu2 %vm419_vm1, %v850_v53 }
  0x2c   : > { %v1180_v57 = vsel %vm1165_vm2, %v1177_v38, %v1179_v52  ;;  %v890_v59 = vsel %vm273_vm3, %v885_v55, %v889_v56  ;;  %v893_v5 = vor.u32 %v891_v0, %v889_v56 }
  0x32   : > { %1684 = vmatmul.msk.bf16.gmra.mxu1 %vm419_vm1, %v1813_v40  ;;  %v324_v40 = vrot.slane %v322_v35, 1 }
  0x34   : > { %v325_v44 = vsel %vm273_vm3, %v320_v39, %v324_v40  ;;  %v328_v53 = vor.u32 %v326_v48, %v324_v40 }
  0x38   : > { %1794 = vmatmul.msk.bf16.gmra.mxu3 %vm419_vm1, %v1172_v1  ;;  %v895_v1 = vshll.u32 %v1837_v61, 16 }
  0x3a   : > { %1663 = vmatmul.msk.bf16.gmra.mxu0 %vm419_vm1, %v301_v2  ;;  %v1181_v2 = vrot.slane %v1837_v61, 1  ;;  %v897_v6 = vrot.slane %v895_v1, 1 }
  0x3b   : > { %1771 = vmatmul.msk.bf16.gmra.mxu2 %vm419_vm1, %v858_v3 }
  0x3c   : > { %v1182_v7 = vsel %vm1165_vm2, %v1179_v52, %v1181_v2  ;;  %v898_v9 = vsel %vm273_vm3, %v893_v5, %v897_v6 }
  0x42   : > { %1685 = vmatmul.msk.bf16.gmra.mxu1 %vm419_vm1, %v1814_v54  ;;  %v332_v54 = vrot.slane %v330_v49, 1 }
  0x44   : > { %v333_v58 = vsel %vm273_vm3, %v328_v53, %v332_v54  ;;  %v336_v3 = vor.u32 %v334_v62, %v332_v54  ;;  %v2041_v62 = vld [vmem:[%s1930_s30 + $0x60] sm:$0xff] }
  0x48   : > { %1795 = vmatmul.msk.bf16.gmra.mxu3 %vm419_vm1, %v1174_v15  ;;  %v899_v15 = vshrl.u32 %v1837_v61, 16  ;;  %v1822_v61 = vld [vmem:[%s1930_s30 + $0x58] sm:$0xff] }
  0x49   : > { %v362_v5 = vshll.u32 %v1822_v61, 16 }
  0x4a   : > { %1664 = vmatmul.msk.bf16.gmra.mxu0 %vm419_vm1, %v309_v16  ;;  %v903_v16 = vshll.u32 %v1838_v11, 16  ;;  %v901_v20 = vor.u32 %v899_v15, %v897_v6 }
  0x4b   : > { %1772 = vmatmul.msk.bf16.gmra.mxu2 %vm419_vm1, %v866_v17  ;;  %v1183_v17 = vrot.slane %v1838_v11, 1 }
  0x4c   : > { %v905_v21 = vrot.slane %v903_v16, 1 }
  0x4d   : > { %v1184_v22 = vsel %vm1165_vm2, %v1181_v2, %v1183_v17 }
  0x4e   : > { %v906_v25 = vsel %vm273_vm3, %v901_v20, %v905_v21 }
  0x52   : > { %1686 = vmatmul.msk.bf16.gmra.mxu1 %vm419_vm1, %v1815_v4  ;;  %v340_v4 = vrot.slane %v338_v63, 1 }
  0x54   : > { %v341_v8 = vsel %vm273_vm3, %v336_v3, %v340_v4 }
  0x58   : > { %1796 = vmatmul.msk.bf16.gmra.mxu3 %vm419_vm1, %v1176_v29  ;;  %v1821_v29 = vld [vmem:[%s1930_s30 + $0x50] sm:$0xff] }
  0x59   : > { %v354_v35 = vshll.u32 %v1821_v29, 16 }
  0x5a   : > { %1665 = vmatmul.msk.bf16.gmra.mxu0 %vm419_vm1, %v317_v30  ;;  %v2020_v30 = vld [vmem:[%s1930_s30 + $0x58] sm:$0xff] }
  0x5b   : > { %1773 = vmatmul.msk.bf16.gmra.mxu2 %vm419_vm1, %v874_v31  ;;  %v911_v38 = vshll.u32 %v2020_v30, 16  ;;  %v1185_v40 = vrot.slane %v2020_v30, 1 }
  0x5d   : > { %v1186_v49 = vsel %vm1165_vm2, %v1183_v17, %v1185_v40 }
  0x62   : > { %1687 = vmatmul.msk.bf16.gmra.mxu1 %vm419_vm1, %v1816_v18  ;;  %v344_v18 = vor.u32 %v342_v12, %v340_v4  ;;  %v358_v4 = vshrl.u32 %v1821_v29, 16 }
  0x64   : > { %v349_v24 = vsel %vm273_vm3, %v344_v18, %v348_v19 }
  0x68   : > { %1797 = vmatmul.msk.bf16.gmra.mxu3 %vm419_vm1, %v1178_v43  ;;  %v352_v43 = vor.u32 %v350_v34, %v348_v19 }
  0x6a   : > { %1666 = vmatmul.msk.bf16.gmra.mxu0 %vm419_vm1, %v325_v44  ;;  %v356_v44 = vrot.slane %v354_v35, 1 }
  0x6b   : > { %1774 = vmatmul.msk.bf16.gmra.mxu2 %vm419_vm1, %v882_v45  ;;  %v909_v45 = vor.u32 %v907_v37, %v905_v21 }
  0x6c   : > { %v357_v54 = vsel %vm273_vm3, %v352_v43, %v356_v44  ;;  %v360_v13 = vor.u32 %v358_v4, %v356_v44 }
  0x72   : > { %1688 = vmatmul.msk.bf16.gmra.mxu1 %vm419_vm1, %v1817_v32 }
  0x78   : > { %1798 = vmatmul.msk.bf16.gmra.mxu3 %vm419_vm1, %v1180_v57 }
  0x7a   : > { %1667 = vmatmul.msk.bf16.gmra.mxu0 %vm419_vm1, %v333_v58 }
  0x7b   : > { %1775 = vmatmul.msk.bf16.gmra.mxu2 %vm419_vm1, %v890_v59 }
  0x82   : > { %1689 = vmatmul.msk.bf16.gmra.mxu1 %vm419_vm1, %v1818_v46  ;;  %v913_v46 = vrot.slane %v911_v38, 1  ;;  %v366_v38 = vshrl.u32 %v1822_v61, 16 }
  0x84   : > { %v914_v55 = vsel %vm273_vm3, %v909_v45, %v913_v46 }
  0x88   : > { %1799 = vmatmul.msk.bf16.gmra.mxu3 %vm419_vm1, %v1182_v7  ;;  %v915_v7 = vshrl.u32 %v2020_v30, 16 }
  0x8a   : > { %1668 = vmatmul.msk.bf16.gmra.mxu0 %vm419_vm1, %v341_v8  ;;  %v919_v8 = vshll.u32 %v2041_v62, 16  ;;  %v917_v15 = vor.u32 %v915_v7, %v913_v46 }
  0x8b   : > { %1776 = vmatmul.msk.bf16.gmra.mxu2 %vm419_vm1, %v898_v9 }
  0x8c   : > { %v921_v16 = vrot.slane %v919_v8, 1 }
  0x8f   : > { %v620_v14 = vpop.f32.mrf.mxu1 }
  0x92   : > { %1690 = vmatmul.msk.bf16.gmra.mxu1 %vm419_vm1, %v1819_v60 }
  0x97   : > { %v484_v23 = vpop.f32.mrf.mxu0  ;;  %v622_v26 = vpop.f32.mrf.mxu1 }
  0x98   : > { %1800 = vmatmul.msk.bf16.gmra.mxu3 %vm419_vm1, %v1184_v22  ;;  %v621_v27 = vadd.f32 %v620_v14, %v484_v23  ;;  %v364_v14 = vrot.slane %v362_v5, 1 }
  0x9a   : > { %1669 = vmatmul.msk.bf16.gmra.mxu0 %vm419_vm1, %v349_v24  ;;  %v365_v24 = vsel %vm273_vm3, %v360_v13, %v364_v14 }
  0x9b   : > { %1777 = vmatmul.msk.bf16.gmra.mxu2 %vm419_vm1, %v906_v25  ;;  %v1269_v28 = vpop.f32.mrf.mxu3  ;;  %v922_v25 = vsel %vm273_vm3, %v917_v15, %v921_v16 }
  0x9e   : > { %v1039_v31 = vpop.f32.mrf.mxu2 }
  0x9f   : > { %v1124_v32 = vadd.f32 %v1039_v31, %v621_v27  ;;  %v486_v33 = vpop.f32.mrf.mxu0  ;;  %v625_v36 = vpop.f32.mrf.mxu1  ;;  %v1823_v31 = vld [vmem:[%s1930_s30 + $0x60] sm:$0xff] }
  0xa0   : > { %v623_v48 = vadd.f32 %v622_v26, %v486_v33  ;;  %v374_v8 = vshrl.u32 %v1823_v31, 16 }
  0xa1   : > { %v1354_v39 = vadd.f32 %v1269_v28, %v1124_v32  ;;  %v2059_v32 = vld [vmem:[%s1930_s30 + $0x68] sm:$0xff] }
  0xa2   : > { %1691 = vmatmul.msk.bf16.gmra.mxu1 %vm419_vm1, %v1820_v10  ;;  %v1187_v10 = vrot.slane %v2041_v62, 1  ;;  %v1189_v44 = vrot.slane %v2059_v32, 1 }
  0xa3   : > { %v1388_v41 = vmul.f32 0.2, %v1354_v39  ;;  %v1271_v42 = vpop.f32.mrf.mxu3 }
  0xa4   : > { %v1188_v19 = vsel %vm1165_vm2, %v1185_v40, %v1187_v10 }
  0xa5   : > { %v1422_v47 = vmax.f32 %v1354_v39, %v1388_v41  ;;  %v370_v39 = vshll.u32 %v1823_v31, 16  ;;  %v923_v41 = vshrl.u32 %v2041_v62, 16 }
  0xa6   : > { %v1041_v50 = vpop.f32.mrf.mxu2 }
  0xa7   : > { %v1456_v51 = vpack.c.bf16 %v1422_v47, %v1422_v47  ;;  %v1125_v52 = vadd.f32 %v1041_v50, %v623_v48  ;;  %v489_v53 = vpop.f32.mrf.mxu0  ;;  %v627_v56 = vpop.f32.mrf.mxu1  ;;  %v368_v47 = vor.u32 %v366_v38, %v364_v14  ;;  %v372_v48 = vrot.slane %v370_v39, 1 }
  0xa8   : > { %1801 = vmatmul.msk.bf16.gmra.mxu3 %vm419_vm1, %v1186_v49  ;;  %v626_v59 = vadd.f32 %v625_v36, %v489_v53  ;;  %v925_v49 = vor.u32 %v923_v41, %v921_v16  ;;  %v1190_v53 = vsel %vm1165_vm2, %v1187_v10, %v1189_v44 }
  0xa9   : > { %1491 = vst.msk [vmem:[%s2030_s6] sm:$0xf] %vm1490_vm4, %v1456_v51  ;;  %v1355_v57 = vadd.f32 %v1271_v42, %v1125_v52  ;;  %v927_v42 = vshll.u32 %v2059_v32, 16 }
  0xaa   : > { %1670 = vmatmul.msk.bf16.gmra.mxu0 %vm419_vm1, %v357_v54 }
  0xab   : > { %v1389_v58 = vmul.f32 0.2, %v1355_v57  ;;  %1778 = vmatmul.msk.bf16.gmra.mxu2 %vm419_vm1, %v914_v55  ;;  %v1274_v60 = vpop.f32.mrf.mxu3  ;;  %v929_v50 = vrot.slane %v927_v42, 1 }
  0xad   : > { %v1423_v63 = vmax.f32 %v1355_v57, %v1389_v58  ;;  %v373_v58 = vsel %vm273_vm3, %v368_v47, %v372_v48 }
  0xae   : > { %v1044_v0 = vpop.f32.mrf.mxu2 }
  0xaf   : > { %v1457_v1 = vpack.c.bf16 %v1423_v63, %v1423_v63  ;;  %v1126_v2 = vadd.f32 %v1044_v0, %v626_v59  ;;  %v491_v3 = vpop.f32.mrf.mxu0  ;;  %v630_v6 = vpop.f32.mrf.mxu1  ;;  %v930_v59 = vsel %vm273_vm3, %v925_v49, %v929_v50 }
  0xb0   : > { %v628_v18 = vadd.f32 %v627_v56, %v491_v3 }
  0xb1   : > { %1492 = vst.msk [vmem:[%s2030_s6 + $0x4] sm:$0xf] %vm1490_vm4, %v1457_v1  ;;  %v1356_v9 = vadd.f32 %v1274_v60, %v1126_v2  ;;  %v1824_v1 = vld [vmem:[%s1930_s30 + $0x68] sm:$0xff]  ;;  %v2077_v2 = vld [vmem:[%s1930_s30 + $0x70] sm:$0xff] }
  0xb2   : > { %1692 = vmatmul.msk.bf16.gmra.mxu1 %vm419_vm1, %v1821_v29  ;;  %v1191_v14 = vrot.slane %v2077_v2, 1  ;;  %v382_v42 = vshrl.u32 %v1824_v1, 16 }
  0xb3   : > { %v1390_v11 = vmul.f32 0.2, %v1356_v9  ;;  %v1276_v12 = vpop.f32.mrf.mxu3 }
  0xb5   : > { %v1424_v17 = vmax.f32 %v1356_v9, %v1390_v11  ;;  %v378_v9 = vshll.u32 %v1824_v1, 16  ;;  %v931_v11 = vshrl.u32 %v2059_v32, 16 }
  0xb6   : > { %v1046_v20 = vpop.f32.mrf.mxu2 }
  0xb7   : > { %v1458_v21 = vpack.c.bf16 %v1424_v17, %v1424_v17  ;;  %v1127_v22 = vadd.f32 %v1046_v20, %v628_v18  ;;  %v494_v23 = vpop.f32.mrf.mxu0  ;;  %v632_v26 = vpop.f32.mrf.mxu1  ;;  %v376_v17 = vor.u32 %v374_v8, %v372_v48  ;;  %v380_v18 = vrot.slane %v378_v9, 1 }
  0xb8   : > { %1802 = vmatmul.msk.bf16.gmra.mxu3 %vm419_vm1, %v1188_v19  ;;  %v631_v29 = vadd.f32 %v630_v6, %v494_v23  ;;  %v933_v19 = vor.u32 %v931_v11, %v929_v50  ;;  %v1192_v23 = vsel %vm1165_vm2, %v1189_v44, %v1191_v14 }
  0xb9   : > { %1493 = vst.msk [vmem:[%s2030_s6 + $0x8] sm:$0xf] %vm1490_vm4, %v1458_v21  ;;  %v1357_v27 = vadd.f32 %v1276_v12, %v1127_v22  ;;  %v935_v12 = vshll.u32 %v2077_v2, 16 }
  0xba   : > { %1671 = vmatmul.msk.bf16.gmra.mxu0 %vm419_vm1, %v365_v24 }
  0xbb   : > { %v1391_v28 = vmul.f32 0.2, %v1357_v27  ;;  %1779 = vmatmul.msk.bf16.gmra.mxu2 %vm419_vm1, %v922_v25  ;;  %v1279_v30 = vpop.f32.mrf.mxu3  ;;  %v937_v20 = vrot.slane %v935_v12, 1 }
  0xbd   : > { %v1425_v33 = vmax.f32 %v1357_v27, %v1391_v28  ;;  %v381_v28 = vsel %vm273_vm3, %v376_v17, %v380_v18 }
  0xbe   : > { %v1049_v34 = vpop.f32.mrf.mxu2 }
  0xbf   : > { %v1459_v35 = vpack.c.bf16 %v1425_v33, %v1425_v33  ;;  %v1128_v36 = vadd.f32 %v1049_v34, %v631_v29  ;;  %v496_v37 = vpop.f32.mrf.mxu0  ;;  %v635_v40 = vpop.f32.mrf.mxu1  ;;  %v938_v29 = vsel %vm273_vm3, %v933_v19, %v937_v20 }
  0xc0   : > { %v633_v52 = vadd.f32 %v632_v26, %v496_v37 }
  0xc1   : > { %1494 = vst.msk [vmem:[%s2030_s6 + $0xc] sm:$0xf] %vm1490_vm4, %v1459_v35  ;;  %v1358_v43 = vadd.f32 %v1279_v30, %v1128_v36  ;;  %v1825_v35 = vld [vmem:[%s1930_s30 + $0x70] sm:$0xff]  ;;  %v2095_v36 = vld [vmem:[%s1930_s30 + $0x78] sm:$0xff] }
  0xc2   : > { %1693 = vmatmul.msk.bf16.gmra.mxu1 %vm419_vm1, %v1822_v61  ;;  %v1193_v48 = vrot.slane %v2095_v36, 1  ;;  %v390_v12 = vshrl.u32 %v1825_v35, 16 }
  0xc3   : > { %v1392_v45 = vmul.f32 0.2, %v1358_v43  ;;  %v1281_v46 = vpop.f32.mrf.mxu3 }
  0xc5   : > { %v1426_v51 = vmax.f32 %v1358_v43, %v1392_v45  ;;  %v386_v43 = vshll.u32 %v1825_v35, 16  ;;  %v939_v45 = vshrl.u32 %v2077_v2, 16 }
  0xc6   : > { %v1051_v54 = vpop.f32.mrf.mxu2 }
  0xc7   : > { %v1460_v55 = vpack.c.bf16 %v1426_v51, %v1426_v51  ;;  %v1129_v56 = vadd.f32 %v1051_v54, %v633_v52  ;;  %v499_v57 = vpop.f32.mrf.mxu0  ;;  %v637_v60 = vpop.f32.mrf.mxu1  ;;  %v384_v51 = vor.u32 %v382_v42, %v380_v18  ;;  %v388_v52 = vrot.slane %v386_v43, 1 }
  0xc8   : > { %1803 = vmatmul.msk.bf16.gmra.mxu3 %vm419_vm1, %v1190_v53  ;;  %v636_v63 = vadd.f32 %v635_v40, %v499_v57  ;;  %v941_v53 = vor.u32 %v939_v45, %v937_v20  ;;  %v1194_v57 = vsel %vm1165_vm2, %v1191_v14, %v1193_v48 }
  0xc9   : > { %1495 = vst.msk [vmem:[%s2030_s6 + $0x10] sm:$0xf] %vm1490_vm4, %v1460_v55  ;;  %v1359_v61 = vadd.f32 %v1281_v46, %v1129_v56  ;;  %v943_v46 = vshll.u32 %v2095_v36, 16 }
  0xca   : > { %1672 = vmatmul.msk.bf16.gmra.mxu0 %vm419_vm1, %v373_v58 }
  0xcb   : > { %v1393_v62 = vmul.f32 0.2, %v1359_v61  ;;  %1780 = vmatmul.msk.bf16.gmra.mxu2 %vm419_vm1, %v930_v59  ;;  %v1284_v0 = vpop.f32.mrf.mxu3  ;;  %v945_v54 = vrot.slane %v943_v46, 1 }
  0xcd   : > { %v1427_v3 = vmax.f32 %v1359_v61, %v1393_v62  ;;  %v389_v62 = vsel %vm273_vm3, %v384_v51, %v388_v52 }
  0xce   : > { %v1054_v4 = vpop.f32.mrf.mxu2 }
  0xcf   : > { %v1461_v5 = vpack.c.bf16 %v1427_v3, %v1427_v3  ;;  %v1130_v6 = vadd.f32 %v1054_v4, %v636_v63  ;;  %v501_v7 = vpop.f32.mrf.mxu0  ;;  %v640_v10 = vpop.f32.mrf.mxu1  ;;  %v946_v63 = vsel %vm273_vm3, %v941_v53, %v945_v54 }
  0xd0   : > { %v638_v22 = vadd.f32 %v637_v60, %v501_v7 }
  0xd1   : > { %1496 = vst.msk [vmem:[%s2030_s6 + $0x14] sm:$0xf] %vm1490_vm4, %v1461_v5  ;;  %v1360_v13 = vadd.f32 %v1284_v0, %v1130_v6  ;;  %v1826_v5 = vld [vmem:[%s1930_s30 + $0x78] sm:$0xff]  ;;  %v2113_v6 = vld [vmem:[%s1930_s30 + $0x80] sm:$0xff] }
  0xd2   : > { %1694 = vmatmul.msk.bf16.gmra.mxu1 %vm419_vm1, %v1823_v31  ;;  %v1195_v18 = vrot.slane %v2113_v6, 1  ;;  %v398_v46 = vshrl.u32 %v1826_v5, 16 }
  0xd3   : > { %v1394_v15 = vmul.f32 0.2, %v1360_v13  ;;  %v1286_v16 = vpop.f32.mrf.mxu3 }
  0xd5   : > { %v1428_v21 = vmax.f32 %v1360_v13, %v1394_v15  ;;  %v394_v13 = vshll.u32 %v1826_v5, 16  ;;  %v947_v15 = vshrl.u32 %v2095_v36, 16 }
  0xd6   : > { %v1056_v24 = vpop.f32.mrf.mxu2 }
  0xd7   : > { %v1462_v25 = vpack.c.bf16 %v1428_v21, %v1428_v21  ;;  %v1131_v26 = vadd.f32 %v1056_v24, %v638_v22  ;;  %v504_v27 = vpop.f32.mrf.mxu0  ;;  %v642_v30 = vpop.f32.mrf.mxu1  ;;  %v392_v21 = vor.u32 %v390_v12, %v388_v52  ;;  %v396_v22 = vrot.slane %v394_v13, 1 }
  0xd8   : > { %1804 = vmatmul.msk.bf16.gmra.mxu3 %vm419_vm1, %v1192_v23  ;;  %v641_v33 = vadd.f32 %v640_v10, %v504_v27  ;;  %v949_v23 = vor.u32 %v947_v15, %v945_v54  ;;  %v1196_v27 = vsel %vm1165_vm2, %v1193_v48, %v1195_v18 }
  0xd9   : > { %1497 = vst.msk [vmem:[%s2030_s6 + $0x18] sm:$0xf] %vm1490_vm4, %v1462_v25  ;;  %v1361_v31 = vadd.f32 %v1286_v16, %v1131_v26  ;;  %v951_v16 = vshll.u32 %v2113_v6, 16 }
  0xda   : > { %1673 = vmatmul.msk.bf16.gmra.mxu0 %vm419_vm1, %v381_v28 }
  0xdb   : > { %v1395_v32 = vmul.f32 0.2, %v1361_v31  ;;  %1781 = vmatmul.msk.bf16.gmra.mxu2 %vm419_vm1, %v938_v29  ;;  %v1289_v34 = vpop.f32.mrf.mxu3  ;;  %v953_v24 = vrot.slane %v951_v16, 1 }
  0xdd   : > { %v1429_v37 = vmax.f32 %v1361_v31, %v1395_v32  ;;  %v397_v32 = vsel %vm273_vm3, %v392_v21, %v396_v22 }
  0xde   : > { %v1059_v38 = vpop.f32.mrf.mxu2 }
  0xdf   : > { %v1463_v39 = vpack.c.bf16 %v1429_v37, %v1429_v37  ;;  %v1132_v40 = vadd.f32 %v1059_v38, %v641_v33  ;;  %v506_v41 = vpop.f32.mrf.mxu0  ;;  %v645_v44 = vpop.f32.mrf.mxu1  ;;  %v954_v33 = vsel %vm273_vm3, %v949_v23, %v953_v24 }
  0xe0   : > { %v643_v56 = vadd.f32 %v642_v30, %v506_v41 }
  0xe1   : > { %1498 = vst.msk [vmem:[%s2030_s6 + $0x1c] sm:$0xf] %vm1490_vm4, %v1463_v39  ;;  %v1362_v47 = vadd.f32 %v1289_v34, %v1132_v40  ;;  %v2130_v39 = vld [vmem:[%s1930_s30 + $0x80] sm:$0xff]  ;;  %v2133_v40 = vld [vmem:[%s1930_s30 + $0x88] sm:$0xff] }
  0xe2   : > { %1695 = vmatmul.msk.bf16.gmra.mxu1 %vm419_vm1, %v1824_v1  ;;  %v1197_v52 = vrot.slane %v2133_v40, 1  ;;  %v963_v23 = vshrl.u32 %v2133_v40, 16 }
  0xe3   : > { %v1396_v49 = vmul.f32 0.2, %v1362_v47  ;;  %v1291_v50 = vpop.f32.mrf.mxu3 }
  0xe5   : > { %v1430_v55 = vmax.f32 %v1362_v47, %v1396_v49  ;;  %v402_v47 = vshll.u32 %v2130_v39, 16  ;;  %v955_v49 = vshrl.u32 %v2113_v6, 16 }
  0xe6   : > { %v1061_v58 = vpop.f32.mrf.mxu2 }
  0xe7   : > { %v1464_v59 = vpack.c.bf16 %v1430_v55, %v1430_v55  ;;  %v1133_v60 = vadd.f32 %v1061_v58, %v643_v56  ;;  %v509_v61 = vpop.f32.mrf.mxu0  ;;  %v647_v0 = vpop.f32.mrf.mxu1  ;;  %v400_v55 = vor.u32 %v398_v46, %v396_v22  ;;  %v404_v56 = vrot.slane %v402_v47, 1 }
  0xe8   : > { %1805 = vmatmul.msk.bf16.gmra.mxu3 %vm419_vm1, %v1194_v57  ;;  %v646_v3 = vadd.f32 %v645_v44, %v509_v61  ;;  %v957_v57 = vor.u32 %v955_v49, %v953_v24 }
  0xe9   : > { %1499 = vst.msk [vmem:[%s2030_s6 + $0x20] sm:$0xf] %vm1490_vm4, %v1464_v59  ;;  %v1363_v1 = vadd.f32 %v1291_v50, %v1133_v60  ;;  %v959_v50 = vshll.u32 %v2133_v40, 16  ;;  %v181_v59 = vld [vmem:[%s1930_s30 + $0x88] sm:$0x1] }
  0xea   : > { %1674 = vmatmul.msk.bf16.gmra.mxu0 %vm419_vm1, %v389_v62  ;;  %v1198_v62 = vsel %vm1165_vm2, %v1195_v18, %v1197_v52  ;;  %v254_v6 = vunpack.c.l.b16 %v181_v59 }
  0xeb   : > { %v1397_v2 = vmul.f32 0.2, %v1363_v1  ;;  %1782 = vmatmul.msk.bf16.gmra.mxu2 %vm419_vm1, %v946_v63  ;;  %v1294_v4 = vpop.f32.mrf.mxu3  ;;  %v961_v58 = vrot.slane %v959_v50, 1  ;;  %v739_v63 = vld [vmem:[%s1930_s30 + $0x90] sm:$0x1] }
  0xec   : > { %v272_v13 = vpack.c.b16 %v254_v6, %v254_v6 }
  0xed   : > { %v1431_v7 = vmax.f32 %v1363_v1, %v1397_v2 }
  0xee   : > { %v1064_v8 = vpop.f32.mrf.mxu2  ;;  %v410_v21 = vshll.u32 %v272_v13, 16 }
  0xef   : > { %v1465_v9 = vpack.c.bf16 %v1431_v7, %v1431_v7  ;;  %v1134_v10 = vadd.f32 %v1064_v8, %v646_v3  ;;  %v511_v11 = vpop.f32.mrf.mxu0  ;;  %v650_v14 = vpop.f32.mrf.mxu1  ;;  %v812_v8 = vunpack.c.l.b16 %v739_v63 }
  0xf0   : > { %v648_v26 = vadd.f32 %v647_v0, %v511_v11 }
  0xf1   : > { %1500 = vst.msk [vmem:[%s2030_s6 + $0x24] sm:$0xf] %vm1490_vm4, %v1465_v9  ;;  %v1364_v17 = vadd.f32 %v1294_v4, %v1134_v10  ;;  %v405_v4 = vsel %vm273_vm3, %v400_v55, %v404_v56 }
  0xf2   : > { %1696 = vmatmul.msk.bf16.gmra.mxu1 %vm419_vm1, %v1825_v35 }
  0xf3   : > { %v1398_v19 = vmul.f32 0.2, %v1364_v17  ;;  %v1296_v20 = vpop.f32.mrf.mxu3 }
  0xf5   : > { %v1432_v25 = vmax.f32 %v1364_v17, %v1398_v19 }
  0xf6   : > { %v1066_v28 = vpop.f32.mrf.mxu2 }
  0xf7   : > { %v1466_v29 = vpack.c.bf16 %v1432_v25, %v1432_v25  ;;  %v1135_v30 = vadd.f32 %v1066_v28, %v648_v26  ;;  %v514_v31 = vpop.f32.mrf.mxu0  ;;  %v652_v34 = vpop.f32.mrf.mxu1 }
  0xf8   : > { %1806 = vmatmul.msk.bf16.gmra.mxu3 %vm419_vm1, %v1196_v27  ;;  %v651_v37 = vadd.f32 %v650_v14, %v514_v31  ;;  %v830_v14 = vpack.c.b16 %v812_v8, %v812_v8  ;;  %v965_v31 = vor.u32 %v963_v23, %v961_v58 }
  0xf9   : > { %1501 = vst.msk [vmem:[%s2030_s6 + $0x28] sm:$0xf] %vm1490_vm4, %v1466_v29  ;;  %v1365_v35 = vadd.f32 %v1296_v20, %v1135_v30  ;;  %v406_v20 = vshrl.u32 %v2130_v39, 16  ;;  %v412_v30 = vrot.slane %v410_v21, 1 }
  0xfa   : > { %1675 = vmatmul.msk.bf16.gmra.mxu0 %vm419_vm1, %v397_v32  ;;  %v967_v24 = vshll.u32 %v830_v14, 16  ;;  %v1199_v26 = vrot.slane %v830_v14, 1 }
  0xfb   : > { %v1399_v36 = vmul.f32 0.2, %v1365_v35  ;;  %1783 = vmatmul.msk.bf16.gmra.mxu2 %vm419_vm1, %v954_v33  ;;  %v1299_v38 = vpop.f32.mrf.mxu3  ;;  %v408_v29 = vor.u32 %v406_v20, %v404_v56 }
  0xfc   : > { %v969_v32 = vrot.slane %v967_v24, 1 }
  0xfd   : > { %v1433_v41 = vmax.f32 %v1365_v35, %v1399_v36  ;;  %v1200_v35 = vsel %vm1165_vm2, %v1197_v52, %v1199_v26 }
  0xfe   : > { %v1069_v42 = vpop.f32.mrf.mxu2 }
  0xff   : > { %v1467_v43 = vpack.c.bf16 %v1433_v41, %v1433_v41  ;;  %v1136_v44 = vadd.f32 %v1069_v42, %v651_v37  ;;  %v516_v45 = vpop.f32.mrf.mxu0  ;;  %v655_v48 = vpop.f32.mrf.mxu1  ;;  %v413_v41 = vsel %vm273_vm3, %v408_v29, %v412_v30 }
 0x100   : > { %v653_v61 = vadd.f32 %v652_v34, %v516_v45 }
 0x101   : > { %1502 = vst.msk [vmem:[%s2030_s6 + $0x2c] sm:$0xf] %vm1490_vm4, %v1467_v43  ;;  %v1366_v51 = vadd.f32 %v1299_v38, %v1136_v44 }
 0x102   : > { %1697 = vmatmul.msk.bf16.gmra.mxu1 %vm419_vm1, %v1826_v5  ;;  %v962_v5 = vsel %vm273_vm3, %v957_v57, %v961_v58 }
 0x103   : > { %v1400_v53 = vmul.f32 0.2, %v1366_v51  ;;  %v1301_v54 = vpop.f32.mrf.mxu3 }
 0x105   : > { %v1434_v60 = vmax.f32 %v1366_v51, %v1400_v53 }
 0x106   : > { %v1071_v0 = vpop.f32.mrf.mxu2 }
 0x107   : > { %v1468_v1 = vpack.c.bf16 %v1434_v60, %v1434_v60  ;;  %v1137_v2 = vadd.f32 %v1071_v0, %v653_v61  ;;  %v519_v3 = vpop.f32.mrf.mxu0  ;;  %v657_v7 = vpop.f32.mrf.mxu1 }
 0x108   : > { %1807 = vmatmul.msk.bf16.gmra.mxu3 %vm419_vm1, %v1198_v62  ;;  %v656_v11 = vadd.f32 %v655_v48, %v519_v3 }
 0x109   : > { %1503 = vst.msk [vmem:[%s2030_s6 + $0x30] sm:$0xf] %vm1490_vm4, %v1468_v1  ;;  %v1367_v9 = vadd.f32 %v1301_v54, %v1137_v2 }
 0x10a   : > { %1676 = vmatmul.msk.bf16.gmra.mxu0 %vm419_vm1, %v405_v4 }
 0x10b   : > { %v1401_v10 = vmul.f32 0.2, %v1367_v9  ;;  %1784 = vmatmul.msk.bf16.gmra.mxu2 %vm419_vm1, %v962_v5  ;;  %v1304_v12 = vpop.f32.mrf.mxu3 }
 0x10d   : > { %v1435_v15 = vmax.f32 %v1367_v9, %v1401_v10 }
 0x10e   : > { %v1074_v16 = vpop.f32.mrf.mxu2 }
 0x10f   : > { %v1469_v17 = vpack.c.bf16 %v1435_v15, %v1435_v15  ;;  %v1138_v18 = vadd.f32 %v1074_v16, %v656_v11  ;;  %v521_v19 = vpop.f32.mrf.mxu0  ;;  %v660_v22 = vpop.f32.mrf.mxu1 }
 0x110   : > { %v658_v34 = vadd.f32 %v657_v7, %v521_v19 }
 0x111   : > { %1504 = vst.msk [vmem:[%s2030_s6 + $0x34] sm:$0xf] %vm1490_vm4, %v1469_v17  ;;  %v1368_v25 = vadd.f32 %v1304_v12, %v1138_v18 }
 0x112   : > { %1698 = vmatmul.msk.bf16.gmra.mxu1 %vm419_vm1, %v2130_v39  ;;  %v970_v39 = vsel %vm273_vm3, %v965_v31, %v969_v32 }
 0x113   : > { %v1402_v27 = vmul.f32 0.2, %v1368_v25  ;;  %v1306_v28 = vpop.f32.mrf.mxu3 }
 0x115   : > { %v1436_v33 = vmax.f32 %v1368_v25, %v1402_v27 }
 0x116   : > { %v1076_v36 = vpop.f32.mrf.mxu2 }
 0x117   : > { %v1470_v37 = vpack.c.bf16 %v1436_v33, %v1436_v33  ;;  %v1139_v38 = vadd.f32 %v1076_v36, %v658_v34  ;;  %v524_v40 = vpop.f32.mrf.mxu0  ;;  %v662_v42 = vpop.f32.mrf.mxu1 }
 0x118   : > { %1808 = vmatmul.msk.bf16.gmra.mxu3 %vm419_vm1, %v1200_v35  ;;  %v661_v45 = vadd.f32 %v660_v22, %v524_v40 }
 0x119   : > { %1505 = vst.msk [vmem:[%s2030_s6 + $0x38] sm:$0xf] %vm1490_vm4, %v1470_v37  ;;  %v1369_v43 = vadd.f32 %v1306_v28, %v1139_v38 }
 0x11a   : > { %1677 = vmatmul.msk.bf16.gmra.mxu0 %vm419_vm1, %v413_v41 }
 0x11b   : > { %v1403_v44 = vmul.f32 0.2, %v1369_v43  ;;  %1785 = vmatmul.msk.bf16.gmra.mxu2 %vm419_vm1, %v970_v39  ;;  %v1309_v46 = vpop.f32.mrf.mxu3 }
 0x11d   : > { %v1437_v47 = vmax.f32 %v1369_v43, %v1403_v44 }
 0x11e   : > { %v1079_v48 = vpop.f32.mrf.mxu2 }
 0x11f   : > { %v1471_v49 = vpack.c.bf16 %v1437_v47, %v1437_v47  ;;  %v1140_v50 = vadd.f32 %v1079_v48, %v661_v45  ;;  %v526_v51 = vpop.f32.mrf.mxu0  ;;  %v665_v52 = vpop.f32.mrf.mxu1 }
 0x120   : > { %v663_v57 = vadd.f32 %v662_v42, %v526_v51 }
 0x121   : > { %1506 = vst.msk [vmem:[%s2030_s6 + $0x3c] sm:$0xf] %vm1490_vm4, %v1471_v49  ;;  %v1370_v53 = vadd.f32 %v1309_v46, %v1140_v50 }
 0x123   : > { %v1404_v54 = vmul.f32 0.2, %v1370_v53  ;;  %v1311_v55 = vpop.f32.mrf.mxu3 }
 0x125   : > { %v1438_v56 = vmax.f32 %v1370_v53, %v1404_v54 }
 0x126   : > { %v1081_v58 = vpop.f32.mrf.mxu2 }
 0x127   : > { %v1472_v59 = vpack.c.bf16 %v1438_v56, %v1438_v56  ;;  %v1141_v60 = vadd.f32 %v1081_v58, %v663_v57  ;;  %v529_v61 = vpop.f32.mrf.mxu0  ;;  %v667_v62 = vpop.f32.mrf.mxu1 }
 0x128   : > { %v666_v1 = vadd.f32 %v665_v52, %v529_v61 }
 0x129   : > { %1507 = vst.msk [vmem:[%s2030_s6 + $0x40] sm:$0xf] %vm1490_vm4, %v1472_v59  ;;  %v1371_v63 = vadd.f32 %v1311_v55, %v1141_v60 }
 0x12b   : > { %v1405_v0 = vmul.f32 0.2, %v1371_v63  ;;  %v1314_v2 = vpop.f32.mrf.mxu3 }
 0x12d   : > { %v1439_v3 = vmax.f32 %v1371_v63, %v1405_v0 }
 0x12e   : > { %v1084_v4 = vpop.f32.mrf.mxu2 }
 0x12f   : > { %v1473_v6 = vpack.c.bf16 %v1439_v3, %v1439_v3  ;;  %v1142_v5 = vadd.f32 %v1084_v4, %v666_v1  ;;  %v531_v7 = vpop.f32.mrf.mxu0  ;;  %v670_v8 = vpop.f32.mrf.mxu1 }
 0x130   : > { %v668_v13 = vadd.f32 %v667_v62, %v531_v7 }
 0x131   : > { %1508 = vst.msk [vmem:[%s2030_s6 + $0x44] sm:$0xf] %vm1490_vm4, %v1473_v6  ;;  %v1372_v9 = vadd.f32 %v1314_v2, %v1142_v5 }
 0x133   : > { %v1406_v10 = vmul.f32 0.2, %v1372_v9  ;;  %v1316_v11 = vpop.f32.mrf.mxu3 }
 0x135   : > { %v1440_v12 = vmax.f32 %v1372_v9, %v1406_v10 }
 0x136   : > { %v1086_v14 = vpop.f32.mrf.mxu2 }
 0x137   : > { %v1474_v15 = vpack.c.bf16 %v1440_v12, %v1440_v12  ;;  %v1143_v16 = vadd.f32 %v1086_v14, %v668_v13  ;;  %v534_v17 = vpop.f32.mrf.mxu0  ;;  %v672_v18 = vpop.f32.mrf.mxu1 }
 0x138   : > { %v671_v21 = vadd.f32 %v670_v8, %v534_v17 }
 0x139   : > { %1509 = vst.msk [vmem:[%s2030_s6 + $0x48] sm:$0xf] %vm1490_vm4, %v1474_v15  ;;  %v1373_v19 = vadd.f32 %v1316_v11, %v1143_v16 }
 0x13b   : > { %v1407_v20 = vmul.f32 0.2, %v1373_v19  ;;  %v1319_v22 = vpop.f32.mrf.mxu3 }
 0x13d   : > { %v1441_v23 = vmax.f32 %v1373_v19, %v1407_v20 }
 0x13e   : > { %v1089_v24 = vpop.f32.mrf.mxu2 }
 0x13f   : > { %v1475_v25 = vpack.c.bf16 %v1441_v23, %v1441_v23  ;;  %v1144_v26 = vadd.f32 %v1089_v24, %v671_v21  ;;  %v536_v27 = vpop.f32.mrf.mxu0  ;;  %v675_v28 = vpop.f32.mrf.mxu1 }
 0x140   : > { %v673_v33 = vadd.f32 %v672_v18, %v536_v27 }
 0x141   : > { %1510 = vst.msk [vmem:[%s2030_s6 + $0x4c] sm:$0xf] %vm1490_vm4, %v1475_v25  ;;  %v1374_v29 = vadd.f32 %v1319_v22, %v1144_v26 }
 0x143   : > { %v1408_v30 = vmul.f32 0.2, %v1374_v29  ;;  %v1321_v31 = vpop.f32.mrf.mxu3 }
 0x145   : > { %v1442_v32 = vmax.f32 %v1374_v29, %v1408_v30 }
 0x146   : > { %v1091_v34 = vpop.f32.mrf.mxu2 }
 0x147   : > { %v1476_v35 = vpack.c.bf16 %v1442_v32, %v1442_v32  ;;  %v1145_v36 = vadd.f32 %v1091_v34, %v673_v33  ;;  %v539_v37 = vpop.f32.mrf.mxu0  ;;  %v677_v38 = vpop.f32.mrf.mxu1 }
 0x148   : > { %v676_v39 = vadd.f32 %v675_v28, %v539_v37 }
 0x149   : > { %1511 = vst.msk [vmem:[%s2030_s6 + $0x50] sm:$0xf] %vm1490_vm4, %v1476_v35  ;;  %v1375_v40 = vadd.f32 %v1321_v31, %v1145_v36 }
 0x14b   : > { %v1409_v41 = vmul.f32 0.2, %v1375_v40  ;;  %v1324_v42 = vpop.f32.mrf.mxu3 }
 0x14d   : > { %v1443_v43 = vmax.f32 %v1375_v40, %v1409_v41 }
 0x14e   : > { %v1094_v44 = vpop.f32.mrf.mxu2 }
 0x14f   : > { %v1477_v45 = vpack.c.bf16 %v1443_v43, %v1443_v43  ;;  %v1146_v46 = vadd.f32 %v1094_v44, %v676_v39  ;;  %v541_v47 = vpop.f32.mrf.mxu0  ;;  %v680_v48 = vpop.f32.mrf.mxu1 }
 0x150   : > { %v678_v53 = vadd.f32 %v677_v38, %v541_v47 }
 0x151   : > { %1512 = vst.msk [vmem:[%s2030_s6 + $0x54] sm:$0xf] %vm1490_vm4, %v1477_v45  ;;  %v1376_v49 = vadd.f32 %v1324_v42, %v1146_v46 }
 0x153   : > { %v1410_v50 = vmul.f32 0.2, %v1376_v49  ;;  %v1326_v51 = vpop.f32.mrf.mxu3 }
 0x155   : > { %v1444_v52 = vmax.f32 %v1376_v49, %v1410_v50 }
 0x156   : > { %v1096_v54 = vpop.f32.mrf.mxu2 }
 0x157   : > { %v1478_v55 = vpack.c.bf16 %v1444_v52, %v1444_v52  ;;  %v1147_v56 = vadd.f32 %v1096_v54, %v678_v53  ;;  %v544_v57 = vpop.f32.mrf.mxu0  ;;  %v682_v58 = vpop.f32.mrf.mxu1 }
 0x158   : > { %v681_v61 = vadd.f32 %v680_v48, %v544_v57 }
 0x159   : > { %1513 = vst.msk [vmem:[%s2030_s6 + $0x58] sm:$0xf] %vm1490_vm4, %v1478_v55  ;;  %v1377_v59 = vadd.f32 %v1326_v51, %v1147_v56 }
 0x15b   : > { %v1411_v60 = vmul.f32 0.2, %v1377_v59  ;;  %v1329_v62 = vpop.f32.mrf.mxu3 }
 0x15d   : > { %v1445_v63 = vmax.f32 %v1377_v59, %v1411_v60 }
 0x15e   : > { %v1099_v0 = vpop.f32.mrf.mxu2 }
 0x15f   : > { %v1479_v1 = vpack.c.bf16 %v1445_v63, %v1445_v63  ;;  %v1148_v2 = vadd.f32 %v1099_v0, %v681_v61  ;;  %v546_v3 = vpop.f32.mrf.mxu0  ;;  %v685_v4 = vpop.f32.mrf.mxu1 }
 0x160   : > { %v683_v9 = vadd.f32 %v682_v58, %v546_v3 }
 0x161   : > { %1514 = vst.msk [vmem:[%s2030_s6 + $0x5c] sm:$0xf] %vm1490_vm4, %v1479_v1  ;;  %v1378_v6 = vadd.f32 %v1329_v62, %v1148_v2 }
 0x163   : > { %v1412_v5 = vmul.f32 0.2, %v1378_v6  ;;  %v1331_v7 = vpop.f32.mrf.mxu3 }
 0x165   : > { %v1446_v8 = vmax.f32 %v1378_v6, %v1412_v5 }
 0x166   : > { %v1101_v10 = vpop.f32.mrf.mxu2 }
 0x167   : > { %v1480_v11 = vpack.c.bf16 %v1446_v8, %v1446_v8  ;;  %v1149_v12 = vadd.f32 %v1101_v10, %v683_v9  ;;  %v549_v13 = vpop.f32.mrf.mxu0  ;;  %v687_v14 = vpop.f32.mrf.mxu1 }
 0x168   : > { %v686_v17 = vadd.f32 %v685_v4, %v549_v13 }
 0x169   : > { %1515 = vst.msk [vmem:[%s2030_s6 + $0x60] sm:$0xf] %vm1490_vm4, %v1480_v11  ;;  %v1379_v15 = vadd.f32 %v1331_v7, %v1149_v12 }
 0x16b   : > { %v1413_v16 = vmul.f32 0.2, %v1379_v15  ;;  %v1334_v18 = vpop.f32.mrf.mxu3 }
 0x16d   : > { %v1447_v19 = vmax.f32 %v1379_v15, %v1413_v16 }
 0x16e   : > { %v1104_v20 = vpop.f32.mrf.mxu2 }
 0x16f   : > { %v1481_v21 = vpack.c.bf16 %v1447_v19, %v1447_v19  ;;  %v1150_v22 = vadd.f32 %v1104_v20, %v686_v17  ;;  %v551_v23 = vpop.f32.mrf.mxu0  ;;  %v690_v25 = vpop.f32.mrf.mxu1 }
 0x170   : > { %v688_v29 = vadd.f32 %v687_v14, %v551_v23 }
 0x171   : > { %1516 = vst.msk [vmem:[%s2030_s6 + $0x64] sm:$0xf] %vm1490_vm4, %v1481_v21  ;;  %v1380_v24 = vadd.f32 %v1334_v18, %v1150_v22 }
 0x173   : > { %v1414_v26 = vmul.f32 0.2, %v1380_v24  ;;  %v1336_v27 = vpop.f32.mrf.mxu3 }
 0x175   : > { %v1448_v28 = vmax.f32 %v1380_v24, %v1414_v26 }
 0x176   : > { %v1106_v30 = vpop.f32.mrf.mxu2 }
 0x177   : > { %v1482_v31 = vpack.c.bf16 %v1448_v28, %v1448_v28  ;;  %v1151_v32 = vadd.f32 %v1106_v30, %v688_v29  ;;  %v554_v33 = vpop.f32.mrf.mxu0  ;;  %v692_v38 = vpop.f32.mrf.mxu1 }
 0x178   : > { %v691_v36 = vadd.f32 %v690_v25, %v554_v33 }
 0x179   : > { %1517 = vst.msk [vmem:[%s2030_s6 + $0x68] sm:$0xf] %vm1490_vm4, %v1482_v31  ;;  %v1381_v34 = vadd.f32 %v1336_v27, %v1151_v32 }
 0x17b   : > { %v1415_v35 = vmul.f32 0.2, %v1381_v34  ;;  %v1339_v37 = vpop.f32.mrf.mxu3 }
 0x17d   : > { %v1449_v40 = vmax.f32 %v1381_v34, %v1415_v35 }
 0x17e   : > { %v1109_v41 = vpop.f32.mrf.mxu2 }
 0x17f   : > { %v1483_v39 = vpack.c.bf16 %v1449_v40, %v1449_v40  ;;  %v1152_v42 = vadd.f32 %v1109_v41, %v691_v36  ;;  %v556_v43 = vpop.f32.mrf.mxu0  ;;  %v695_v49 = vpop.f32.mrf.mxu1 }
 0x180   : > { %v693_v48 = vadd.f32 %v692_v38, %v556_v43 }
 0x181   : > { %1518 = vst.msk [vmem:[%s2030_s6 + $0x6c] sm:$0xf] %vm1490_vm4, %v1483_v39  ;;  %v1382_v44 = vadd.f32 %v1339_v37, %v1152_v42 }
 0x183   : > { %v1416_v45 = vmul.f32 0.2, %v1382_v44  ;;  %v1341_v46 = vpop.f32.mrf.mxu3 }
 0x185   : > { %v1450_v47 = vmax.f32 %v1382_v44, %v1416_v45 }
 0x186   : > { %v1111_v50 = vpop.f32.mrf.mxu2 }
 0x187   : > { %v1484_v51 = vpack.c.bf16 %v1450_v47, %v1450_v47  ;;  %v1153_v52 = vadd.f32 %v1111_v50, %v693_v48  ;;  %v559_v53 = vpop.f32.mrf.mxu0  ;;  %v697_v63 = vpop.f32.mrf.mxu1 }
 0x188   : > { %v696_v56 = vadd.f32 %v695_v49, %v559_v53 }
 0x189   : > { %1519 = vst.msk [vmem:[%s2030_s6 + $0x70] sm:$0xf] %vm1490_vm4, %v1484_v51  ;;  %v1383_v54 = vadd.f32 %v1341_v46, %v1153_v52 }
 0x18b   : > { %v1417_v55 = vmul.f32 0.2, %v1383_v54  ;;  %v1344_v57 = vpop.f32.mrf.mxu3 }
 0x18d   : > { %v1451_v58 = vmax.f32 %v1383_v54, %v1417_v55 }
 0x18e   : > { %v1114_v59 = vpop.f32.mrf.mxu2 }
 0x18f   : > { %v1485_v60 = vpack.c.bf16 %v1451_v58, %v1451_v58  ;;  %v1154_v61 = vadd.f32 %v1114_v59, %v696_v56  ;;  %v561_v62 = vpop.f32.mrf.mxu0  ;;  %v700_v10 = vpop.f32.mrf.mxu1 }
 0x190   : > { %v698_v4 = vadd.f32 %v697_v63, %v561_v62 }
 0x191   : > { %1520 = vst.msk [vmem:[%s2030_s6 + $0x74] sm:$0xf] %vm1490_vm4, %v1485_v60  ;;  %v1384_v0 = vadd.f32 %v1344_v57, %v1154_v61 }
 0x193   : > { %v1418_v1 = vmul.f32 0.2, %v1384_v0  ;;  %v1346_v2 = vpop.f32.mrf.mxu3 }
 0x195   : > { %v1452_v3 = vmax.f32 %v1384_v0, %v1418_v1 }
 0x196   : > { %v1116_v6 = vpop.f32.mrf.mxu2 }
 0x197   : > { %v1486_v5 = vpack.c.bf16 %v1452_v3, %v1452_v3  ;;  %v1155_v7 = vadd.f32 %v1116_v6, %v698_v4  ;;  %v564_v8 = vpop.f32.mrf.mxu0  ;;  %v702_v21 = vpop.f32.mrf.mxu1 }
 0x198   : > { %v701_v12 = vadd.f32 %v700_v10, %v564_v8 }
 0x199   : > { %1521 = vst.msk [vmem:[%s2030_s6 + $0x78] sm:$0xf] %vm1490_vm4, %v1486_v5  ;;  %v1385_v9 = vadd.f32 %v1346_v2, %v1155_v7 }
 0x19b   : > { %v1419_v11 = vmul.f32 0.2, %v1385_v9  ;;  %v1349_v14 = vpop.f32.mrf.mxu3 }
 0x19d   : > { %v1453_v13 = vmax.f32 %v1385_v9, %v1419_v11 }
 0x19e   : > { %v1119_v15 = vpop.f32.mrf.mxu2 }
 0x19f   : > { %v1487_v16 = vpack.c.bf16 %v1453_v13, %v1453_v13  ;;  %v1156_v17 = vadd.f32 %v1119_v15, %v701_v12  ;;  %v566_v19 = vpop.f32.mrf.mxu0 }
 0x1a0   : > { %v703_v23 = vadd.f32 %v702_v21, %v566_v19 }
 0x1a1   : > { %1522 = vst.msk [vmem:[%s2030_s6 + $0x7c] sm:$0xf] %vm1490_vm4, %v1487_v16  ;;  %v1386_v18 = vadd.f32 %v1349_v14, %v1156_v17 }
 0x1a3   : > { %v1420_v20 = vmul.f32 0.2, %v1386_v18  ;;  %v1351_v27 = vpop.f32.mrf.mxu3 }
 0x1a5   : > { %v1454_v22 = vmax.f32 %v1386_v18, %v1420_v20 }
 0x1a6   : > { %v1121_v24 = vpop.f32.mrf.mxu2 }
 0x1a7   : > { %v1488_v25 = vpack.c.bf16 %v1454_v22, %v1454_v22  ;;  %v1157_v26 = vadd.f32 %v1121_v24, %v703_v23 }
 0x1a9   : > { %1523 = vst.msk [vmem:[%s2030_s6 + $0x80] sm:$0xf] %vm1490_vm4, %v1488_v25  ;;  %v1387_v28 = vadd.f32 %v1351_v27, %v1157_v26 }
 0x1ab   : > { %v1421_v29 = vmul.f32 0.2, %v1387_v28 }
 0x1ad   : > { %v1455_v30 = vmax.f32 %v1387_v28, %v1421_v29 }
 0x1af   : > { %v1489_v31 = vpack.c.bf16 %v1455_v30, %v1455_v30 }
 0x1b1   : > { %1524 = vst.msk [vmem:[%s2030_s6 + $0x84] sm:$0xf] %vm1490_vm4, %v1489_v31 }
 0x1b2 PF: > { %s12_s9 = sadd.s32 1, %s1872_s9  }
 0x1b3   : > { %p9_p4 = scmp.ge.s32.totalorder %s12_s9, 4  }
 0x1b5   :  { %11 = sbr.rel (!%p9_p4) target bundleno = 1 (0x1), region = 61 }

// kernel: discriminator_forward.7
= control target key start
LH: loop header
LB: loop body
LE: loop exit
PB: predicated region body
PF: predicated region fallthrough
CT: control target
= control target key end

     0   :  { %s374_s12 = smov 0   ;;  %s413_s0 = inlined_call_operand.vmem [shape: bf16[2,72,16], index: 0, kind: input, shape index: {}]   ;;  %s414_s1 = inlined_call_operand.vmem [shape: f32[1,16], index: 1, kind: input, shape index: {}]   ;;  %s415_s2 = inlined_call_operand.vmem [shape: f32[1,16], index: 2, kind: input, shape index: {}]   ;;  %s416_s3 = inlined_call_operand.vmem [shape: bf16[2,72,16], index: 3, kind: output, shape index: {}]  }
   0x1 LB: > { %s307_s13 = sadd.s32 4294967295, %s352_s12   ;;  %p311_p0 = scmp.ge.s32.totalorder %s352_s12, 1  ;;  %s352_s12 = sphi %s374_s12, %s13_s12  }
   0x2   : > { %p137_p1 = scmp.lt.s32.totalorder %s352_s12, 3 }
   0x4   : > { %p138_p2 = pnand %p311_p0, %p137_p1 }
   0x5   : > { %p161_p3 = scmp.lt.s32.totalorder (!%p138_p2), %s307_s13, 1 }
   0x6   : > { %141 = sbr.rel (%p138_p2) target bundleno = 38 (0x26), region = 32 }
   0xb   : > { %s418_s13 = smov (!%p161_p3, %s307_s13), 1  ;;  %v344_v0 = vld [vmem:[%s414_s1] ss:$0 sm:$0xff]  ;;  %vm242_vm0 = vcmask 125952  }
   0xc   : > { %s335_s14 = smul.u32 36, %s418_s13  ;;  %v345_v5 = vld [vmem:[%s415_s2] ss:$0 sm:$0xff] }
   0xe   : > { %s165_s17 = scalar_lea.vmem %s413_s0, %s335_s14  ;;  %s170_s24 = scalar_lea.vmem %s416_s3, %s335_s14 }
   0xf   : > { %v317_v1 = vld [vmem:[%s165_s17] sm:$0xff]   ;;  %v332_v2 = vld [vmem:[%s165_s17 + $0x8] sm:$0xff]   ;;  %v333_v3 = vld [vmem:[%s165_s17 + $0x10] sm:$0xff]  }
  0x10   : > { %v318_v4 = vunpack.c.l.bf16 %v317_v1  ;;  %v319_v6 = vunpack.c.h.bf16 %v317_v1  ;;  %v322_v7 = vunpack.c.l.bf16 %v332_v2  ;;  %v323_v8 = vunpack.c.h.bf16 %v332_v2  ;;  %v334_v9 = vld [vmem:[%s165_s17 + $0x18] sm:$0xff]   ;;  %v179_v26 = vld [vmem:[%s165_s17 + $0x20] sm:$0xf] }
  0x11   : > { %v326_v10 = vunpack.c.l.bf16 %v333_v3  ;;  %v327_v11 = vunpack.c.h.bf16 %v333_v3  ;;  %v330_v12 = vunpack.c.l.bf16 %v334_v9  ;;  %v331_v13 = vunpack.c.h.bf16 %v334_v9 }
  0x12   : > { %v193_v14 = vmul.f32 %v344_v0, %v318_v4  ;;  %v194_v15 = vmul.f32 %v344_v0, %v319_v6  ;;  %v195_v16 = vmul.f32 %v344_v0, %v322_v7  ;;  %v196_v17 = vmul.f32 %v344_v0, %v323_v8 }
  0x13   : > { %v197_v18 = vmul.f32 %v344_v0, %v326_v10  ;;  %v198_v19 = vmul.f32 %v344_v0, %v327_v11  ;;  %v199_v20 = vmul.f32 %v344_v0, %v330_v12  ;;  %v200_v21 = vmul.f32 %v344_v0, %v331_v13 }
  0x14   : > { %v206_v22 = vadd.f32 %v345_v5, %v193_v14  ;;  %v207_v23 = vadd.f32 %v345_v5, %v194_v15  ;;  %v208_v24 = vadd.f32 %v345_v5, %v195_v16  ;;  %v209_v25 = vadd.f32 %v345_v5, %v196_v17 }
  0x15   : > { %v210_v27 = vadd.f32 %v345_v5, %v197_v18  ;;  %v211_v28 = vadd.f32 %v345_v5, %v198_v19  ;;  %v212_v29 = vadd.f32 %v345_v5, %v199_v20  ;;  %v213_v30 = vadd.f32 %v345_v5, %v200_v21 }
  0x16   : > { %v215_v31 = vmul.f32 0.2, %v206_v22  ;;  %v216_v32 = vmul.f32 0.2, %v207_v23  ;;  %v217_v33 = vmul.f32 0.2, %v208_v24  ;;  %v188_v37 = vunpack.c.l.bf16 %v179_v26 }
  0x17   : > { %v218_v34 = vmul.f32 0.2, %v209_v25  ;;  %v219_v35 = vmul.f32 0.2, %v210_v27  ;;  %v220_v36 = vmul.f32 0.2, %v211_v28 }
  0x18   : > { %v224_v38 = vmax.f32 %v206_v22, %v215_v31  ;;  %v225_v39 = vmax.f32 %v207_v23, %v216_v32  ;;  %v226_v40 = vmax.f32 %v208_v24, %v217_v33  ;;  %v221_v41 = vmul.f32 0.2, %v212_v29 }
  0x19   : > { %v227_v42 = vmax.f32 %v209_v25, %v218_v34  ;;  %v228_v43 = vmax.f32 %v210_v27, %v219_v35  ;;  %v229_v44 = vmax.f32 %v211_v28, %v220_v36  ;;  %v222_v45 = vmul.f32 0.2, %v213_v30 }
  0x1a   : > { %v233_v46 = vpack.c.bf16 %v224_v38, %v224_v38  ;;  %v234_v47 = vpack.c.bf16 %v225_v39, %v225_v39  ;;  %v235_v48 = vpack.c.bf16 %v226_v40, %v226_v40  ;;  %v230_v49 = vmax.f32 %v212_v29, %v221_v41 }
  0x1b   : > { %v236_v50 = vpack.c.bf16 %v227_v42, %v227_v42  ;;  %v231_v51 = vmax.f32 %v213_v30, %v222_v45  ;;  %v237_v52 = vpack.c.bf16 %v228_v43, %v228_v43  ;;  %v201_v53 = vmul.f32 %v344_v0, %v188_v37 }
  0x1c   : > { %243 = vst.msk [vmem:[%s170_s24] sm:$0xf] %vm242_vm0, %v233_v46  ;;  %v238_v54 = vpack.c.bf16 %v229_v44, %v229_v44  ;;  %v239_v55 = vpack.c.bf16 %v230_v49, %v230_v49 }
  0x1d   : > { %244 = vst.msk [vmem:[%s170_s24 + $0x4] sm:$0xf] %vm242_vm0, %v234_v47  ;;  %v214_v56 = vadd.f32 %v345_v5, %v201_v53  ;;  %v240_v57 = vpack.c.bf16 %v231_v51, %v231_v51 }
  0x1e   : > { %245 = vst.msk [vmem:[%s170_s24 + $0x8] sm:$0xf] %vm242_vm0, %v235_v48 }
  0x1f   : > { %246 = vst.msk [vmem:[%s170_s24 + $0xc] sm:$0xf] %vm242_vm0, %v236_v50  ;;  %v223_v58 = vmul.f32 0.2, %v214_v56 }
  0x20   : > { %247 = vst.msk [vmem:[%s170_s24 + $0x10] sm:$0xf] %vm242_vm0, %v237_v52 }
  0x21   : > { %248 = vst.msk [vmem:[%s170_s24 + $0x14] sm:$0xf] %vm242_vm0, %v238_v54  ;;  %v232_v59 = vmax.f32 %v214_v56, %v223_v58 }
  0x22   : > { %249 = vst.msk [vmem:[%s170_s24 + $0x18] sm:$0xf] %vm242_vm0, %v239_v55 }
  0x23   : > { %250 = vst.msk [vmem:[%s170_s24 + $0x1c] sm:$0xf] %vm242_vm0, %v240_v57  ;;  %v241_v60 = vpack.c.bf16 %v232_v59, %v232_v59 }
  0x25   : > { %251 = vst.msk [vmem:[%s170_s24 + $0x20] sm:$0xf] %vm242_vm0, %v241_v60 }
  0x26 PF: > { %s13_s12 = sadd.s32 1, %s352_s12  }
  0x27   : > { %p10_p4 = scmp.ge.s32.totalorder %s13_s12, 4  }
  0x29   :  { %12 = sbr.rel (!%p10_p4) target bundleno = 1 (0x1), region = 62 }

// kernel: discriminator_forward.6
= control target key start
LH: loop header
LB: loop body
LE: loop exit
PB: predicated region body
PF: predicated region fallthrough
CT: control target
= control target key end

     0   :  { %s1369_s15 = smov 0   ;;  %s1826_s0 = inlined_call_operand.vmem [shape: bf16[2,96,32], index: 0, kind: input, shape index: {}]   ;;  %s1827_s1 = inlined_call_operand.vmem [shape: bf16[4,32,16], index: 1, kind: input, shape index: {}]   ;;  %s1828_s2 = inlined_call_operand.vmem [shape: bf16[2,72,16], index: 2, kind: output, shape index: {0}]   ;;  %s1829_s3 = inlined_call_operand.vmem [shape: f32[2,1,16], index: 3, kind: output, shape index: {1}]   ;;  %s1830_s4 = inlined_call_operand.vmem [shape: f32[2,1,16], index: 4, kind: output, shape index: {2}]  }
   0x1 LB: > { %s1189_s16 = sadd.s32 4294967295, %s1340_s15   ;;  %p1193_p0 = scmp.ge.s32.totalorder %s1340_s15, 1  ;;  %s1340_s15 = sphi %s1369_s15, %s15_s15  }
   0x2   : > { %p167_p1 = scmp.lt.s32.totalorder %s1340_s15, 3 }
   0x4   : > { %p168_p2 = pnand %p1193_p0, %p167_p1 }
   0x5   : > { %p199_p3 = scmp.lt.s32.totalorder (!%p168_p2), %s1189_s16, 1 }
   0x6   : > { %171 = sbr.rel (%p168_p2) target bundleno = 244 (0xf4), region = 28 }
   0xb   : > { %v1308_v0 = vld [vmem:[%s1827_s1 + $0x8] sm:$0xff]  ;;  %v1318_v1 = vld [vmem:[%s1827_s1 + $0x38] sm:$0xff]  ;;  %v1307_v4 = vld [vmem:[%s1827_s1] sm:$0xff]  ;;  %s1862_s16 = smov (!%p199_p3, %s1189_s16), 1  ;;  %vm312_vm0 = vcmask 261120   ;;  %vm575_vm1 = vcmask 1046528  }
   0xc   : > { %v1310_v2 = vld [vmem:[%s1827_s1 + $0x18] sm:$0xff]  ;;  %v1316_v3 = vld [vmem:[%s1827_s1 + $0x28] sm:$0xff]  ;;  %391 = vmatpush.bf16.msra.mxu1 %v1308_v0  ;;  %618 = vmatpush.bf16.msra.mxu3 %v1318_v1  ;;  %v1317_v5 = vld [vmem:[%s1827_s1 + $0x30] sm:$0xff]  ;;  %s1319_s7 = smul.u32 48, %s1862_s16  ;;  %vm260_vm2 = vsmask.f32 7424  ;;  %s211_s19 = scalar_lea.vmem %s1829_s3, %s1862_s16 }
   0xd   : > { %334 = vmatpush.bf16.msra.mxu0 %v1310_v2  ;;  %530 = vmatpush.bf16.msra.mxu2 %v1316_v3  ;;  %v1309_v6 = vld [vmem:[%s1827_s1 + $0x10] sm:$0xff]  ;;  %v1315_v7 = vld [vmem:[%s1827_s1 + $0x20] sm:$0xff]  ;;  %s1320_s11 = smul.u32 36, %s1862_s16  ;;  %vm663_vm10 = vcmask 125952   ;;  %s214_s22 = scalar_lea.vmem %s1830_s4, %s1862_s16 }
   0xe   : > { %s1407_s10 = scalar_lea.vmem %s1826_s0, %s1319_s7 }
   0xf   : > { %v1303_v8 = vld [vmem:[%s1407_s10] sm:$0xff]  ;;  %v1331_v10 = vld [vmem:[%s1407_s10 + $0x4] sm:$0xf0]  ;;  %v1311_v11 = vld [vmem:[%s1407_s10 + $0xc] sm:$0xff]  ;;  %s1551_s14 = scalar_lea.vmem %s1828_s2, %s1320_s11 }
  0x10   : > { %392 = vmatpush.bf16.msra.mxu1 %v1307_v4  ;;  %619 = vmatpush.bf16.msra.mxu3 %v1317_v5  ;;  %v419_v9 = vld [vmem:[%s1407_s10 + $0x4] sm:$0xff]   ;;  %v264_v14 = vshll.u32 %v1303_v8, 16  ;;  %v262_v15 = vshrl.u32 %v1303_v8, 16  ;;  %v466_v17 = vshll.u32 %v1311_v11, 16  ;;  %v577_v19 = vrot.slane %v1311_v11, 1  ;;  %v1305_v31 = vld [vmem:[%s1407_s10 + $0x10] sm:$0xff] }
  0x11   : > { %335 = vmatpush.bf16.msra.mxu0 %v1309_v6  ;;  %531 = vmatpush.bf16.msra.mxu2 %v1315_v7  ;;  %v1332_v12 = vld [vmem:[%s1407_s10 + $0x4] sm:$0xe]  ;;  %v1304_v13 = vld [vmem:[%s1407_s10 + $0x8] sm:$0xff]  ;;  %v459_v22 = vshrl.u32 %v419_v9, 16  ;;  %v461_v23 = vshll.u32 %v419_v9, 16  ;;  %v1312_v33 = vld [vmem:[%s1407_s10 + $0x14] sm:$0xff] }
  0x12   : > { %v269_v16 = vshll.u32 %v1304_v13, 16  ;;  %v1333_v18 = vor.u32 %v1332_v12, %v1331_v10  ;;  %v266_v20 = vrot.slane %v264_v14, 1  ;;  %v468_v27 = vrot.slane %v466_v17, 1  ;;  %v1306_v46 = vld [vmem:[%s1407_s10 + $0x18] sm:$0xff]  ;;  %v224_v55 = vld [vmem:[%s1407_s10 + $0x20] sm:$0xf] }
  0x13   : > { %1237 = vmatmul.msk.bf16.vlgmr.msra.gmra.mxu1 %vm312_vm0, %v1303_v8  ;;  %v463_v26 = vrot.slane %v461_v23, 1  ;;  %v273_v34 = vshrl.u32 %v1304_v13, 16  ;;  %v277_v35 = vshll.u32 %v1305_v31, 16  ;;  %v470_v36 = vshrl.u32 %v1311_v11, 16  ;;  %v1313_v47 = vld [vmem:[%s1407_s10 + $0x1c] sm:$0xff] }
  0x14   : > { %v271_v21 = vrot.slane %v269_v16, 1  ;;  %v576_v24 = vrot.slane %v1333_v18, 1  ;;  %v267_v25 = vor.u32 %v266_v20, %v262_v15  ;;  %v474_v37 = vshll.u32 %v1312_v33, 16  ;;  %v229_v56 = vld [vmem:[%s1407_s10 + $0x24] sm:$0x1] }
  0x15   : > { %v464_v30 = vor.u32 %v463_v26, %v459_v22  ;;  %v579_v38 = vrot.slane %v1312_v33, 1  ;;  %v279_v40 = vrot.slane %v277_v35, 1  ;;  %v472_v41 = vor.u32 %v470_v36, %v468_v27  ;;  %v1260_v1 = vld [vmem:[%s1407_s10 + $0x24] sm:$0xf]  ;;  %v1314_v2 = vld [vmem:[%s1407_s10 + $0x24] sm:$0x10] }
  0x16   : > { %v578_v28 = vsel %vm575_vm1, %v576_v24, %v577_v19  ;;  %v272_v29 = vsel %vm260_vm2, %v267_v25, %v271_v21  ;;  %v275_v39 = vor.u32 %v273_v34, %v271_v21  ;;  %v476_v42 = vrot.slane %v474_v37, 1 }
  0x17   : > { %1287 = vmatmul.msk.bf16.vlgmr.msra.gmra.mxu3 %vm312_vm0, %v578_v28  ;;  %1224 = vmatmul.msk.bf16.vlgmr.msra.gmra.mxu0 %vm312_vm0, %v272_v29  ;;  %v469_v32 = vsel %vm260_vm2, %v464_v30, %v468_v27  ;;  %v580_v43 = vsel %vm575_vm1, %v577_v19, %v579_v38  ;;  %v281_v48 = vshrl.u32 %v1305_v31, 16  ;;  %v285_v49 = vshll.u32 %v1306_v46, 16 }
  0x18   : > { %1270 = vmatmul.msk.bf16.vlgmr.msra.gmra.mxu2 %vm312_vm0, %v469_v32  ;;  %v280_v44 = vsel %vm260_vm2, %v275_v39, %v279_v40  ;;  %v477_v45 = vsel %vm260_vm2, %v472_v41, %v476_v42  ;;  %v478_v50 = vshrl.u32 %v1312_v33, 16  ;;  %v482_v51 = vshll.u32 %v1313_v47, 16 }
  0x19   : > { %v581_v52 = vrot.slane %v1313_v47, 1  ;;  %v283_v53 = vor.u32 %v281_v48, %v279_v40  ;;  %v287_v54 = vrot.slane %v285_v49, 1  ;;  %v253_v61 = vunpack.c.l.b16 %v224_v55 }
  0x1a   : > { %v480_v57 = vor.u32 %v478_v50, %v476_v42  ;;  %v484_v58 = vrot.slane %v482_v51, 1  ;;  %v254_v62 = vunpack.c.l.b16 %v229_v56  ;;  %v1261_v3 = vor.u32 %v1314_v2, %v1260_v1 }
  0x1b   : > { %v582_v59 = vsel %vm575_vm1, %v579_v38, %v581_v52  ;;  %v288_v60 = vsel %vm260_vm2, %v283_v53, %v287_v54  ;;  %v289_v4 = vshrl.u32 %v1306_v46, 16  ;;  %v486_v6 = vshrl.u32 %v1313_v47, 16 }
  0x1c   : > { %v485_v63 = vsel %vm260_vm2, %v480_v57, %v484_v58  ;;  %v259_v0 = vpack.c.b16 %v254_v62, %v253_v61  ;;  %v490_v7 = vshll.u32 %v1261_v3, 16  ;;  %v583_v8 = vrot.slane %v1261_v3, 1 }
  0x1d   : > { %v291_v9 = vor.u32 %v289_v4, %v287_v54  ;;  %v488_v11 = vor.u32 %v486_v6, %v484_v58  ;;  %v361_v16 = vpack.c.b16 %v253_v61, %v253_v61  ;;  %v494_v18 = vshrl.u32 %v1261_v3, 16 }
  0x1e   : > { %v293_v5 = vshll.u32 %v259_v0, 16  ;;  %v492_v12 = vrot.slane %v490_v7, 1  ;;  %v297_v17 = vshrl.u32 %v259_v0, 16  ;;  %v673_v21 = vlaneseq }
  0x1f   : > { %v1342_v36 = vmov 0  }
  0x20   : > { %v295_v10 = vrot.slane %v293_v5, 1  ;;  %v493_v15 = vsel %vm260_vm2, %v488_v11, %v492_v12  ;;  %v496_v20 = vor.u32 %v494_v18, %v492_v12  ;;  %v1455_v22 = vshrl.u32 %v673_v21, 7 }
  0x22   : > { %v296_v14 = vsel %vm260_vm2, %v291_v9, %v295_v10  ;;  %v299_v19 = vor.u32 %v297_v17, %v295_v10  ;;  %v686_v23 = vand.u32 65535, %v1455_v22  ;;  %v687_v24 = vshrl.u32 %v1455_v22, 16 }
  0x23   : > { %1238 = vmatmul.msk.bf16.gmra.mxu1 %vm312_vm0, %v1304_v13  ;;  %v584_v13 = vsel %vm575_vm1, %v581_v52, %v583_v8  ;;  %v1460_v26 = vadd.s32 8, %v1455_v22  ;;  %v1466_v41 = vadd.s32 16, %v1455_v22  ;;  %v1472_v51 = vadd.s32 24, %v1455_v22 }
  0x24   : > { %v690_v25 = vmul.u32 58254, %v686_v23  ;;  %v689_v27 = vmul.u32 14564, %v686_v23  ;;  %v691_v28 = vmul.u32 14564, %v687_v24  ;;  %v692_v35 = vmul.u32 58254, %v687_v24 }
  0x25   : > { %v715_v30 = vand.u32 65535, %v1460_v26  ;;  %v716_v33 = vshrl.u32 %v1460_v26, 16  ;;  %v745_v52 = vshrl.u32 %v1466_v41, 16  ;;  %v774_v3 = vshrl.u32 %v1472_v51, 16 }
  0x26   : > { %v693_v29 = vshll.u32 %v690_v25, 16  ;;  %v694_v47 = vshrl.u32 %v690_v25, 16  ;;  %v696_v54 = vshrl.u32 %v691_v28, 16  ;;  %v1491_v9 = vadd.s32 40, %v1455_v22 }
  0x27   : > { %1288 = vmatmul.msk.bf16.gmra.mxu3 %vm312_vm0, %v580_v43  ;;  %1225 = vmatmul.msk.bf16.gmra.mxu0 %vm312_vm0, %v280_v44  ;;  %v719_v34 = vmul.u32 58254, %v715_v30  ;;  %v718_v38 = vmul.u32 14564, %v715_v30  ;;  %v720_v39 = vmul.u32 14564, %v716_v33  ;;  %v721_v49 = vmul.u32 58254, %v716_v33 }
  0x28   : > { %1271 = vmatmul.msk.bf16.gmra.mxu2 %vm312_vm0, %v477_v45  ;;  %vm697_vm3 = vc.u32 %v689_v27, %v693_v29  ;;  %v699_v32 = vadd.s32 %v693_v29, %v689_v27  ;;  %v1479_v61 = vmul.u32 14564, %v745_v52  ;;  %v1494_v17 = vmul.u32 14564, %v774_v3 }
  0x29   : > { %v698_v37 = vsel %vm697_vm3, 1, %v1342_v36  ;;  %v722_v40 = vshll.u32 %v719_v34, 16  ;;  %v724_v44 = vshll.u32 %v720_v39, 16  ;;  %v723_v1 = vshrl.u32 %v719_v34, 16 }
  0x2a   : > { %v700_v42 = vadd.s32 %v698_v37, %v692_v35  ;;  %v753_v5 = vshll.u32 %v1479_v61, 16  ;;  %v725_v11 = vshrl.u32 %v720_v39, 16  ;;  %v831_v21 = vand.u32 65535, %v1491_v9 }
  0x2b   : > { %vm726_vm5 = vc.u32 %v718_v38, %v722_v40  ;;  %v728_v45 = vadd.s32 %v722_v40, %v718_v38  ;;  %v1501_v23 = vadd.s32 48, %v1455_v22 }
  0x2c   : > { %v727_v50 = vsel %vm726_vm5, 1, %v1342_v36  ;;  %v1516_v38 = vmul.u32 58254, %v831_v21 }
  0x2d   : > { %vm730_vm6 = vc.u32 %v728_v45, %v724_v44  ;;  %v729_v56 = vadd.s32 %v727_v50, %v721_v49  ;;  %v860_v39 = vand.u32 65535, %v1501_v23  ;;  %v832_v45 = vshrl.u32 %v1491_v9, 16 }
  0x2e   : > { %v731_v58 = vsel %vm730_vm6, 1, %v1342_v36 }
  0x2f   : > { %v733_v2 = vadd.s32 %v731_v58, %v729_v56  ;;  %v834_v56 = vmul.u32 14564, %v831_v21  ;;  %v1538_v58 = vmul.u32 58254, %v860_v39 }
  0x31   : > { %v734_v12 = vadd.s32 %v733_v2, %v723_v1  ;;  %v1546_v1 = vmul.u32 14564, %v832_v45 }
  0x33   : > { %1239 = vmatmul.msk.bf16.gmra.mxu1 %vm312_vm0, %v1305_v31  ;;  %v695_v31 = vshll.u32 %v691_v28, 16  ;;  %v1503_v24 = vadd.s32 %v734_v12, %v725_v11  ;;  %v782_v28 = vshll.u32 %v1494_v17, 16 }
  0x35   : > { %vm701_vm4 = vc.u32 %v699_v32, %v695_v31 }
  0x36   : > { %v702_v43 = vsel %vm701_vm4, 1, %v1342_v36 }
  0x37   : > { %1289 = vmatmul.msk.bf16.gmra.mxu3 %vm312_vm0, %v582_v59  ;;  %1226 = vmatmul.msk.bf16.gmra.mxu0 %vm312_vm0, %v288_v60  ;;  %v704_v48 = vadd.s32 %v702_v43, %v700_v42  ;;  %v773_v59 = vand.u32 65535, %v1472_v51  ;;  %v736_v42 = vshrl.u32 %v1503_v24, 3 }
  0x38   : > { %1272 = vmatmul.msk.bf16.gmra.mxu2 %vm312_vm0, %v485_v63  ;;  %v1483_v63 = vadd.s32 32, %v1455_v22 }
  0x39   : > { %v705_v55 = vadd.s32 %v704_v48, %v694_v47  ;;  %v1486_v4 = vmul.u32 58254, %v773_v59  ;;  %v779_v48 = vmul.u32 58254, %v774_v3 }
  0x3a   : > { %v802_v7 = vand.u32 65535, %v1483_v63  ;;  %v803_v30 = vshrl.u32 %v1483_v63, 16 }
  0x3b   : > { %v706_v0 = vadd.s32 %v705_v55, %v696_v54  ;;  %v780_v18 = vshll.u32 %v1486_v4, 16  ;;  %v861_v55 = vshrl.u32 %v1501_v23, 16  ;;  %v781_v21 = vshrl.u32 %v1486_v4, 16 }
  0x3c   : > { %v805_v34 = vmul.u32 14564, %v802_v7  ;;  %v1526_v50 = vmul.u32 14564, %v803_v30  ;;  %v808_v3 = vmul.u32 58254, %v803_v30  ;;  %v783_v30 = vshrl.u32 %v1494_v17, 16 }
  0x3d   : > { %v1562_v11 = vmul.u32 14564, %v861_v55 }
  0x43   : > { %1240 = vmatmul.msk.bf16.gmra.mxu1 %vm312_vm0, %v1306_v46  ;;  %v744_v46 = vand.u32 65535, %v1466_v41 }
  0x45   : > { %v1475_v53 = vmul.u32 58254, %v744_v46  ;;  %v747_v60 = vmul.u32 14564, %v744_v46 }
  0x47   : > { %1290 = vmatmul.msk.bf16.gmra.mxu3 %vm312_vm0, %v584_v13  ;;  %1227 = vmatmul.msk.bf16.gmra.mxu0 %vm312_vm0, %v296_v14  ;;  %v751_v62 = vshll.u32 %v1475_v53, 16  ;;  %v750_v13 = vmul.u32 58254, %v745_v52  ;;  %v752_v43 = vshrl.u32 %v1475_v53, 16 }
  0x48   : > { %1273 = vmatmul.msk.bf16.gmra.mxu2 %vm312_vm0, %v493_v15 }
  0x49   : > { %vm755_vm7 = vc.u32 %v747_v60, %v751_v62  ;;  %v757_v6 = vadd.s32 %v751_v62, %v747_v60  ;;  %v754_v62 = vshrl.u32 %v1479_v61, 16 }
  0x4a   : > { %v756_v15 = vsel %vm755_vm7, 1, %v1342_v36 }
  0x4b   : > { %vm759_vm8 = vc.u32 %v757_v6, %v753_v5  ;;  %v758_v25 = vadd.s32 %v756_v15, %v750_v13  ;;  %v811_v5 = vshll.u32 %v1526_v50, 16  ;;  %v863_v13 = vmul.u32 14564, %v860_v39 }
  0x4c   : > { %v760_v27 = vsel %vm759_vm8, 1, %v1342_v36  ;;  %v867_v15 = vshll.u32 %v1538_v58, 16 }
  0x4d   : > { %v762_v44 = vadd.s32 %v760_v27, %v758_v25  ;;  %v840_v25 = vshll.u32 %v1546_v1, 16 }
  0x4e   : > { %vm1581_vm15 = vc.u32 %v863_v13, %v867_v15  ;;  %v873_v39 = vadd.s32 %v867_v15, %v863_v13 }
  0x53   : > { %1241 = vmatmul.msk.bf16.gmra.mxu1 %vm312_vm0, %v361_v16  ;;  %v776_v16 = vmul.u32 14564, %v773_v59  ;;  %v1541_v59 = vadd.s32 56, %v1455_v22 }
  0x55   : > { %vm1507_vm9 = vc.u32 %v776_v16, %v780_v18  ;;  %v786_v33 = vadd.s32 %v780_v18, %v776_v16  ;;  %v889_v16 = vand.u32 65535, %v1541_v59 }
  0x56   : > { %v785_v49 = vsel %vm1507_vm9, 1, %v1342_v36 }
  0x57   : > { %1291 = vmatmul.msk.bf16.gmra.mxu3 %vm312_vm0, %v583_v8  ;;  %1228 = vmatmul.msk.bf16.gmra.mxu0 %vm312_vm0, %v299_v19  ;;  %v707_v8 = vshrl.u32 %v706_v0, 3  ;;  %v1497_v19 = vmul.u32 58254, %v802_v7  ;;  %vm1528_vm11 = vc.u32 %v786_v33, %v782_v28  ;;  %v763_v0 = vadd.s32 %v762_v44, %v752_v43 }
  0x58   : > { %1274 = vmatmul.msk.bf16.gmra.mxu2 %vm312_vm0, %v496_v20  ;;  %v787_v2 = vadd.s32 %v785_v49, %v779_v48  ;;  %v789_v61 = vsel %vm1528_vm11, 1, %v1342_v36  ;;  %v1586_v43 = vmul.u32 58254, %v889_v16  ;;  %v866_v48 = vmul.u32 58254, %v861_v55 }
  0x59   : > { %v708_v20 = vmul.u32 9, %v707_v8  ;;  %v809_v35 = vshll.u32 %v1497_v19, 16 }
  0x5b   : > { %v1514_v37 = vsub.s32 %v1455_v22, %v708_v20  ;;  %vm1532_vm12 = vc.u32 %v805_v34, %v809_v35  ;;  %v815_v6 = vadd.s32 %v809_v35, %v805_v34  ;;  %v837_v34 = vmul.u32 58254, %v832_v45 }
  0x5c   : > { %v869_v35 = vshll.u32 %v1562_v11, 16  ;;  %v892_v45 = vmul.u32 14564, %v889_v16 }
  0x5d   : > { %vm817_vm14 = vc.u32 %v815_v6, %v811_v5  ;;  %vm944_vm4 = vcmp.ne.s32.totalorder %v1514_v37, 0  ;;  %vm953_vm5 = vcmp.lt.s32.totalorder %v1514_v37, 0 }
  0x5e   : > { %v818_v44 = vsel %vm817_vm14, 1, %v1342_v36  ;;  %vm875_vm1 = vc.u32 %v873_v39, %v869_v35  ;;  %v897_v35 = vshrl.u32 %v1586_v43, 16  ;;  %vm1663_vm11 = vmand %vm953_vm5, %vm944_vm4 }
  0x90   : > { %v394_v57 = vpop.f32.mrf.mxu1 }
  0x94   : > { %v337_v10 = vpop.f32.mrf.mxu0 }
  0x95   : > { %v395_v31 = vadd.f32 %v394_v57, %v337_v10  ;;  %v838_v57 = vshll.u32 %v1516_v38, 16  ;;  %v814_v10 = vsel %vm1532_vm12, 1, %v1342_v36 }
  0x97   : > { %vm1564_vm13 = vc.u32 %v834_v56, %v838_v57  ;;  %v844_v27 = vadd.s32 %v838_v57, %v834_v56 }
  0x98   : > { %v396_v14 = vpop.f32.mrf.mxu1 }
  0x99   : > { %vm846_vm0 = vc.u32 %v844_v27, %v840_v25 }
  0x9a   : > { %v621_v32 = vpop.f32.mrf.mxu3  ;;  %v847_v6 = vsel %vm846_vm0, 1, %v1342_v36 }
  0x9b   : > { %v533_v46 = vpop.f32.mrf.mxu2 }
  0x9c   : > { %v339_v40 = vpop.f32.mrf.mxu0  ;;  %v557_v52 = vadd.f32 %v533_v46, %v395_v31  ;;  %v791_v31 = vadd.s32 %v789_v61, %v787_v2  ;;  %v872_v2 = vsel %vm1581_vm15, 1, %v1342_v36 }
  0x9d   : > { %v397_v18 = vadd.f32 %v396_v14, %v339_v40  ;;  %v843_v14 = vsel %vm1564_vm13, 1, %v1342_v36  ;;  %v890_v40 = vshrl.u32 %v1541_v59, 16  ;;  %v874_v13 = vadd.s32 %v872_v2, %v866_v48 }
  0x9e   : > { %v1543_v60 = vadd.f32 %v621_v32, %v557_v52  ;;  %v816_v32 = vadd.s32 %v814_v10, %v808_v3  ;;  %v792_v46 = vadd.s32 %v791_v31, %v781_v21  ;;  %v896_v52 = vshll.u32 %v1586_v43, 16 }
  0x9f   : > { %v1591_v49 = vmul.u32 14564, %v890_v40  ;;  %v845_v57 = vadd.s32 %v843_v14, %v837_v34  ;;  %v810_v3 = vshrl.u32 %v1497_v19, 16  ;;  %v764_v10 = vadd.s32 %v763_v0, %v754_v62 }
  0xa0   : > { %v399_v47 = vpop.f32.mrf.mxu1  ;;  %v654_v7 = vpack.c.bf16 %v1543_v60, %v1543_v60  ;;  %v820_v5 = vadd.s32 %v818_v44, %v816_v32  ;;  %vm900_vm2 = vc.u32 %v892_v45, %v896_v52  ;;  %v839_v19 = vshrl.u32 %v1516_v38, 16 }
  0xa1   : > { %v898_v15 = vshll.u32 %v1591_v49, 16  ;;  %v901_v24 = vsel %vm900_vm2, 1, %v1342_v36  ;;  %v812_v21 = vshrl.u32 %v1526_v50, 16  ;;  %v868_v31 = vshrl.u32 %v1538_v58, 16 }
  0xa2   : > { %v623_v8 = vpop.f32.mrf.mxu3  ;;  %664 = vst.msk [vmem:[%s1551_s14] sm:$0xf] %vm663_vm10, %v654_v7  ;;  %v895_v7 = vmul.u32 58254, %v890_v40  ;;  %v821_v25 = vadd.s32 %v820_v5, %v810_v3  ;;  %v841_v50 = vshrl.u32 %v1546_v1, 16  ;;  %v899_v2 = vshrl.u32 %v1591_v49, 16 }
  0xa3   : > { %v535_v28 = vpop.f32.mrf.mxu2 }
  0xa4   : > { %v342_v20 = vpop.f32.mrf.mxu0  ;;  %v558_v33 = vadd.f32 %v535_v28, %v397_v18  ;;  %v849_v18 = vadd.s32 %v847_v6, %v845_v57  ;;  %v903_v62 = vadd.s32 %v901_v24, %v895_v7  ;;  %v765_v28 = vshrl.u32 %v764_v10, 3 }
  0xa5   : > { %v400_v54 = vadd.f32 %v399_v47, %v342_v20  ;;  %v737_v47 = vmul.u32 9, %v736_v42  ;;  %v876_v20 = vsel %vm875_vm1, 1, %v1342_v36  ;;  %v793_v42 = vadd.s32 %v792_v46, %v783_v30 }
  0xa6   : > { %v1588_v17 = vadd.f32 %v623_v8, %v558_v33  ;;  %v1606_v8 = vadd.s32 64, %v1455_v22  ;;  %v902_v22 = vadd.s32 %v896_v52, %v892_v45  ;;  %v878_v32 = vadd.s32 %v876_v20, %v874_v13 }
  0xa7   : > { %v850_v34 = vadd.s32 %v849_v18, %v839_v19  ;;  %v794_v45 = vshrl.u32 %v793_v42, 3  ;;  %v822_v46 = vadd.s32 %v821_v25, %v812_v21  ;;  %v870_v52 = vshrl.u32 %v1562_v11, 16 }
  0xa8   : > { %v1574_v29 = vpop.f32.mrf.mxu1  ;;  %v655_v53 = vpack.c.bf16 %v1588_v17, %v1588_v17  ;;  %v918_v0 = vand.u32 65535, %v1606_v8  ;;  %v919_v38 = vshrl.u32 %v1606_v8, 16  ;;  %vm904_vm3 = vc.u32 %v902_v22, %v898_v15 }
  0xa9   : > { %v905_v14 = vsel %vm904_vm3, 1, %v1342_v36  ;;  %v879_v43 = vadd.s32 %v878_v32, %v868_v31  ;;  %v795_v7 = vmul.u32 9, %v794_v45 }
  0xaa   : > { %v626_v56 = vpop.f32.mrf.mxu3  ;;  %665 = vst.msk [vmem:[%s1551_s14 + $0x4] sm:$0xf] %vm663_vm10, %v655_v53  ;;  %v907_v4 = vadd.s32 %v905_v14, %v903_v62  ;;  %v1623_v39 = vmul.u32 58254, %v918_v0  ;;  %v1625_v40 = vmul.u32 14564, %v919_v38  ;;  %v1635_v53 = vsub.s32 %v1460_v26, %v737_v47 }
  0xab   : > { %v538_v61 = vpop.f32.mrf.mxu2  ;;  %v924_v11 = vmul.u32 58254, %v919_v38  ;;  %v880_v26 = vadd.s32 %v879_v43, %v870_v52  ;;  %v1654_v20 = vsub.s32 %v1472_v51, %v795_v7 }
  0xac   : > { %v344_v55 = vpop.f32.mrf.mxu0  ;;  %v559_v16 = vadd.f32 %v538_v61, %v400_v54  ;;  %v921_v54 = vmul.u32 14564, %v918_v0  ;;  %v908_v3 = vadd.s32 %v907_v4, %v897_v35  ;;  %v925_v5 = vshll.u32 %v1623_v39, 16 }
  0xad   : > { %v402_v58 = vadd.f32 %v1574_v29, %v344_v55  ;;  %v851_v29 = vadd.s32 %v850_v34, %v841_v50  ;;  %v927_v6 = vshll.u32 %v1625_v40, 16  ;;  %v823_v61 = vshrl.u32 %v822_v46, 3 }
  0xae   : > { %v1613_v27 = vadd.f32 %v626_v56, %v559_v16  ;;  %v766_v56 = vmul.u32 9, %v765_v28  ;;  %vm929_vm6 = vc.u32 %v921_v54, %v925_v5  ;;  %v931_v47 = vadd.s32 %v925_v5, %v921_v54 }
  0xaf   : > { %vm945_vm7 = vcmp.ne.s32.totalorder %v1635_v53, 0  ;;  %v852_v15 = vshrl.u32 %v851_v29, 3  ;;  %v909_v16 = vadd.s32 %v908_v3, %v899_v2  ;;  %v930_v18 = vsel %vm929_vm6, 1, %v1342_v36 }
  0xb0   : > { %v404_v12 = vpop.f32.mrf.mxu1  ;;  %v656_v30 = vpack.c.bf16 %v1613_v27, %v1613_v27  ;;  %v1645_v49 = vsub.s32 %v1466_v41, %v766_v56  ;;  %vm933_vm8 = vc.u32 %v931_v47, %v927_v6  ;;  %vm954_vm9 = vcmp.lt.s32.totalorder %v1635_v53, 0 }
  0xb1   : > { %v824_v41 = vmul.u32 9, %v823_v61  ;;  %v932_v42 = vadd.s32 %v930_v18, %v924_v11  ;;  %v881_v22 = vshrl.u32 %v880_v26, 3  ;;  %v926_v62 = vshrl.u32 %v1623_v39, 16  ;;  %vm1673_vm13 = vmand %vm954_vm9, %vm945_vm7 }
  0xb2   : > { %v628_v33 = vpop.f32.mrf.mxu3  ;;  %666 = vst.msk [vmem:[%s1551_s14 + $0x8] sm:$0xf] %vm663_vm10, %v656_v30  ;;  %v934_v0 = vsel %vm933_vm8, 1, %v1342_v36  ;;  %v972_v51 = vadd.s32 9, %v1635_v53  ;;  %vm946_vm12 = vcmp.ne.s32.totalorder %v1645_v49, 0  ;;  %vm955_vm14 = vcmp.lt.s32.totalorder %v1645_v49, 0 }
  0xb3   : > { %v540_v1 = vpop.f32.mrf.mxu2  ;;  %v936_v31 = vadd.s32 %v934_v0, %v932_v42  ;;  %v853_v32 = vmul.u32 9, %v852_v15  ;;  %v910_v30 = vshrl.u32 %v909_v16, 3  ;;  %vm947_vm15 = vcmp.ne.s32.totalorder %v1654_v20, 0  ;;  %vm1692_vm1 = vmand %vm955_vm14, %vm946_vm12 }
  0xb4   : > { %v347_v44 = vpop.f32.mrf.mxu0  ;;  %v560_v57 = vadd.f32 %v540_v1, %v402_v58  ;;  %vm956_vm0 = vcmp.lt.s32.totalorder %v1654_v20, 0  ;;  %v825_v34 = vsub.s32 %v1483_v63, %v824_v41  ;;  %v882_v35 = vmul.u32 9, %v881_v22 }
  0xb5   : > { %v405_v10 = vadd.f32 %v404_v12, %v347_v44  ;;  %v971_v12 = vadd.s32 9, %v1514_v37  ;;  %v937_v4 = vadd.s32 %v936_v31, %v926_v62  ;;  %v981_v39 = vsel %vm1673_vm13, %v972_v51, %v1635_v53  ;;  %vm1700_vm2 = vmand %vm956_vm0, %vm947_vm15 }
  0xb6   : > { %v1640_v55 = vadd.f32 %v628_v33, %v560_v57  ;;  %v928_v33 = vshrl.u32 %v1625_v40, 16  ;;  %v973_v58 = vadd.s32 9, %v1645_v49  ;;  %v974_v63 = vadd.s32 9, %v1654_v20 }
  0xb7   : > { %v980_v14 = vsel %vm1663_vm11, %v971_v12, %v1514_v37  ;;  %v854_v46 = vsub.s32 %v1491_v9, %v853_v32  ;;  %v911_v1 = vmul.u32 9, %v910_v30  ;;  %vm948_vm3 = vcmp.ne.s32.totalorder %v825_v34, 0 }
  0xb8   : > { %v1631_v48 = vpop.f32.mrf.mxu1  ;;  %v657_v19 = vpack.c.bf16 %v1640_v55, %v1640_v55  ;;  %v938_v52 = vadd.s32 %v937_v4, %v928_v33  ;;  %vm957_vm4 = vcmp.lt.s32.totalorder %v825_v34, 0  ;;  %vm989_vm5 = vcmp.ne.s32.totalorder %v980_v14, 8 }
  0xb9   : > { %vm990_vm6 = vcmp.ne.s32.totalorder %v981_v39, 8  ;;  %v883_v57 = vsub.s32 %v1501_v23, %v882_v35  ;;  %v982_v9 = vsel %vm1692_vm1, %v973_v58, %v1645_v49  ;;  %v975_v29 = vadd.s32 9, %v825_v34  ;;  %vm1717_vm7 = vmand %vm957_vm4, %vm948_vm3 }
  0xba   : > { %v631_v13 = vpop.f32.mrf.mxu3  ;;  %667 = vst.msk [vmem:[%s1551_s14 + $0xc] sm:$0xf] %vm663_vm10, %v657_v19  ;;  %vm949_vm8 = vcmp.ne.s32.totalorder %v854_v46, 0  ;;  %vm958_vm9 = vcmp.lt.s32.totalorder %v854_v46, 0  ;;  %v912_v5 = vsub.s32 %v1541_v59, %v911_v1  ;;  %v939_v6 = vshrl.u32 %v938_v52, 3 }
  0xbb   : > { %v543_v21 = vpop.f32.mrf.mxu2  ;;  %v1343_v23 = vmov 0.0   ;;  %vm991_vm11 = vcmp.ne.s32.totalorder %v982_v9, 8  ;;  %v976_v26 = vadd.s32 9, %v854_v46  ;;  %vm950_vm12 = vcmp.ne.s32.totalorder %v883_v57, 0  ;;  %vm1736_vm15 = vmand %vm958_vm9, %vm949_vm8 }
  0xbc   : > { %v349_v24 = vpop.f32.mrf.mxu0  ;;  %v561_v28 = vadd.f32 %v543_v21, %v405_v10  ;;  %v1292_v7 = vsel %vm989_vm5, 1.0, %v1343_v23  ;;  %v1293_v61 = vsel %vm990_vm6, 1.0, %v1343_v23  ;;  %vm959_vm13 = vcmp.lt.s32.totalorder %v883_v57, 0 }
  0xbd   : > { %v407_v43 = vadd.f32 %v1631_v48, %v349_v24  ;;  %v983_v48 = vsel %vm1700_vm2, %v974_v63, %v1654_v20  ;;  %v984_v59 = vsel %vm1717_vm7, %v975_v29, %v825_v34  ;;  %v977_v15 = vadd.s32 9, %v883_v57  ;;  %vm1746_vm2 = vmand %vm959_vm13, %vm950_vm12 }
  0xbe   : > { %v1681_v50 = vadd.f32 %v631_v13, %v561_v28  ;;  %vm1726_vm14 = vcmp.ne.s32.totalorder %v983_v48, 8  ;;  %vm951_vm0 = vcmp.ne.s32.totalorder %v912_v5, 0  ;;  %vm960_vm1 = vcmp.lt.s32.totalorder %v912_v5, 0 }
  0xbf   : > { %v940_v16 = vmul.u32 9, %v939_v6  ;;  %v1017_v18 = vmul.f32 %v1293_v61, %v1588_v17  ;;  %v1294_v20 = vsel %vm991_vm11, 1.0, %v1343_v23  ;;  %v985_v42 = vsel %vm1736_vm15, %v976_v26, %v854_v46  ;;  %vm1758_vm4 = vmand %vm960_vm1, %vm951_vm0 }
  0xc0   : > { %v409_v25 = vpop.f32.mrf.mxu1  ;;  %v658_v44 = vpack.c.bf16 %v1681_v50, %v1681_v50  ;;  %v1016_v22 = vmul.f32 %v1292_v7, %v1543_v60  ;;  %v1295_v62 = vsel %vm1726_vm14, 1.0, %v1343_v23  ;;  %vm993_vm3 = vcmp.ne.s32.totalorder %v984_v59, 8 }
  0xc1   : > { %v1018_v51 = vmul.f32 %v1294_v20, %v1613_v27  ;;  %v986_v28 = vsel %vm1746_vm2, %v977_v15, %v883_v57  ;;  %v941_v31 = vsub.s32 %v1606_v8, %v940_v16  ;;  %v1052_v36 = vmul.f32 %v1017_v18, %v1588_v17 }
  0xc2   : > { %v633_v37 = vpop.f32.mrf.mxu3  ;;  %668 = vst.msk [vmem:[%s1551_s14 + $0x10] sm:$0xf] %vm663_vm10, %v658_v44  ;;  %vm994_vm5 = vcmp.ne.s32.totalorder %v985_v42, 8  ;;  %vm1025_vm6 = vcmask 130048   ;;  %v1019_v30 = vmul.f32 %v1295_v62, %v1640_v55  ;;  %v1296_v33 = vsel %vm993_vm3, 1.0, %v1343_v23 }
  0xc3   : > { %v545_v53 = vpop.f32.mrf.mxu2  ;;  %v1051_v14 = vmul.f32 %v1016_v22, %v1543_v60  ;;  %v1027_v35 = vsel %vm1025_vm6, %v1017_v18, 0.0  ;;  %vm995_vm7 = vcmp.ne.s32.totalorder %v986_v28, 8  ;;  %v1053_v17 = vmul.f32 %v1018_v51, %v1613_v27 }
  0xc4   : > { %v352_v54 = vpop.f32.mrf.mxu0  ;;  %v562_v2 = vadd.f32 %v545_v53, %v407_v43  ;;  %v1297_v39 = vsel %vm994_vm5, 1.0, %v1343_v23  ;;  %vm952_vm8 = vcmp.ne.s32.totalorder %v941_v31, 0  ;;  %vm961_vm9 = vcmp.lt.s32.totalorder %v941_v31, 0 }
  0xc5   : > { %v410_v49 = vadd.f32 %v409_v25, %v352_v54  ;;  %v978_v25 = vadd.s32 9, %v912_v5  ;;  %v1061_v40 = vsel %vm1025_vm6, %v1052_v36, 0.0  ;;  %v1020_v58 = vmul.f32 %v1296_v33, %v1681_v50  ;;  %vm1788_vm12 = vmand %vm961_vm9, %vm952_vm8 }
  0xc6   : > { %v1724_v11 = vadd.f32 %v633_v37, %v562_v2  ;;  %v1026_v44 = vsel %vm1025_vm6, %v1016_v22, 0.0  ;;  %v1054_v37 = vmul.f32 %v1019_v30, %v1640_v55  ;;  %v1298_v27 = vsel %vm995_vm7, 1.0, %v1343_v23 }
  0xc7   : > { %v987_v34 = vsel %vm1758_vm4, %v978_v25, %v912_v5  ;;  %v979_v1 = vadd.s32 9, %v941_v31  ;;  %v1060_v52 = vsel %vm1025_vm6, %v1051_v14, 0.0  ;;  %v1029_v43 = vsel %vm1025_vm6, %v1018_v51, 0.0 }
  0xc8   : > { %v1708_v56 = vpop.f32.mrf.mxu1  ;;  %v659_v10 = vpack.c.bf16 %v1724_v11, %v1724_v11  ;;  %vm996_vm11 = vcmp.ne.s32.totalorder %v987_v34, 8  ;;  %v1021_v54 = vmul.f32 %v1297_v39, %v1724_v11  ;;  %v1028_v57 = vadd.f32 %v1027_v35, %v1026_v44 }
  0xc9   : > { %v1062_v55 = vadd.f32 %v1061_v40, %v1060_v52  ;;  %v1063_v9 = vsel %vm1025_vm6, %v1053_v17, 0.0  ;;  %v1299_v48 = vsel %vm996_vm11, 1.0, %v1343_v23  ;;  %v1031_v29 = vsel %vm1025_vm6, %v1019_v30, 0.0 }
  0xca   : > { %v636_v13 = vpop.f32.mrf.mxu3  ;;  %669 = vst.msk [vmem:[%s1551_s14 + $0x14] sm:$0xf] %vm663_vm10, %v659_v10  ;;  %v1055_v2 = vmul.f32 %v1020_v58, %v1681_v50  ;;  %v1030_v6 = vadd.f32 %v1029_v43, %v1028_v57  ;;  %v1065_v7 = vsel %vm1025_vm6, %v1054_v37, 0.0  ;;  %v1033_v61 = vsel %vm1025_vm6, %v1020_v58, 0.0 }
  0xcb   : > { %v548_v12 = vpop.f32.mrf.mxu2  ;;  %v988_v26 = vsel %vm1788_vm12, %v979_v1, %v941_v31  ;;  %v1056_v47 = vmul.f32 %v1021_v54, %v1724_v11  ;;  %v1035_v16 = vsel %vm1025_vm6, %v1021_v54, 0.0 }
  0xcc   : > { %v354_v24 = vpop.f32.mrf.mxu0  ;;  %v563_v0 = vadd.f32 %v548_v12, %v410_v49  ;;  %v1032_v15 = vadd.f32 %v1031_v29, %v1030_v6  ;;  %v1067_v50 = vsel %vm1025_vm6, %v1055_v2, 0.0  ;;  %vm997_vm13 = vcmp.ne.s32.totalorder %v988_v26, 8 }
  0xcd   : > { %v412_v63 = vadd.f32 %v1708_v56, %v354_v24  ;;  %v1069_v11 = vsel %vm1025_vm6, %v1056_v47, 0.0 }
  0xce   : > { %v651_v32 = vadd.f32 %v636_v13, %v563_v0  ;;  %v1064_v13 = vadd.f32 %v1063_v9, %v1062_v55  ;;  %v1034_v41 = vadd.f32 %v1033_v61, %v1032_v15  ;;  %v1300_v0 = vsel %vm997_vm13, 1.0, %v1343_v23 }
  0xd0   : > { %v414_v21 = vpop.f32.mrf.mxu1  ;;  %v660_v4 = vpack.c.bf16 %v651_v32, %v651_v32  ;;  %v1022_v3 = vmul.f32 %v1298_v27, %v651_v32  ;;  %v1066_v24 = vadd.f32 %v1065_v7, %v1064_v13  ;;  %v1036_v62 = vadd.f32 %v1035_v16, %v1034_v41 }
  0xd2   : > { %v638_v8 = vpop.f32.mrf.mxu3  ;;  %670 = vst.msk [vmem:[%s1551_s14 + $0x18] sm:$0xf] %vm663_vm10, %v660_v4  ;;  %v1057_v18 = vmul.f32 %v1022_v3, %v651_v32  ;;  %v1037_v12 = vsel %vm1025_vm6, %v1022_v3, 0.0  ;;  %v1068_v22 = vadd.f32 %v1067_v50, %v1066_v24 }
  0xd3   : > { %v550_v45 = vpop.f32.mrf.mxu2  ;;  %v1038_v36 = vadd.f32 %v1037_v12, %v1036_v62 }
  0xd4   : > { %v357_v60 = vpop.f32.mrf.mxu0  ;;  %v564_v53 = vadd.f32 %v550_v45, %v412_v63  ;;  %v1071_v38 = vsel %vm1025_vm6, %v1057_v18, 0.0  ;;  %v1070_v31 = vadd.f32 %v1069_v11, %v1068_v22 }
  0xd5   : > { %v415_v59 = vadd.f32 %v414_v21, %v357_v60 }
  0xd6   : > { %v652_v5 = vadd.f32 %v638_v8, %v564_v53  ;;  %v1072_v14 = vadd.f32 %v1071_v38, %v1070_v31 }
  0xd8   : > { %v416_v46 = vpop.f32.mrf.mxu1  ;;  %v661_v49 = vpack.c.bf16 %v652_v5, %v652_v5  ;;  %v1023_v10 = vmul.f32 %v1299_v48, %v652_v5 }
  0xda   : > { %v641_v19 = vpop.f32.mrf.mxu3  ;;  %671 = vst.msk [vmem:[%s1551_s14 + $0x1c] sm:$0xf] %vm663_vm10, %v661_v49  ;;  %v1058_v21 = vmul.f32 %v1023_v10, %v652_v5  ;;  %v1039_v51 = vsel %vm1025_vm6, %v1023_v10, 0.0 }
  0xdb   : > { %v553_v42 = vpop.f32.mrf.mxu2  ;;  %v1040_v35 = vadd.f32 %v1039_v51, %v1038_v36 }
  0xdc   : > { %v359_v20 = vpop.f32.mrf.mxu0  ;;  %v565_v25 = vadd.f32 %v553_v42, %v415_v59  ;;  %v1073_v32 = vsel %vm1025_vm6, %v1058_v21, 0.0 }
  0xdd   : > { %v1074_v8 = vadd.f32 %v1073_v32, %v1072_v14 }
  0xde   : > { %v653_v28 = vadd.f32 %v641_v19, %v565_v25 }
  0xe0   : > { %v662_v30 = vpack.c.bf16 %v653_v28, %v653_v28  ;;  %v1024_v33 = vmul.f32 %v1300_v0, %v653_v28 }
  0xe2   : > { %v643_v34 = vpop.f32.mrf.mxu3  ;;  %672 = vst.msk [vmem:[%s1551_s14 + $0x20] sm:$0xf] %vm663_vm10, %v662_v30  ;;  %v1041_v4 = vsel %vm1025_vm6, %v1024_v33, 0.0  ;;  %v1059_v23 = vmul.f32 %v1024_v33, %v653_v28  ;;  %vm1049_vm10 = vcmask 122880  }
  0xe3   : > { %v1042_v17 = vadd.f32 %v1041_v4, %v1040_v35  ;;  %v555_v39 = vpop.f32.mrf.mxu2 }
  0xe4   : > { %v1075_v40 = vsel %vm1025_vm6, %v1059_v23, 0.0 }
  0xe5   : > { %v1043_v58 = vrot.slane %v1042_v17, 4  ;;  %v1076_v63 = vadd.f32 %v1075_v40, %v1074_v8 }
  0xe7   : > { %v1044_v60 = vadd.f32 %v1043_v58, %v1042_v17  ;;  %v1077_v44 = vrot.slane %v1076_v63, 4 }
  0xe9   : > { %v1045_v37 = vrot.slane %v1044_v60, 2  ;;  %v1078_v27 = vadd.f32 %v1077_v44, %v1076_v63 }
  0xeb   : > { %v1046_v45 = vadd.f32 %v1045_v37, %v1044_v60  ;;  %v1079_v46 = vrot.slane %v1078_v27, 2 }
  0xed   : > { %v1047_v1 = vrot.slane %v1046_v45, 1  ;;  %v1080_v52 = vadd.f32 %v1079_v46, %v1078_v27 }
  0xef   : > { %v1048_v43 = vadd.f32 %v1047_v1, %v1046_v45  ;;  %v1081_v54 = vrot.slane %v1080_v52, 1 }
  0xf1   : > { %1050 = vst.msk [vmem:[%s211_s19] sm:$0x1] %vm1049_vm10, %v1048_v43  ;;  %v1082_v53 = vadd.f32 %v1081_v54, %v1080_v52 }
  0xf3   : > { %1083 = vst.msk [vmem:[%s214_s22] sm:$0x1] %vm1049_vm10, %v1082_v53 }
  0xf4 PF: > { %s15_s15 = sadd.s32 1, %s1340_s15  }
  0xf5   : > { %p12_p4 = scmp.ge.s32.totalorder %s15_s15, 4  }
  0xf7   :  { %14 = sbr.rel (!%p12_p4) target bundleno = 1 (0x1), region = 85 }

// kernel: discriminator_forward.9
= control target key start
LH: loop header
LB: loop body
LE: loop exit
PB: predicated region body
PF: predicated region fallthrough
CT: control target
= control target key end

     0   :  { %s312_s12 = smov 0   ;;  %s335_s0 = inlined_call_operand.vmem [shape: bf16[2,20,32], index: 0, kind: input, shape index: {}]   ;;  %s336_s1 = inlined_call_operand.vmem [shape: f32[1,32], index: 1, kind: input, shape index: {}]   ;;  %s337_s2 = inlined_call_operand.vmem [shape: f32[1,32], index: 2, kind: input, shape index: {}]   ;;  %s338_s3 = inlined_call_operand.vmem [shape: bf16[2,20,32], index: 3, kind: output, shape index: {}]  }
   0x1 LB: > { %s260_s13 = sadd.s32 4294967295, %s290_s12   ;;  %p264_p0 = scmp.ge.s32.totalorder %s290_s12, 1  ;;  %s290_s12 = sphi %s312_s12, %s13_s12  }
   0x2   : > { %p137_p1 = scmp.lt.s32.totalorder %s290_s12, 3 }
   0x4   : > { %p138_p2 = pnand %p264_p0, %p137_p1 }
   0x5   : > { %p161_p3 = scmp.lt.s32.totalorder (!%p138_p2), %s260_s13, 1 }
   0x6   : > { %141 = sbr.rel (%p138_p2) target bundleno = 31 (0x1f), region = 32 }
   0xb   : > { %s340_s13 = smov (!%p161_p3, %s260_s13), 1  ;;  %v282_v0 = vld [vmem:[%s336_s1] ss:$0 sm:$0xff]  ;;  %vm200_vm0 = vcmask 257024   ;;  %vm203_vm1 = vcmask 254976  }
   0xc   : > { %s273_s14 = smul.u32 12, %s340_s13  ;;  %v283_v6 = vld [vmem:[%s337_s2] ss:$0 sm:$0xff] }
   0xe   : > { %s165_s17 = scalar_lea.vmem %s335_s0, %s273_s14  ;;  %s170_s24 = scalar_lea.vmem %s338_s3, %s273_s14 }
   0xf   : > { %v270_v1 = vld [vmem:[%s165_s17] sm:$0xff]   ;;  %v173_v2 = vld [vmem:[%s165_s17 + $0x8] sm:$0x3] }
  0x10   : > { %v271_v3 = vunpack.c.l.bf16 %v270_v1  ;;  %v272_v4 = vunpack.c.h.bf16 %v270_v1  ;;  %v176_v5 = vunpack.c.l.bf16 %v173_v2 }
  0x12   : > { %v181_v7 = vmul.f32 %v282_v0, %v271_v3  ;;  %v182_v8 = vmul.f32 %v282_v0, %v272_v4  ;;  %v183_v9 = vmul.f32 %v282_v0, %v176_v5 }
  0x14   : > { %v188_v10 = vadd.f32 %v283_v6, %v181_v7  ;;  %v189_v11 = vadd.f32 %v283_v6, %v182_v8  ;;  %v190_v12 = vadd.f32 %v283_v6, %v183_v9 }
  0x16   : > { %v191_v13 = vmul.f32 0.2, %v188_v10  ;;  %v192_v14 = vmul.f32 0.2, %v189_v11  ;;  %v193_v15 = vmul.f32 0.2, %v190_v12 }
  0x18   : > { %v194_v16 = vmax.f32 %v188_v10, %v191_v13  ;;  %v195_v17 = vmax.f32 %v189_v11, %v192_v14  ;;  %v196_v18 = vmax.f32 %v190_v12, %v193_v15 }
  0x1a   : > { %v197_v19 = vpack.c.bf16 %v194_v16, %v194_v16  ;;  %v198_v20 = vpack.c.bf16 %v195_v17, %v195_v17  ;;  %v199_v21 = vpack.c.bf16 %v196_v18, %v196_v18 }
  0x1c   : > { %201 = vst.msk [vmem:[%s170_s24] sm:$0xf] %vm200_vm0, %v197_v19 }
  0x1d   : > { %202 = vst.msk [vmem:[%s170_s24 + $0x4] sm:$0xf] %vm200_vm0, %v198_v20 }
  0x1e   : > { %204 = vst.msk [vmem:[%s170_s24 + $0x8] sm:$0x3] %vm203_vm1, %v199_v21 }
  0x1f PF: > { %s13_s12 = sadd.s32 1, %s290_s12  }
  0x20   : > { %p10_p4 = scmp.ge.s32.totalorder %s13_s12, 4  }
  0x22   :  { %12 = sbr.rel (!%p10_p4) target bundleno = 1 (0x1), region = 62 }

// kernel: discriminator_forward.8
= control target key start
LH: loop header
LB: loop body
LE: loop exit
PB: predicated region body
PF: predicated region fallthrough
CT: control target
= control target key end

     0   :  { %s962_s15 = smov 0   ;;  %s1085_s0 = inlined_call_operand.vmem [shape: bf16[2,32,64], index: 0, kind: input, shape index: {}]   ;;  %s1086_s1 = inlined_call_operand.vmem [shape: bf16[4,64,32], index: 1, kind: input, shape index: {}]   ;;  %s1087_s2 = inlined_call_operand.vmem [shape: bf16[2,20,32], index: 2, kind: output, shape index: {0}]   ;;  %s1088_s3 = inlined_call_operand.vmem [shape: f32[2,1,32], index: 3, kind: output, shape index: {1}]   ;;  %s1089_s4 = inlined_call_operand.vmem [shape: f32[2,1,32], index: 4, kind: output, shape index: {2}]  }
   0x1 LB: > { %s780_s16 = sadd.s32 4294967295, %s933_s15   ;;  %p784_p0 = scmp.ge.s32.totalorder %s933_s15, 1  ;;  %s933_s15 = sphi %s962_s15, %s15_s15  }
   0x2   : > { %p167_p1 = scmp.lt.s32.totalorder %s933_s15, 3 }
   0x4   : > { %p168_p2 = pnand %p784_p0, %p167_p1 }
   0x5   : > { %p199_p3 = scmp.lt.s32.totalorder (!%p168_p2), %s780_s16, 1 }
   0x6   : > { %171 = sbr.rel (%p168_p2) target bundleno = 201 (0xc9), region = 28 }
   0xb   : > { %v906_v0 = vld [vmem:[%s1086_s1 + $0x38] sm:$0xff]  ;;  %v905_v4 = vld [vmem:[%s1086_s1 + $0x30] sm:$0xff]  ;;  %s1091_s16 = smov (!%p199_p3, %s780_s16), 1  ;;  %v904_v8 = vld [vmem:[%s1086_s1 + $0x28] sm:$0xff]  ;;  %vm245_vm0 = vsmask.f32 7424  ;;  %v528_v57 = vlaneseq }
   0xc   : > { %v902_v1 = vld [vmem:[%s1086_s1 + $0x18] sm:$0xff]  ;;  %296 = vmatpush.bf16.msra.mxu0 %v906_v0  ;;  %v901_v5 = vld [vmem:[%s1086_s1 + $0x10] sm:$0xff]  ;;  %s897_s9 = sshll.u32 %s1091_s16, 4  ;;  %v900_v9 = vld [vmem:[%s1086_s1 + $0x8] sm:$0xff]  ;;  %vm465_vm1 = vcmask 1044480   ;;  %vm285_vm2 = vcmask 523264   ;;  %s214_s12 = scalar_lea.vmem %s1089_s4, %s1091_s16 }
   0xd   : > { %v911_v2 = vld [vmem:[%s1086_s1 + $0x58] sm:$0xff]  ;;  %346 = vmatpush.bf16.msra.mxu1 %v902_v1  ;;  %v910_v6 = vld [vmem:[%s1086_s1 + $0x50] sm:$0xff]  ;;  %v909_v10 = vld [vmem:[%s1086_s1 + $0x48] sm:$0xff]  ;;  %s1012_s20 = scalar_lea.vmem %s1085_s0, %s897_s9  ;;  %vm383_vm3 = vsmask.f32 5376  ;;  %v1044_v58 = vshrl.u32 %v528_v57, 7  ;;  %s211_s9 = scalar_lea.vmem %s1088_s3, %s1091_s16 }
   0xe   : > { %v915_v3 = vld [vmem:[%s1086_s1 + $0x78] sm:$0xff]  ;;  %435 = vmatpush.bf16.msra.mxu2 %v911_v2  ;;  %v914_v7 = vld [vmem:[%s1086_s1 + $0x70] sm:$0xff]  ;;  %v913_v11 = vld [vmem:[%s1086_s1 + $0x68] sm:$0xff]  ;;  %s916_s29 = smul.u32 12, %s1091_s16 }
   0xf   : > { %503 = vmatpush.bf16.msra.mxu3 %v915_v3  ;;  %v898_v12 = vld [vmem:[%s1012_s20] sm:$0xff]  ;;  %v227_v13 = vld [vmem:[%s1012_s20 + $0x8] sm:$0x7]  ;;  %v907_v18 = vld [vmem:[%s1012_s20 + $0x8] sm:$0x10]  ;;  %v1047_v59 = vadd.s32 8, %v1044_v58 }
  0x10   : > { %297 = vmatpush.bf16.msra.mxu0 %v905_v4  ;;  %v360_v14 = vld [vmem:[%s1012_s20] sm:$0xc]  ;;  %v242_v15 = vunpack.c.l.b16 %v227_v13  ;;  %v361_v16 = vld [vmem:[%s1012_s20 + $0x4] sm:$0xf]  ;;  %v846_v17 = vld [vmem:[%s1012_s20 + $0x8] sm:$0xf]  ;;  %s1065_s6 = scalar_lea.vmem %s1087_s2, %s916_s29 }
  0x11   : > { %347 = vmatpush.bf16.msra.mxu1 %v901_v5  ;;  %v377_v19 = vunpack.c.l.b16 %v360_v14  ;;  %v247_v20 = vshrl.u32 %v898_v12, 16  ;;  %v249_v21 = vshll.u32 %v898_v12, 16  ;;  %v378_v22 = vunpack.c.l.b16 %v361_v16  ;;  %v452_v24 = vld [vmem:[%s1012_s20] sm:$0x8]  ;;  %v218_v52 = vld [vmem:[%s1012_s20 + $0x8] sm:$0x3] }
  0x12   : > { %436 = vmatpush.bf16.msra.mxu2 %v910_v6  ;;  %v847_v23 = vor.u32 %v907_v18, %v846_v17  ;;  %v244_v25 = vpack.c.b16 %v242_v15, %v242_v15  ;;  %v463_v26 = vunpack.c.l.b16 %v452_v24  ;;  %v903_v27 = vld [vmem:[%s1086_s1 + $0x20] sm:$0xff]  ;;  %v311_v54 = vunpack.c.l.b16 %v218_v52 }
  0x13   : > { %504 = vmatpush.bf16.msra.mxu3 %v914_v7  ;;  %v899_v28 = vld [vmem:[%s1086_s1] sm:$0xff]  ;;  %v251_v29 = vrot.slane %v249_v21, 1  ;;  %v381_v30 = vpack.c.b16 %v378_v22, %v377_v19  ;;  %v535_v60 = vand.u32 65535, %v1044_v58  ;;  %v564_v61 = vand.u32 65535, %v1047_v59 }
  0x14   : > { %298 = vmatpush.bf16.msra.mxu0 %v904_v8  ;;  %v393_v31 = vshrl.u32 %v847_v23, 16  ;;  %v396_v32 = vshll.u32 %v847_v23, 16  ;;  %v908_v33 = vld [vmem:[%s1086_s1 + $0x40] sm:$0xff]  ;;  %v254_v35 = vshll.u32 %v244_v25, 16  ;;  %v464_v36 = vpack.c.b16 %v378_v22, %v463_v26 }
  0x15   : > { %348 = vmatpush.bf16.msra.mxu1 %v900_v9  ;;  %v912_v34 = vld [vmem:[%s1086_s1 + $0x60] sm:$0xff]  ;;  %v467_v37 = vrot.slane %v847_v23, 3  ;;  %v252_v38 = vor.u32 %v251_v29, %v247_v20  ;;  %v385_v39 = vshrl.u32 %v381_v30, 16  ;;  %v388_v40 = vshll.u32 %v381_v30, 16 }
  0x16   : > { %437 = vmatpush.bf16.msra.mxu2 %v909_v10  ;;  %v395_v41 = vrot.slane %v393_v31, 2  ;;  %v256_v42 = vrot.slane %v254_v35, 1  ;;  %v398_v43 = vrot.slane %v396_v32, 3  ;;  %v466_v44 = vrot.slane %v464_v36, 3 }
  0x17   : > { %505 = vmatpush.bf16.msra.mxu3 %v913_v11  ;;  %v387_v45 = vrot.slane %v385_v39, 2  ;;  %v390_v46 = vrot.slane %v388_v40, 3  ;;  %v258_v53 = vshrl.u32 %v244_v25, 16  ;;  %v312_v56 = vpack.c.b16 %v311_v54, %v311_v54 }
  0x18   : > { %299 = vmatpush.bf16.msra.mxu0 %v903_v27  ;;  %v257_v47 = vsel %vm245_vm0, %v252_v38, %v256_v42  ;;  %v399_v48 = vor.u32 %v398_v43, %v395_v41  ;;  %v468_v49 = vsel %vm465_vm1, %v466_v44, %v467_v37  ;;  %v565_v62 = vshrl.u32 %v1047_v59, 16 }
  0x19   : > { %349 = vmatpush.bf16.msra.mxu1 %v899_v28  ;;  %v391_v50 = vor.u32 %v390_v46, %v387_v45  ;;  %v260_v55 = vor.u32 %v258_v53, %v256_v42  ;;  %v536_v63 = vshrl.u32 %v1044_v58, 16  ;;  %v568_v0 = vmul.u32 52428, %v564_v61 }
  0x1a   : > { %438 = vmatpush.bf16.msra.mxu2 %v908_v33  ;;  %v539_v1 = vmul.u32 52428, %v535_v60  ;;  %v569_v2 = vmul.u32 52429, %v565_v62  ;;  %v567_v3 = vmul.u32 52429, %v564_v61  ;;  %v1054_v5 = vadd.s32 16, %v1044_v58 }
  0x1b   : > { %506 = vmatpush.bf16.msra.mxu3 %v912_v34  ;;  %816 = vmatmul.msk.bf16.vlgmr.msra.gmra.mxu0 %vm285_vm2, %v257_v47  ;;  %v400_v51 = vsel %vm383_vm3, %v391_v50, %v399_v48  ;;  %v571_v4 = vshll.u32 %v568_v0, 16  ;;  %v540_v6 = vmul.u32 52429, %v536_v63  ;;  %v538_v7 = vmul.u32 52429, %v535_v60 }
  0x1c   : > { %834 = vmatmul.msk.bf16.vlgmr.msra.gmra.mxu1 %vm285_vm2, %v898_v12  ;;  %v542_v8 = vshll.u32 %v539_v1, 16  ;;  %v593_v9 = vand.u32 65535, %v1054_v5  ;;  %v573_v10 = vshll.u32 %v569_v2, 16  ;;  %v594_v12 = vshrl.u32 %v1054_v5, 16 }
  0x1d   : > { %864 = vmatmul.msk.bf16.vlgmr.msra.gmra.mxu2 %vm285_vm2, %v400_v51  ;;  %vm575_vm4 = vc.u32 %v567_v3, %v571_v4  ;;  %v577_v11 = vadd.s32 %v571_v4, %v567_v3  ;;  %v544_v14 = vshll.u32 %v540_v6, 16  ;;  %v570_v16 = vmul.u32 52428, %v565_v62 }
  0x1e   : > { %890 = vmatmul.msk.bf16.vlgmr.msra.gmra.mxu3 %vm285_vm2, %v468_v49  ;;  %v597_v13 = vmul.u32 52428, %v593_v9  ;;  %vm546_vm5 = vc.u32 %v538_v7, %v542_v8  ;;  %v548_v15 = vadd.s32 %v542_v8, %v538_v7  ;;  %v541_v17 = vmul.u32 52428, %v536_v63 }
  0x1f   : > { %v935_v18 = vmov 0   ;;  %vm579_vm6 = vc.u32 %v577_v11, %v573_v10  ;;  %v596_v20 = vmul.u32 52429, %v593_v9  ;;  %v598_v21 = vmul.u32 52429, %v594_v12 }
  0x20   : > { %v576_v19 = vsel %vm575_vm4, 1, %v935_v18  ;;  %v600_v22 = vshll.u32 %v597_v13, 16  ;;  %v547_v23 = vsel %vm546_vm5, 1, %v935_v18  ;;  %vm550_vm7 = vc.u32 %v548_v15, %v544_v14 }
  0x21   : > { %v578_v24 = vadd.s32 %v576_v19, %v570_v16  ;;  %v580_v25 = vsel %vm579_vm6, 1, %v935_v18  ;;  %v549_v26 = vadd.s32 %v547_v23, %v541_v17  ;;  %v602_v27 = vshll.u32 %v598_v21, 16 }
  0x22   : > { %vm604_vm8 = vc.u32 %v596_v20, %v600_v22  ;;  %v606_v28 = vadd.s32 %v600_v22, %v596_v20  ;;  %v551_v29 = vsel %vm550_vm7, 1, %v935_v18  ;;  %v572_v30 = vshrl.u32 %v568_v0, 16 }
  0x23   : > { %v582_v31 = vadd.s32 %v580_v25, %v578_v24  ;;  %v599_v32 = vmul.u32 52428, %v594_v12  ;;  %v605_v33 = vsel %vm604_vm8, 1, %v935_v18  ;;  %v543_v34 = vshrl.u32 %v539_v1, 16 }
  0x24   : > { %v553_v35 = vadd.s32 %v551_v29, %v549_v26  ;;  %vm608_vm9 = vc.u32 %v606_v28, %v602_v27  ;;  %v574_v36 = vshrl.u32 %v569_v2, 16  ;;  %v545_v40 = vshrl.u32 %v540_v6, 16 }
  0x25   : > { %v607_v38 = vadd.s32 %v605_v33, %v599_v32  ;;  %v609_v39 = vsel %vm608_vm9, 1, %v935_v18  ;;  %v601_v43 = vshrl.u32 %v597_v13, 16  ;;  %v603_v47 = vshrl.u32 %v598_v21, 16 }
  0x26   : > { %v554_v41 = vadd.s32 %v553_v35, %v543_v34  ;;  %vm523_vm0 = vcmask 257024   ;;  %v936_v15 = vmov 0.0   ;;  %vm646_vm7 = vcmask 261120  }
  0x27   : > { %v611_v44 = vadd.s32 %v609_v39, %v607_v38  ;;  %vm526_vm8 = vcmask 254976   ;;  %vm658_vm9 = vcmask 253952  }
  0x28   : > { %v555_v45 = vadd.s32 %v554_v41, %v545_v40 }
  0x2a   : > { %v556_v49 = vshrl.u32 %v555_v45, 2 }
  0x2b   : > { %817 = vmatmul.msk.bf16.gmra.mxu0 %vm285_vm2, %v260_v55 }
  0x2c   : > { %835 = vmatmul.msk.bf16.gmra.mxu1 %vm285_vm2, %v312_v56  ;;  %v557_v54 = vmul.u32 5, %v556_v49 }
  0x2d   : > { %865 = vmatmul.msk.bf16.gmra.mxu2 %vm285_vm2, %v399_v48  ;;  %v612_v48 = vadd.s32 %v611_v44, %v601_v43 }
  0x2e   : > { %891 = vmatmul.msk.bf16.gmra.mxu3 %vm285_vm2, %v467_v37  ;;  %v583_v37 = vadd.s32 %v582_v31, %v572_v30  ;;  %v558_v57 = vsub.s32 %v1044_v58, %v557_v54 }
  0x2f   : > { %v613_v51 = vadd.s32 %v612_v48, %v603_v47 }
  0x30   : > { %v584_v42 = vadd.s32 %v583_v37, %v574_v36  ;;  %vm619_vm12 = vcmp.ne.s32.totalorder %v558_v57, 0  ;;  %vm622_vm13 = vcmp.lt.s32.totalorder %v558_v57, 0  ;;  %v628_v4 = vadd.s32 5, %v558_v57 }
  0x31   : > { %v614_v56 = vshrl.u32 %v613_v51, 2  ;;  %vm625_vm15 = vmand %vm622_vm13, %vm619_vm12 }
  0x32   : > { %v585_v46 = vshrl.u32 %v584_v42, 2  ;;  %v631_v8 = vsel %vm625_vm15, %v628_v4, %v558_v57 }
  0x33   : > { %v615_v61 = vmul.u32 5, %v614_v56  ;;  %vm634_vm4 = vcmp.ne.s32.totalorder %v631_v8, 4 }
  0x34   : > { %v586_v50 = vmul.u32 5, %v585_v46  ;;  %v892_v18 = vsel %vm634_vm4, 1.0, %v936_v15 }
  0x36   : > { %v587_v55 = vsub.s32 %v1047_v59, %v586_v50  ;;  %v616_v59 = vsub.s32 %v1054_v5, %v615_v61 }
  0x38   : > { %vm620_vm10 = vcmp.ne.s32.totalorder %v587_v55, 0  ;;  %vm623_vm11 = vcmp.lt.s32.totalorder %v587_v55, 0  ;;  %v629_v1 = vadd.s32 5, %v587_v55  ;;  %vm621_vm1 = vcmp.ne.s32.totalorder %v616_v59, 0 }
  0x39   : > { %vm626_vm14 = vmand %vm623_vm11, %vm620_vm10  ;;  %vm624_vm2 = vcmp.lt.s32.totalorder %v616_v59, 0  ;;  %v630_v12 = vadd.s32 5, %v616_v59 }
  0x3a   : > { %v632_v58 = vsel %vm626_vm14, %v629_v1, %v587_v55  ;;  %vm627_vm5 = vmand %vm624_vm2, %vm621_vm1 }
  0x3b   : > { %vm635_vm3 = vcmp.ne.s32.totalorder %v632_v58, 4  ;;  %v633_v19 = vsel %vm627_vm5, %v630_v12, %v616_v59 }
  0x3c   : > { %v893_v16 = vsel %vm635_vm3, 1.0, %v936_v15  ;;  %vm636_vm6 = vcmp.ne.s32.totalorder %v633_v19, 4 }
  0x3d   : > { %v894_v30 = vsel %vm636_vm6, 1.0, %v936_v15 }
  0x98   : > { %v301_v52 = vpop.f32.mrf.mxu0 }
  0x99   : > { %v351_v53 = vpop.f32.mrf.mxu1 }
  0x9a   : > { %v352_v60 = vadd.f32 %v351_v53, %v301_v52 }
  0xa0   : > { %v440_v63 = vpop.f32.mrf.mxu2  ;;  %v303_v0 = vpop.f32.mrf.mxu0 }
  0xa1   : > { %v508_v62 = vpop.f32.mrf.mxu3  ;;  %v449_v2 = vadd.f32 %v440_v63, %v352_v60  ;;  %v353_v3 = vpop.f32.mrf.mxu1 }
  0xa2   : > { %v354_v9 = vadd.f32 %v353_v3, %v303_v0 }
  0xa3   : > { %v517_v6 = vadd.f32 %v508_v62, %v449_v2 }
  0xa5   : > { %v520_v7 = vpack.c.bf16 %v517_v6, %v517_v6  ;;  %v643_v23 = vmul.f32 %v892_v18, %v517_v6 }
  0xa7   : > { %524 = vst.msk [vmem:[%s1065_s6] sm:$0xf] %vm523_vm0, %v520_v7  ;;  %v660_v31 = vmul.f32 %v643_v23, %v517_v6  ;;  %v647_v34 = vsel %vm646_vm7, %v643_v23, 0.0 }
  0xa8   : > { %v442_v5 = vpop.f32.mrf.mxu2  ;;  %v306_v11 = vpop.f32.mrf.mxu0 }
  0xa9   : > { %v510_v10 = vpop.f32.mrf.mxu3  ;;  %v450_v13 = vadd.f32 %v442_v5, %v354_v9  ;;  %v356_v14 = vpop.f32.mrf.mxu1  ;;  %v663_v39 = vsel %vm646_vm7, %v660_v31, 0.0 }
  0xaa   : > { %v357_v22 = vadd.f32 %v356_v14, %v306_v11 }
  0xab   : > { %v518_v17 = vadd.f32 %v510_v10, %v450_v13 }
  0xad   : > { %v521_v20 = vpack.c.bf16 %v518_v17, %v518_v17  ;;  %v644_v21 = vmul.f32 %v893_v16, %v518_v17 }
  0xaf   : > { %525 = vst.msk [vmem:[%s1065_s6 + $0x4] sm:$0xf] %vm523_vm0, %v521_v20  ;;  %v661_v27 = vmul.f32 %v644_v21, %v518_v17  ;;  %v648_v32 = vsel %vm646_vm7, %v644_v21, 0.0 }
  0xb0   : > { %v445_v25 = vpop.f32.mrf.mxu2  ;;  %v308_v26 = vpop.f32.mrf.mxu0  ;;  %v649_v38 = vadd.f32 %v648_v32, %v647_v34 }
  0xb1   : > { %v513_v24 = vpop.f32.mrf.mxu3  ;;  %v451_v28 = vadd.f32 %v445_v25, %v357_v22  ;;  %v358_v29 = vpop.f32.mrf.mxu1  ;;  %v664_v35 = vsel %vm646_vm7, %v661_v27, 0.0 }
  0xb2   : > { %v665_v43 = vadd.f32 %v664_v35, %v663_v39 }
  0xb3   : > { %v519_v33 = vadd.f32 %v513_v24, %v451_v28 }
  0xb5   : > { %v522_v36 = vpack.c.bf16 %v519_v33, %v519_v33  ;;  %v645_v37 = vmul.f32 %v894_v30, %v519_v33 }
  0xb7   : > { %527 = vst.msk [vmem:[%s1065_s6 + $0x8] sm:$0x3] %vm526_vm8, %v522_v36  ;;  %v650_v40 = vsel %vm523_vm0, %v645_v37, 0.0  ;;  %v662_v41 = vmul.f32 %v645_v37, %v519_v33 }
  0xb8   : > { %v651_v44 = vadd.f32 %v650_v40, %v649_v38  ;;  %v447_v45 = vpop.f32.mrf.mxu2 }
  0xb9   : > { %v515_v42 = vpop.f32.mrf.mxu3  ;;  %v666_v46 = vsel %vm523_vm0, %v662_v41, 0.0 }
  0xba   : > { %v652_v47 = vrot.slane %v651_v44, 4  ;;  %v667_v48 = vadd.f32 %v666_v46, %v665_v43 }
  0xbc   : > { %v653_v49 = vadd.f32 %v652_v47, %v651_v44  ;;  %v668_v50 = vrot.slane %v667_v48, 4 }
  0xbe   : > { %v654_v51 = vrot.slane %v653_v49, 2  ;;  %v669_v52 = vadd.f32 %v668_v50, %v667_v48 }
  0xc0   : > { %v655_v53 = vadd.f32 %v654_v51, %v653_v49  ;;  %v670_v54 = vrot.slane %v669_v52, 2 }
  0xc2   : > { %v656_v55 = vrot.slane %v655_v53, 1  ;;  %v671_v56 = vadd.f32 %v670_v54, %v669_v52 }
  0xc4   : > { %v657_v57 = vadd.f32 %v656_v55, %v655_v53  ;;  %v672_v60 = vrot.slane %v671_v56, 1 }
  0xc6   : > { %659 = vst.msk [vmem:[%s211_s9] sm:$0x1] %vm658_vm9, %v657_v57  ;;  %v673_v61 = vadd.f32 %v672_v60, %v671_v56 }
  0xc8   : > { %674 = vst.msk [vmem:[%s214_s12] sm:$0x1] %vm658_vm9, %v673_v61 }
  0xc9 PF: > { %s15_s15 = sadd.s32 1, %s933_s15  }
  0xca   : > { %p12_p4 = scmp.ge.s32.totalorder %s15_s15, 4  }
  0xcc   :  { %14 = sbr.rel (!%p12_p4) target bundleno = 1 (0x1), region = 85 }

</bundles_post_ra>
